<compile_context>
chip_gen: v7x
topology: tpu7x:2x2x1
jax: 0.10.0
libtpu: 0.0.40
codegen_flags: <defaults>
</compile_context>

<pallas_src>
import functools

import numpy as np

import jax
import jax.numpy as jnp
from jax.experimental import pallas as pl
from jax.experimental.pallas import tpu as pltpu


# ---------------------------------------------------------------------------
# Init-time weight preparation (pure host-side layout work, done once)
# ---------------------------------------------------------------------------
def _prep_conv_transpose(w_t, w_in):
    """Phase-decomposed ConvTranspose2d(k=3, s=2, p=1, output_padding=1) weights.

    Activations are laid out rows=(b, h), lanes=(w, c).  Returns three matrices of shape
    (w_in*c_in, 2*w_in*c_out) such that
        even output rows = x                @ g_even
        odd  output rows = x @ g_odd_same   + shift(+1)(x) @ g_odd_next
    where shift(+1)(x)[r] = x[r+1] within the same image (zero at the bottom edge).
    Column taps / output-column interleaving are folded into the matrices.
    """
    c_in, c_out = w_t.shape[0], w_t.shape[1]
    l_in, l_out = w_in * c_in, 2 * w_in * c_out
    mats = {kh: np.zeros((l_in, l_out), np.float32) for kh in range(3)}
    for kh in range(3):
        g = mats[kh]
        for n in range(w_in):
            # ow = 2n   (even): kw=1, iw=n
            g[n * c_in:(n + 1) * c_in, (2 * n) * c_out:(2 * n + 1) * c_out] += w_t[:, :, kh, 1]
            # ow = 2n+1 (odd) : kw=2, iw=n
            g[n * c_in:(n + 1) * c_in, (2 * n + 1) * c_out:(2 * n + 2) * c_out] += w_t[:, :, kh, 2]
            # ow = 2n+1 (odd) : kw=0, iw=n+1 (past the right edge -> zero, skip)
            if n + 1 < w_in:
                g[(n + 1) * c_in:(n + 2) * c_in,
                  (2 * n + 1) * c_out:(2 * n + 2) * c_out] += w_t[:, :, kh, 0]
    # kh=1 -> even output rows (ih=m); kh=2 -> odd rows from ih=m; kh=0 -> odd rows from ih=m+1
    return mats[1], mats[2], mats[0]


def _prep_conv3x3(w_c, width):
    """Conv2d(k=3, s=1, p=1) weights as three lane-space matrices (one per kh row tap)."""
    c_out, c_in = w_c.shape[0], w_c.shape[1]
    mats = []
    for kh in range(3):
        f = np.zeros((width * c_in, width * c_out), np.float32)
        for ow in range(width):
            for kw in range(3):
                iw = ow - 1 + kw
                if 0 <= iw < width:
                    f[iw * c_in:(iw + 1) * c_in, ow * c_out:(ow + 1) * c_out] += w_c[:, :, kh, kw].T
        mats.append(f)
    return mats


def prepare_params(params):
    """Convert PyTorch-layout parameters into kernel-ready matrices (done once at init)."""
    cd = params["conv_dims"]
    hidden = params["lin_w"].shape[0]
    c0 = cd[0]

    # Linear: permute output columns from NCHW (c, h, w) order to NHWC (h, w, c) order.
    lw = np.asarray(params["lin_w"], np.float32).reshape(hidden, c0, 2, 2)
    lw = np.transpose(lw, (0, 2, 3, 1)).reshape(hidden, 4 * c0)
    lb = np.asarray(params["lin_b"], np.float32).reshape(c0, 2, 2)
    lb = np.transpose(lb, (1, 2, 0)).reshape(1, 4 * c0)

    prep = {"conv_dims": list(cd),
            "lin_w": jnp.asarray(lw),
            "lin_b": jnp.asarray(lb),
            "ct": []}

    # Conv-transpose stack (the model layers + the final-layer conv-transpose).
    # NOTE: the ConvTranspose2d biases are intentionally dropped: they are added per output
    # channel *before* batch-stats BatchNorm and are exactly cancelled by the mean subtraction.
    specs = [(lyr["w"], lyr["gamma"], lyr["beta"]) for lyr in params["layers"]]
    fin = params["final"]
    specs.append((fin["ct_w"], fin["gamma"], fin["beta"]))

    w_in = 2
    for w_t, gamma, beta in specs:
        w_np = np.asarray(w_t, np.float32)
        c_out = w_np.shape[1]
        g_e, g_o0, g_o1 = _prep_conv_transpose(w_np, w_in)
        w_out = 2 * w_in
        gamma_l = np.tile(np.asarray(gamma, np.float32).reshape(1, c_out), (1, w_out))
        beta_l = np.tile(np.asarray(beta, np.float32).reshape(1, c_out), (1, w_out))
        prep["ct"].append({"g_e": jnp.asarray(g_e),
                           "g_o0": jnp.asarray(g_o0),
                           "g_o1": jnp.asarray(g_o1),
                           "gamma_l": jnp.asarray(gamma_l),
                           "beta_l": jnp.asarray(beta_l)})
        w_in = w_out

    # Final Conv2d(k=3, p=1, C_out=1) + bias (kept: no BN follows it).
    w_c = np.asarray(fin["c_w"], np.float32)
    f0, f1, f2 = _prep_conv3x3(w_c, w_in)
    cb = np.full((1, w_in), float(np.asarray(fin["c_b"]).reshape(-1)[0]), np.float32)
    prep["f0"], prep["f1"], prep["f2"] = jnp.asarray(f0), jnp.asarray(f1), jnp.asarray(f2)
    prep["conv_bias"] = jnp.asarray(cb)
    prep["h_final"] = w_in
    return prep


# ---------------------------------------------------------------------------
# The fused Pallas kernel: whole decoder forward, activations VMEM-resident.
# Activation layout inside the kernel: rows = (b, h), lanes = (w, c).
# ---------------------------------------------------------------------------
def _decoder_kernel(B, cd, eps, *refs):
    f32 = jnp.float32
    n_ct = len(cd)
    chans = list(cd[1:]) + [cd[-1]]          # output channels of each conv-transpose layer

    z_ref, lw_ref, lb_ref = refs[0:3]
    pos = 3
    ct_refs = []
    for _ in range(n_ct):
        ct_refs.append(refs[pos:pos + 5])
        pos += 5
    f0_ref, f1_ref, f2_ref, cb_ref = refs[pos:pos + 4]
    out_ref = refs[pos + 4]

    def mm(a, b):
        return jnp.dot(a, b, preferred_element_type=f32)

    def iota2(shape, dim):
        return jax.lax.broadcasted_iota(jnp.int32, shape, dim)

    def shift_rows(x, h, delta):
        # rows are (b, m), m in [0, h).  Returns xs with xs[r] = x[r + delta] when m + delta
        # stays inside the same image, else 0 (spatial zero padding).  Implemented as a tiny
        # 0/1 matmul so no unsupported scatter/strided ops are needed.
        R = x.shape[0]
        out_r = iota2((R, R), 0)
        in_r = iota2((R, R), 1)
        m = out_r % h
        valid = (in_r == out_r + delta) & (m + delta >= 0) & (m + delta <= h - 1)
        return mm(valid.astype(f32), x)

    def interleave_rows(y_even, y_odd):
        # out[2r] = y_even[r], out[2r+1] = y_odd[r]
        R = y_even.shape[0]
        out_r = iota2((2 * R, R), 0)
        in_r = iota2((2 * R, R), 1)
        p_e = (out_r == 2 * in_r).astype(f32)
        p_o = (out_r == 2 * in_r + 1).astype(f32)
        return mm(p_e, y_even) + mm(p_o, y_odd)

    def lane_pool_sum(v, c):
        # v: (1, w*c), lanes ordered (w, c); sum over the w blocks -> (1, c)
        w = v.shape[1] // c
        acc = v[:, 0:c]
        for j in range(1, w):
            acc = acc + v[:, j * c:(j + 1) * c]
        return acc

    def lane_tile(v, reps):
        return jnp.concatenate([v] * reps, axis=1)

    def bn_relu(y, c, gamma_l, beta_l):
        # Training-mode BatchNorm2d (per-channel batch mean / biased variance) + ReLU.
        R, L = y.shape
        w = L // c
        count = float(R * w)
        mean_l = lane_tile(lane_pool_sum(jnp.sum(y, axis=0, keepdims=True), c) / count, w)
        cent = y - mean_l                                   # reused for var and normalization
        var_c = lane_pool_sum(jnp.sum(cent * cent, axis=0, keepdims=True), c) / count
        inv_l = lane_tile(jax.lax.rsqrt(var_c + eps), w)
        return jnp.maximum(cent * inv_l * gamma_l + beta_l, 0.0)

    # ---- input Linear, re-laid out to rows=(b, h), lanes=(w, c) ----
    y0 = mm(z_ref[...], lw_ref[...]) + lb_ref[...]          # (B, 2*2*c0), lanes (h, w, c)
    half = 2 * cd[0]                                        # one h-row worth of (w, c) lanes
    x = interleave_rows(y0[:, :half], y0[:, half:2 * half])  # (2B, 2*c0)
    h = 2

    # ---- ConvTranspose2d(k3,s2,p1,op1) + BN + ReLU stack (incl. the final-layer convT) ----
    for (g_e, g_o0, g_o1, gamma_l, beta_l), c_out in zip(ct_refs, chans):
        x_next = shift_rows(x, h, +1)                       # input row m+1 (bottom zero-pad)
        y_even = mm(x, g_e[...])
        y_odd = mm(x, g_o0[...]) + mm(x_next, g_o1[...])
        y = interleave_rows(y_even, y_odd)                  # (B*2h, 2w*c_out)
        h = 2 * h
        x = bn_relu(y, c_out, gamma_l[...], beta_l[...])

    # ---- final Conv2d(k3, s1, p1, C_out=1) + Sigmoid ----
    x_m1 = shift_rows(x, h, -1)                             # input row oh-1
    x_p1 = shift_rows(x, h, +1)                             # input row oh+1
    y = mm(x_m1, f0_ref[...]) + mm(x, f1_ref[...]) + mm(x_p1, f2_ref[...]) + cb_ref[...]
    y = jax.nn.sigmoid(y)                                   # (B*h, h)   (square image, 1 chan)

    # ---- repack rows -> lanes so the single HBM store is lane-dense: (B, h*w) ----
    R = B * h
    out_b = iota2((B, R), 0)
    in_r = iota2((B, R), 1)
    pieces = []
    for oh in range(h):
        sel = (in_r == out_b * h + oh).astype(f32)          # picks row (b, oh) for output row b
        pieces.append(mm(sel, y))                           # (B, w)
    out_ref[...] = jnp.concatenate(pieces, axis=1).astype(out_ref.dtype)


def decoder_forward(prep, z):
    """z: (B, hidden_dim) -> (B, 1, H, W)  (NCHW, matching PyTorch)."""
    cd = prep["conv_dims"]
    B = z.shape[0]
    h_f = prep["h_final"]

    args = [z.astype(jnp.float32), prep["lin_w"], prep["lin_b"]]
    for lyr in prep["ct"]:
        args += [lyr["g_e"], lyr["g_o0"], lyr["g_o1"], lyr["gamma_l"], lyr["beta_l"]]
    args += [prep["f0"], prep["f1"], prep["f2"], prep["conv_bias"]]

    in_specs = [pl.BlockSpec(a.shape, lambda i: (0, 0)) for a in args]
    out_spec = pl.BlockSpec((B, h_f * h_f), lambda i: (0, 0))

    kernel = functools.partial(_decoder_kernel, B, tuple(cd), 1e-5)
    y = pl.pallas_call(
        kernel,
        out_shape=jax.ShapeDtypeStruct((B, h_f * h_f), jnp.float32),
        grid=(1,),
        in_specs=in_specs,
        out_specs=out_spec,
        compiler_params=pltpu.CompilerParams(dimension_semantics=("arbitrary",)),
    )(*args)
    return y.reshape(B, 1, h_f, h_f)


# ---------------------------------------------------------------------------
# Parameter init (PyTorch-native layouts) + pure-JAX reference for validation
# ---------------------------------------------------------------------------
def init_params(key, hidden_dim, conv_dims):
    cd = list(reversed(conv_dims))            # __init__ does conv_dims.reverse()
    keys = iter(jax.random.split(key, 64))

    def nrm(shape, scale=0.1):
        return scale * jax.random.normal(next(keys), shape, jnp.float32)

    params = {
        "conv_dims": cd,
        "lin_w": nrm((hidden_dim, cd[0] * 4)),
        "lin_b": nrm((cd[0] * 4,)),
        "layers": [],
    }
    for i in range(len(cd) - 1):
        params["layers"].append({
            "w": nrm((cd[i], cd[i + 1], 3, 3)),      # ConvTranspose2d weight layout
            "b": nrm((cd[i + 1],)),                  # cancelled by BN; used by the reference only
            "gamma": 1.0 + nrm((cd[i + 1],), 0.05),
            "beta": nrm((cd[i + 1],), 0.05),
        })
    params["final"] = {
        "ct_w": nrm((cd[-1], cd[-1], 3, 3)),
        "ct_b": nrm((cd[-1],)),
        "gamma": 1.0 + nrm((cd[-1],), 0.05),
        "beta": nrm((cd[-1],), 0.05),
        "c_w": nrm((1, cd[-1], 3, 3)),               # Conv2d weight layout
        "c_b": nrm((1,)),
    }
    return params


def decoder_reference(params, z):
    """Pure-JAX (XLA) reference of the PyTorch Decoder forward (training-mode BN)."""
    cd = params["conv_dims"]
    B = z.shape[0]
    hp = jax.lax.Precision.HIGHEST

    x = jnp.dot(z, params["lin_w"], precision=hp) + params["lin_b"]
    x = x.reshape(B, cd[0], 2, 2)                    # NCHW

    def conv_t(x, w_t, b):                           # ConvTranspose2d(k3,s2,p1,op1)
        Bq, c_in, H, W = x.shape
        c_out = w_t.shape[1]
        y = jnp.zeros((Bq, c_out, 2 * H, 2 * W), jnp.float32)
        for kh in range(3):
            for kw in range(3):
                t = jnp.einsum('bchw,cd->bdhw', x, w_t[:, :, kh, kw], precision=hp)
                ih0 = 1 if kh == 0 else 0
                iw0 = 1 if kw == 0 else 0
                oh0 = 2 * ih0 + kh - 1
                ow0 = 2 * iw0 + kw - 1
                nh, nw = H - ih0, W - iw0
                y = y.at[:, :, oh0:oh0 + 2 * nh:2, ow0:ow0 + 2 * nw:2].add(t[:, :, ih0:, iw0:])
        return y + b.reshape(1, -1, 1, 1)

    def bn_relu(y, gamma, beta, eps=1e-5):
        mean = jnp.mean(y, axis=(0, 2, 3), keepdims=True)
        var = jnp.mean((y - mean) ** 2, axis=(0, 2, 3), keepdims=True)
        yn = (y - mean) * jax.lax.rsqrt(var + eps)
        return jnp.maximum(yn * gamma.reshape(1, -1, 1, 1) + beta.reshape(1, -1, 1, 1), 0.0)

    for lyr in params["layers"]:
        x = bn_relu(conv_t(x, lyr["w"], lyr["b"]), lyr["gamma"], lyr["beta"])
    fin = params["final"]
    x = bn_relu(conv_t(x, fin["ct_w"], fin["ct_b"]), fin["gamma"], fin["beta"])

    Bq, c_in, H, W = x.shape
    xp = jnp.pad(x, ((0, 0), (0, 0), (1, 1), (1, 1)))
    y = jnp.zeros((Bq, 1, H, W), jnp.float32)
    for kh in range(3):
        for kw in range(3):
            y = y + jnp.einsum('bchw,dc->bdhw', xp[:, :, kh:kh + H, kw:kw + W],
                               fin["c_w"][:, :, kh, kw], precision=hp)
    return jax.nn.sigmoid(y + fin["c_b"].reshape(1, -1, 1, 1))


if __name__ == "__main__":
    key = jax.random.PRNGKey(0)
    hidden_dim = 32
    conv_dims = [8, 16, 32]        # as passed to __init__; module reverses -> [32, 16, 8]
    B = 2

    params = init_params(key, hidden_dim, conv_dims)
    prep = prepare_params(params)
    z = jax.random.normal(jax.random.fold_in(key, 999), (B, hidden_dim), jnp.float32)

    out = decoder_forward(prep, z)
    out = jax.block_until_ready(out)

    # 2x2 -> 4 -> 8 (model) -> 16 (final convT); Conv2d keeps 16x16, 1 channel.
    assert out.shape == (B, 1, 16, 16), out.shape
    assert bool(jnp.all((out >= 0.0) & (out <= 1.0)))          # sigmoid range

    ref = decoder_reference(params, z)
    max_err = float(jnp.max(jnp.abs(out - ref)))
    assert max_err < 1e-2, max_err                              # typical observed error ~1e-6

    print("KERNEL_OK")
</pallas_src>

<mosaic_0001>
module attributes {stable_mosaic.version = 11 : i64} {
  func.func @_decoder_kernel(%arg0: i32, %arg1: memref<2x32xf32, #tpu.memory_space<vmem>>, %arg2: memref<32x128xf32, #tpu.memory_space<vmem>>, %arg3: memref<1x128xf32, #tpu.memory_space<vmem>>, %arg4: memref<64x64xf32, #tpu.memory_space<vmem>>, %arg5: memref<64x64xf32, #tpu.memory_space<vmem>>, %arg6: memref<64x64xf32, #tpu.memory_space<vmem>>, %arg7: memref<1x64xf32, #tpu.memory_space<vmem>>, %arg8: memref<1x64xf32, #tpu.memory_space<vmem>>, %arg9: memref<64x64xf32, #tpu.memory_space<vmem>>, %arg10: memref<64x64xf32, #tpu.memory_space<vmem>>, %arg11: memref<64x64xf32, #tpu.memory_space<vmem>>, %arg12: memref<1x64xf32, #tpu.memory_space<vmem>>, %arg13: memref<1x64xf32, #tpu.memory_space<vmem>>, %arg14: memref<64x128xf32, #tpu.memory_space<vmem>>, %arg15: memref<64x128xf32, #tpu.memory_space<vmem>>, %arg16: memref<64x128xf32, #tpu.memory_space<vmem>>, %arg17: memref<1x128xf32, #tpu.memory_space<vmem>>, %arg18: memref<1x128xf32, #tpu.memory_space<vmem>>, %arg19: memref<128x16xf32, #tpu.memory_space<vmem>>, %arg20: memref<128x16xf32, #tpu.memory_space<vmem>>, %arg21: memref<128x16xf32, #tpu.memory_space<vmem>>, %arg22: memref<1x16xf32, #tpu.memory_space<vmem>>, %arg23: memref<2x256xf32, #tpu.memory_space<vmem>>) attributes {dimension_semantics = [#tpu.dimension_semantics<arbitrary>], iteration_bounds = array<i64: 1>, scalar_prefetch = 0 : i64, scratch_operands = 0 : i64, tpu.core_type = #tpu.core_type<tc>, window_params = [{pipeline_mode = #tpu.pipeline_mode<synchronous>, transform_indices = @transform_0, window_bounds = array<i64: 2, 32>}, {pipeline_mode = #tpu.pipeline_mode<synchronous>, transform_indices = @transform_1, window_bounds = array<i64: 32, 128>}, {pipeline_mode = #tpu.pipeline_mode<synchronous>, transform_indices = @transform_2, window_bounds = array<i64: 1, 128>}, {pipeline_mode = #tpu.pipeline_mode<synchronous>, transform_indices = @transform_3, window_bounds = array<i64: 64, 64>}, {pipeline_mode = #tpu.pipeline_mode<synchronous>, transform_indices = @transform_4, window_bounds = array<i64: 64, 64>}, {pipeline_mode = #tpu.pipeline_mode<synchronous>, transform_indices = @transform_5, window_bounds = array<i64: 64, 64>}, {pipeline_mode = #tpu.pipeline_mode<synchronous>, transform_indices = @transform_6, window_bounds = array<i64: 1, 64>}, {pipeline_mode = #tpu.pipeline_mode<synchronous>, transform_indices = @transform_7, window_bounds = array<i64: 1, 64>}, {pipeline_mode = #tpu.pipeline_mode<synchronous>, transform_indices = @transform_8, window_bounds = array<i64: 64, 64>}, {pipeline_mode = #tpu.pipeline_mode<synchronous>, transform_indices = @transform_9, window_bounds = array<i64: 64, 64>}, {pipeline_mode = #tpu.pipeline_mode<synchronous>, transform_indices = @transform_10, window_bounds = array<i64: 64, 64>}, {pipeline_mode = #tpu.pipeline_mode<synchronous>, transform_indices = @transform_11, window_bounds = array<i64: 1, 64>}, {pipeline_mode = #tpu.pipeline_mode<synchronous>, transform_indices = @transform_12, window_bounds = array<i64: 1, 64>}, {pipeline_mode = #tpu.pipeline_mode<synchronous>, transform_indices = @transform_13, window_bounds = array<i64: 64, 128>}, {pipeline_mode = #tpu.pipeline_mode<synchronous>, transform_indices = @transform_14, window_bounds = array<i64: 64, 128>}, {pipeline_mode = #tpu.pipeline_mode<synchronous>, transform_indices = @transform_15, window_bounds = array<i64: 64, 128>}, {pipeline_mode = #tpu.pipeline_mode<synchronous>, transform_indices = @transform_16, window_bounds = array<i64: 1, 128>}, {pipeline_mode = #tpu.pipeline_mode<synchronous>, transform_indices = @transform_17, window_bounds = array<i64: 1, 128>}, {pipeline_mode = #tpu.pipeline_mode<synchronous>, transform_indices = @transform_18, window_bounds = array<i64: 128, 16>}, {pipeline_mode = #tpu.pipeline_mode<synchronous>, transform_indices = @transform_19, window_bounds = array<i64: 128, 16>}, {pipeline_mode = #tpu.pipeline_mode<synchronous>, transform_indices = @transform_20, window_bounds = array<i64: 128, 16>}, {pipeline_mode = #tpu.pipeline_mode<synchronous>, transform_indices = @transform_21, window_bounds = array<i64: 1, 16>}, {pipeline_mode = #tpu.pipeline_mode<synchronous>, transform_indices = @transform_22, window_bounds = array<i64: 2, 256>}]} {
    %c0 = arith.constant 0 : index
    %c0_0 = arith.constant 0 : index
    %0 = vector.load %arg1[%c0, %c0_0] : memref<2x32xf32, #tpu.memory_space<vmem>>, vector<2x32xf32>
    %c0_1 = arith.constant 0 : index
    %c0_2 = arith.constant 0 : index
    %1 = vector.load %arg2[%c0_1, %c0_2] : memref<32x128xf32, #tpu.memory_space<vmem>>, vector<32x128xf32>
    %cst = arith.constant dense<0.000000e+00> : vector<2x128xf32>
    %2 = tpu.matmul %0, %1, %cst {dimension_numbers = #tpu.dot_dimension_numbers<[1], [0], [0], [1], [0, 0, 1, 1], [], []>} : vector<2x32xf32>, vector<32x128xf32>, vector<2x128xf32> -> vector<2x128xf32>
    %c0_3 = arith.constant 0 : index
    %c0_4 = arith.constant 0 : index
    %3 = vector.load %arg3[%c0_3, %c0_4] : memref<1x128xf32, #tpu.memory_space<vmem>>, vector<1x128xf32>
    %4 = vector.broadcast %3 : vector<1x128xf32> to vector<2x128xf32>
    %5 = arith.addf %2, %4 : vector<2x128xf32>
    %6 = vector.extract_strided_slice %5 {offsets = [0, 0], sizes = [2, 64], strides = [1, 1]} : vector<2x128xf32> to vector<2x64xf32>
    %7 = vector.extract_strided_slice %5 {offsets = [0, 64], sizes = [2, 64], strides = [1, 1]} : vector<2x128xf32> to vector<2x64xf32>
    %8 = tpu.iota {dimensions = array<i32: 0>} : vector<4x2xi32>
    %9 = tpu.iota {dimensions = array<i32: 1>} : vector<4x2xi32>
    %c2_i32 = arith.constant 2 : i32
    %10 = vector.broadcast %c2_i32 : i32 to vector<4x2xi32>
    %11 = arith.muli %10, %9 : vector<4x2xi32>
    %12 = arith.cmpi eq, %8, %11 : vector<4x2xi32>
    %13 = arith.extui %12 : vector<4x2xi1> to vector<4x2xi32>
    %14 = arith.sitofp %13 : vector<4x2xi32> to vector<4x2xf32>
    %c2_i32_5 = arith.constant 2 : i32
    %15 = vector.broadcast %c2_i32_5 : i32 to vector<4x2xi32>
    %16 = arith.muli %15, %9 : vector<4x2xi32>
    %c1_i32 = arith.constant 1 : i32
    %17 = vector.broadcast %c1_i32 : i32 to vector<4x2xi32>
    %18 = arith.addi %16, %17 : vector<4x2xi32>
    %19 = arith.cmpi eq, %8, %18 : vector<4x2xi32>
    %20 = arith.extui %19 : vector<4x2xi1> to vector<4x2xi32>
    %21 = arith.sitofp %20 : vector<4x2xi32> to vector<4x2xf32>
    %cst_6 = arith.constant dense<0.000000e+00> : vector<4x64xf32>
    %22 = tpu.matmul %14, %6, %cst_6 {dimension_numbers = #tpu.dot_dimension_numbers<[1], [0], [0], [1], [0, 0, 1, 1], [], []>} : vector<4x2xf32>, vector<2x64xf32>, vector<4x64xf32> -> vector<4x64xf32>
    %cst_7 = arith.constant dense<0.000000e+00> : vector<4x64xf32>
    %23 = tpu.matmul %21, %7, %cst_7 {dimension_numbers = #tpu.dot_dimension_numbers<[1], [0], [0], [1], [0, 0, 1, 1], [], []>} : vector<4x2xf32>, vector<2x64xf32>, vector<4x64xf32> -> vector<4x64xf32>
    %24 = arith.addf %22, %23 : vector<4x64xf32>
    %25 = tpu.iota {dimensions = array<i32: 0>} : vector<4x4xi32>
    %26 = tpu.iota {dimensions = array<i32: 1>} : vector<4x4xi32>
    %c2_i32_8 = arith.constant 2 : i32
    %c0_i32 = arith.constant 0 : i32
    %27 = arith.cmpi eq, %c2_i32_8, %c0_i32 : i32
    %c1_i32_9 = arith.constant 1 : i32
    %28 = arith.select %27, %c1_i32_9, %c2_i32_8 : i32
    %29 = vector.broadcast %28 : i32 to vector<4x4xi32>
    %30 = arith.remsi %25, %29 : vector<4x4xi32>
    %c0_i32_10 = arith.constant 0 : i32
    %31 = vector.broadcast %c0_i32_10 : i32 to vector<4x4xi32>
    %32 = arith.cmpi ne, %30, %31 : vector<4x4xi32>
    %c0_i32_11 = arith.constant 0 : i32
    %33 = vector.broadcast %c0_i32_11 : i32 to vector<4x4xi32>
    %34 = arith.cmpi slt, %30, %33 : vector<4x4xi32>
    %c0_i32_12 = arith.constant 0 : i32
    %35 = arith.cmpi slt, %28, %c0_i32_12 : i32
    %36 = vector.broadcast %35 : i1 to vector<4x4xi1>
    %37 = vector.broadcast %36 : vector<4x4xi1> to vector<4x4xi1>
    %38 = arith.xori %34, %37 : vector<4x4xi1>
    %39 = arith.andi %38, %32 : vector<4x4xi1>
    %40 = vector.broadcast %28 : i32 to vector<4x4xi32>
    %41 = arith.addi %30, %40 : vector<4x4xi32>
    %42 = arith.select %39, %41, %30 : vector<4x4xi1>, vector<4x4xi32>
    %c1_i32_13 = arith.constant 1 : i32
    %43 = vector.broadcast %c1_i32_13 : i32 to vector<4x4xi32>
    %44 = arith.addi %25, %43 : vector<4x4xi32>
    %45 = arith.cmpi eq, %26, %44 : vector<4x4xi32>
    %c1_i32_14 = arith.constant 1 : i32
    %46 = vector.broadcast %c1_i32_14 : i32 to vector<4x4xi32>
    %47 = arith.addi %42, %46 : vector<4x4xi32>
    %c0_i32_15 = arith.constant 0 : i32
    %48 = vector.broadcast %c0_i32_15 : i32 to vector<4x4xi32>
    %49 = arith.cmpi sge, %47, %48 : vector<4x4xi32>
    %50 = arith.andi %45, %49 : vector<4x4xi1>
    %c1_i32_16 = arith.constant 1 : i32
    %51 = vector.broadcast %c1_i32_16 : i32 to vector<4x4xi32>
    %52 = arith.addi %42, %51 : vector<4x4xi32>
    %c1_i32_17 = arith.constant 1 : i32
    %53 = vector.broadcast %c1_i32_17 : i32 to vector<4x4xi32>
    %54 = arith.cmpi sle, %52, %53 : vector<4x4xi32>
    %55 = arith.andi %50, %54 : vector<4x4xi1>
    %56 = arith.extui %55 : vector<4x4xi1> to vector<4x4xi32>
    %57 = arith.sitofp %56 : vector<4x4xi32> to vector<4x4xf32>
    %cst_18 = arith.constant dense<0.000000e+00> : vector<4x64xf32>
    %58 = tpu.matmul %57, %24, %cst_18 {dimension_numbers = #tpu.dot_dimension_numbers<[1], [0], [0], [1], [0, 0, 1, 1], [], []>} : vector<4x4xf32>, vector<4x64xf32>, vector<4x64xf32> -> vector<4x64xf32>
    %c0_19 = arith.constant 0 : index
    %c0_20 = arith.constant 0 : index
    %59 = vector.load %arg4[%c0_19, %c0_20] : memref<64x64xf32, #tpu.memory_space<vmem>>, vector<64x64xf32>
    %cst_21 = arith.constant dense<0.000000e+00> : vector<4x64xf32>
    %60 = tpu.matmul %24, %59, %cst_21 {dimension_numbers = #tpu.dot_dimension_numbers<[1], [0], [0], [1], [0, 0, 1, 1], [], []>} : vector<4x64xf32>, vector<64x64xf32>, vector<4x64xf32> -> vector<4x64xf32>
    %c0_22 = arith.constant 0 : index
    %c0_23 = arith.constant 0 : index
    %61 = vector.load %arg5[%c0_22, %c0_23] : memref<64x64xf32, #tpu.memory_space<vmem>>, vector<64x64xf32>
    %cst_24 = arith.constant dense<0.000000e+00> : vector<4x64xf32>
    %62 = tpu.matmul %24, %61, %cst_24 {dimension_numbers = #tpu.dot_dimension_numbers<[1], [0], [0], [1], [0, 0, 1, 1], [], []>} : vector<4x64xf32>, vector<64x64xf32>, vector<4x64xf32> -> vector<4x64xf32>
    %c0_25 = arith.constant 0 : index
    %c0_26 = arith.constant 0 : index
    %63 = vector.load %arg6[%c0_25, %c0_26] : memref<64x64xf32, #tpu.memory_space<vmem>>, vector<64x64xf32>
    %cst_27 = arith.constant dense<0.000000e+00> : vector<4x64xf32>
    %64 = tpu.matmul %58, %63, %cst_27 {dimension_numbers = #tpu.dot_dimension_numbers<[1], [0], [0], [1], [0, 0, 1, 1], [], []>} : vector<4x64xf32>, vector<64x64xf32>, vector<4x64xf32> -> vector<4x64xf32>
    %65 = arith.addf %62, %64 : vector<4x64xf32>
    %66 = tpu.iota {dimensions = array<i32: 0>} : vector<8x4xi32>
    %67 = tpu.iota {dimensions = array<i32: 1>} : vector<8x4xi32>
    %c2_i32_28 = arith.constant 2 : i32
    %68 = vector.broadcast %c2_i32_28 : i32 to vector<8x4xi32>
    %69 = arith.muli %68, %67 : vector<8x4xi32>
    %70 = arith.cmpi eq, %66, %69 : vector<8x4xi32>
    %71 = arith.extui %70 : vector<8x4xi1> to vector<8x4xi32>
    %72 = arith.sitofp %71 : vector<8x4xi32> to vector<8x4xf32>
    %c2_i32_29 = arith.constant 2 : i32
    %73 = vector.broadcast %c2_i32_29 : i32 to vector<8x4xi32>
    %74 = arith.muli %73, %67 : vector<8x4xi32>
    %c1_i32_30 = arith.constant 1 : i32
    %75 = vector.broadcast %c1_i32_30 : i32 to vector<8x4xi32>
    %76 = arith.addi %74, %75 : vector<8x4xi32>
    %77 = arith.cmpi eq, %66, %76 : vector<8x4xi32>
    %78 = arith.extui %77 : vector<8x4xi1> to vector<8x4xi32>
    %79 = arith.sitofp %78 : vector<8x4xi32> to vector<8x4xf32>
    %cst_31 = arith.constant dense<0.000000e+00> : vector<8x64xf32>
    %80 = tpu.matmul %72, %60, %cst_31 {dimension_numbers = #tpu.dot_dimension_numbers<[1], [0], [0], [1], [0, 0, 1, 1], [], []>} : vector<8x4xf32>, vector<4x64xf32>, vector<8x64xf32> -> vector<8x64xf32>
    %cst_32 = arith.constant dense<0.000000e+00> : vector<8x64xf32>
    %81 = tpu.matmul %79, %65, %cst_32 {dimension_numbers = #tpu.dot_dimension_numbers<[1], [0], [0], [1], [0, 0, 1, 1], [], []>} : vector<8x4xf32>, vector<4x64xf32>, vector<8x64xf32> -> vector<8x64xf32>
    %82 = arith.addf %80, %81 : vector<8x64xf32>
    %c0_33 = arith.constant 0 : index
    %c0_34 = arith.constant 0 : index
    %83 = vector.load %arg7[%c0_33, %c0_34] : memref<1x64xf32, #tpu.memory_space<vmem>>, vector<1x64xf32>
    %c0_35 = arith.constant 0 : index
    %c0_36 = arith.constant 0 : index
    %84 = vector.load %arg8[%c0_35, %c0_36] : memref<1x64xf32, #tpu.memory_space<vmem>>, vector<1x64xf32>
    %cst_37 = arith.constant dense<0.000000e+00> : vector<64xf32>
    %85 = vector.multi_reduction <add>, %82, %cst_37 [0] : vector<8x64xf32> to vector<64xf32>
    %86 = vector.shape_cast %85 : vector<64xf32> to vector<1x64xf32>
    %87 = vector.extract_strided_slice %86 {offsets = [0, 0], sizes = [1, 16], strides = [1, 1]} : vector<1x64xf32> to vector<1x16xf32>
    %88 = vector.extract_strided_slice %86 {offsets = [0, 16], sizes = [1, 16], strides = [1, 1]} : vector<1x64xf32> to vector<1x16xf32>
    %89 = arith.addf %87, %88 : vector<1x16xf32>
    %90 = vector.extract_strided_slice %86 {offsets = [0, 32], sizes = [1, 16], strides = [1, 1]} : vector<1x64xf32> to vector<1x16xf32>
    %91 = arith.addf %89, %90 : vector<1x16xf32>
    %92 = vector.extract_strided_slice %86 {offsets = [0, 48], sizes = [1, 16], strides = [1, 1]} : vector<1x64xf32> to vector<1x16xf32>
    %93 = arith.addf %91, %92 : vector<1x16xf32>
    %cst_38 = arith.constant 3.200000e+01 : f32
    %94 = vector.broadcast %cst_38 : f32 to vector<1x16xf32>
    %95 = arith.divf %93, %94 : vector<1x16xf32>
    %96 = tpu.concatenate %95, %95, %95, %95 in 1 : vector<1x16xf32>, vector<1x16xf32>, vector<1x16xf32>, vector<1x16xf32> -> vector<1x64xf32>
    %97 = vector.broadcast %96 : vector<1x64xf32> to vector<8x64xf32>
    %98 = arith.subf %82, %97 : vector<8x64xf32>
    %99 = arith.mulf %98, %98 : vector<8x64xf32>
    %cst_39 = arith.constant dense<0.000000e+00> : vector<64xf32>
    %100 = vector.multi_reduction <add>, %99, %cst_39 [0] : vector<8x64xf32> to vector<64xf32>
    %101 = vector.shape_cast %100 : vector<64xf32> to vector<1x64xf32>
    %102 = vector.extract_strided_slice %101 {offsets = [0, 0], sizes = [1, 16], strides = [1, 1]} : vector<1x64xf32> to vector<1x16xf32>
    %103 = vector.extract_strided_slice %101 {offsets = [0, 16], sizes = [1, 16], strides = [1, 1]} : vector<1x64xf32> to vector<1x16xf32>
    %104 = arith.addf %102, %103 : vector<1x16xf32>
    %105 = vector.extract_strided_slice %101 {offsets = [0, 32], sizes = [1, 16], strides = [1, 1]} : vector<1x64xf32> to vector<1x16xf32>
    %106 = arith.addf %104, %105 : vector<1x16xf32>
    %107 = vector.extract_strided_slice %101 {offsets = [0, 48], sizes = [1, 16], strides = [1, 1]} : vector<1x64xf32> to vector<1x16xf32>
    %108 = arith.addf %106, %107 : vector<1x16xf32>
    %cst_40 = arith.constant 3.200000e+01 : f32
    %109 = vector.broadcast %cst_40 : f32 to vector<1x16xf32>
    %110 = arith.divf %108, %109 : vector<1x16xf32>
    %cst_41 = arith.constant 9.99999974E-6 : f32
    %111 = vector.broadcast %cst_41 : f32 to vector<1x16xf32>
    %112 = arith.addf %110, %111 : vector<1x16xf32>
    %113 = math.rsqrt %112 : vector<1x16xf32>
    %114 = tpu.concatenate %113, %113, %113, %113 in 1 : vector<1x16xf32>, vector<1x16xf32>, vector<1x16xf32>, vector<1x16xf32> -> vector<1x64xf32>
    %115 = vector.broadcast %114 : vector<1x64xf32> to vector<8x64xf32>
    %116 = arith.mulf %98, %115 : vector<8x64xf32>
    %117 = vector.broadcast %83 : vector<1x64xf32> to vector<8x64xf32>
    %118 = arith.mulf %116, %117 : vector<8x64xf32>
    %119 = vector.broadcast %84 : vector<1x64xf32> to vector<8x64xf32>
    %120 = arith.addf %118, %119 : vector<8x64xf32>
    %cst_42 = arith.constant 0.000000e+00 : f32
    %121 = vector.broadcast %cst_42 : f32 to vector<8x64xf32>
    %122 = arith.maximumf %120, %121 : vector<8x64xf32>
    %123 = tpu.iota {dimensions = array<i32: 0>} : vector<8x8xi32>
    %124 = tpu.iota {dimensions = array<i32: 1>} : vector<8x8xi32>
    %c4_i32 = arith.constant 4 : i32
    %c0_i32_43 = arith.constant 0 : i32
    %125 = arith.cmpi eq, %c4_i32, %c0_i32_43 : i32
    %c1_i32_44 = arith.constant 1 : i32
    %126 = arith.select %125, %c1_i32_44, %c4_i32 : i32
    %127 = vector.broadcast %126 : i32 to vector<8x8xi32>
    %128 = arith.remsi %123, %127 : vector<8x8xi32>
    %c0_i32_45 = arith.constant 0 : i32
    %129 = vector.broadcast %c0_i32_45 : i32 to vector<8x8xi32>
    %130 = arith.cmpi ne, %128, %129 : vector<8x8xi32>
    %c0_i32_46 = arith.constant 0 : i32
    %131 = vector.broadcast %c0_i32_46 : i32 to vector<8x8xi32>
    %132 = arith.cmpi slt, %128, %131 : vector<8x8xi32>
    %c0_i32_47 = arith.constant 0 : i32
    %133 = arith.cmpi slt, %126, %c0_i32_47 : i32
    %134 = vector.broadcast %133 : i1 to vector<8x8xi1>
    %135 = vector.broadcast %134 : vector<8x8xi1> to vector<8x8xi1>
    %136 = arith.xori %132, %135 : vector<8x8xi1>
    %137 = arith.andi %136, %130 : vector<8x8xi1>
    %138 = vector.broadcast %126 : i32 to vector<8x8xi32>
    %139 = arith.addi %128, %138 : vector<8x8xi32>
    %140 = arith.select %137, %139, %128 : vector<8x8xi1>, vector<8x8xi32>
    %c1_i32_48 = arith.constant 1 : i32
    %141 = vector.broadcast %c1_i32_48 : i32 to vector<8x8xi32>
    %142 = arith.addi %123, %141 : vector<8x8xi32>
    %143 = arith.cmpi eq, %124, %142 : vector<8x8xi32>
    %c1_i32_49 = arith.constant 1 : i32
    %144 = vector.broadcast %c1_i32_49 : i32 to vector<8x8xi32>
    %145 = arith.addi %140, %144 : vector<8x8xi32>
    %c0_i32_50 = arith.constant 0 : i32
    %146 = vector.broadcast %c0_i32_50 : i32 to vector<8x8xi32>
    %147 = arith.cmpi sge, %145, %146 : vector<8x8xi32>
    %148 = arith.andi %143, %147 : vector<8x8xi1>
    %c1_i32_51 = arith.constant 1 : i32
    %149 = vector.broadcast %c1_i32_51 : i32 to vector<8x8xi32>
    %150 = arith.addi %140, %149 : vector<8x8xi32>
    %c3_i32 = arith.constant 3 : i32
    %151 = vector.broadcast %c3_i32 : i32 to vector<8x8xi32>
    %152 = arith.cmpi sle, %150, %151 : vector<8x8xi32>
    %153 = arith.andi %148, %152 : vector<8x8xi1>
    %154 = arith.extui %153 : vector<8x8xi1> to vector<8x8xi32>
    %155 = arith.sitofp %154 : vector<8x8xi32> to vector<8x8xf32>
    %cst_52 = arith.constant dense<0.000000e+00> : vector<8x64xf32>
    %156 = tpu.matmul %155, %122, %cst_52 {dimension_numbers = #tpu.dot_dimension_numbers<[1], [0], [0], [1], [0, 0, 1, 1], [], []>} : vector<8x8xf32>, vector<8x64xf32>, vector<8x64xf32> -> vector<8x64xf32>
    %c0_53 = arith.constant 0 : index
    %c0_54 = arith.constant 0 : index
    %157 = vector.load %arg9[%c0_53, %c0_54] : memref<64x64xf32, #tpu.memory_space<vmem>>, vector<64x64xf32>
    %cst_55 = arith.constant dense<0.000000e+00> : vector<8x64xf32>
    %158 = tpu.matmul %122, %157, %cst_55 {dimension_numbers = #tpu.dot_dimension_numbers<[1], [0], [0], [1], [0, 0, 1, 1], [], []>} : vector<8x64xf32>, vector<64x64xf32>, vector<8x64xf32> -> vector<8x64xf32>
    %c0_56 = arith.constant 0 : index
    %c0_57 = arith.constant 0 : index
    %159 = vector.load %arg10[%c0_56, %c0_57] : memref<64x64xf32, #tpu.memory_space<vmem>>, vector<64x64xf32>
    %cst_58 = arith.constant dense<0.000000e+00> : vector<8x64xf32>
    %160 = tpu.matmul %122, %159, %cst_58 {dimension_numbers = #tpu.dot_dimension_numbers<[1], [0], [0], [1], [0, 0, 1, 1], [], []>} : vector<8x64xf32>, vector<64x64xf32>, vector<8x64xf32> -> vector<8x64xf32>
    %c0_59 = arith.constant 0 : index
    %c0_60 = arith.constant 0 : index
    %161 = vector.load %arg11[%c0_59, %c0_60] : memref<64x64xf32, #tpu.memory_space<vmem>>, vector<64x64xf32>
    %cst_61 = arith.constant dense<0.000000e+00> : vector<8x64xf32>
    %162 = tpu.matmul %156, %161, %cst_61 {dimension_numbers = #tpu.dot_dimension_numbers<[1], [0], [0], [1], [0, 0, 1, 1], [], []>} : vector<8x64xf32>, vector<64x64xf32>, vector<8x64xf32> -> vector<8x64xf32>
    %163 = arith.addf %160, %162 : vector<8x64xf32>
    %164 = tpu.iota {dimensions = array<i32: 0>} : vector<16x8xi32>
    %165 = tpu.iota {dimensions = array<i32: 1>} : vector<16x8xi32>
    %c2_i32_62 = arith.constant 2 : i32
    %166 = vector.broadcast %c2_i32_62 : i32 to vector<16x8xi32>
    %167 = arith.muli %166, %165 : vector<16x8xi32>
    %168 = arith.cmpi eq, %164, %167 : vector<16x8xi32>
    %169 = arith.extui %168 : vector<16x8xi1> to vector<16x8xi32>
    %170 = arith.sitofp %169 : vector<16x8xi32> to vector<16x8xf32>
    %c2_i32_63 = arith.constant 2 : i32
    %171 = vector.broadcast %c2_i32_63 : i32 to vector<16x8xi32>
    %172 = arith.muli %171, %165 : vector<16x8xi32>
    %c1_i32_64 = arith.constant 1 : i32
    %173 = vector.broadcast %c1_i32_64 : i32 to vector<16x8xi32>
    %174 = arith.addi %172, %173 : vector<16x8xi32>
    %175 = arith.cmpi eq, %164, %174 : vector<16x8xi32>
    %176 = arith.extui %175 : vector<16x8xi1> to vector<16x8xi32>
    %177 = arith.sitofp %176 : vector<16x8xi32> to vector<16x8xf32>
    %cst_65 = arith.constant dense<0.000000e+00> : vector<16x64xf32>
    %178 = tpu.matmul %170, %158, %cst_65 {dimension_numbers = #tpu.dot_dimension_numbers<[1], [0], [0], [1], [0, 0, 1, 1], [], []>} : vector<16x8xf32>, vector<8x64xf32>, vector<16x64xf32> -> vector<16x64xf32>
    %cst_66 = arith.constant dense<0.000000e+00> : vector<16x64xf32>
    %179 = tpu.matmul %177, %163, %cst_66 {dimension_numbers = #tpu.dot_dimension_numbers<[1], [0], [0], [1], [0, 0, 1, 1], [], []>} : vector<16x8xf32>, vector<8x64xf32>, vector<16x64xf32> -> vector<16x64xf32>
    %180 = arith.addf %178, %179 : vector<16x64xf32>
    %c0_67 = arith.constant 0 : index
    %c0_68 = arith.constant 0 : index
    %181 = vector.load %arg12[%c0_67, %c0_68] : memref<1x64xf32, #tpu.memory_space<vmem>>, vector<1x64xf32>
    %c0_69 = arith.constant 0 : index
    %c0_70 = arith.constant 0 : index
    %182 = vector.load %arg13[%c0_69, %c0_70] : memref<1x64xf32, #tpu.memory_space<vmem>>, vector<1x64xf32>
    %cst_71 = arith.constant dense<0.000000e+00> : vector<64xf32>
    %183 = vector.multi_reduction <add>, %180, %cst_71 [0] : vector<16x64xf32> to vector<64xf32>
    %184 = vector.shape_cast %183 : vector<64xf32> to vector<1x64xf32>
    %185 = vector.extract_strided_slice %184 {offsets = [0, 0], sizes = [1, 8], strides = [1, 1]} : vector<1x64xf32> to vector<1x8xf32>
    %186 = vector.extract_strided_slice %184 {offsets = [0, 8], sizes = [1, 8], strides = [1, 1]} : vector<1x64xf32> to vector<1x8xf32>
    %187 = arith.addf %185, %186 : vector<1x8xf32>
    %188 = vector.extract_strided_slice %184 {offsets = [0, 16], sizes = [1, 8], strides = [1, 1]} : vector<1x64xf32> to vector<1x8xf32>
    %189 = arith.addf %187, %188 : vector<1x8xf32>
    %190 = vector.extract_strided_slice %184 {offsets = [0, 24], sizes = [1, 8], strides = [1, 1]} : vector<1x64xf32> to vector<1x8xf32>
    %191 = arith.addf %189, %190 : vector<1x8xf32>
    %192 = vector.extract_strided_slice %184 {offsets = [0, 32], sizes = [1, 8], strides = [1, 1]} : vector<1x64xf32> to vector<1x8xf32>
    %193 = arith.addf %191, %192 : vector<1x8xf32>
    %194 = vector.extract_strided_slice %184 {offsets = [0, 40], sizes = [1, 8], strides = [1, 1]} : vector<1x64xf32> to vector<1x8xf32>
    %195 = arith.addf %193, %194 : vector<1x8xf32>
    %196 = vector.extract_strided_slice %184 {offsets = [0, 48], sizes = [1, 8], strides = [1, 1]} : vector<1x64xf32> to vector<1x8xf32>
    %197 = arith.addf %195, %196 : vector<1x8xf32>
    %198 = vector.extract_strided_slice %184 {offsets = [0, 56], sizes = [1, 8], strides = [1, 1]} : vector<1x64xf32> to vector<1x8xf32>
    %199 = arith.addf %197, %198 : vector<1x8xf32>
    %cst_72 = arith.constant 1.280000e+02 : f32
    %200 = vector.broadcast %cst_72 : f32 to vector<1x8xf32>
    %201 = arith.divf %199, %200 : vector<1x8xf32>
    %202 = tpu.concatenate %201, %201, %201, %201, %201, %201, %201, %201 in 1 : vector<1x8xf32>, vector<1x8xf32>, vector<1x8xf32>, vector<1x8xf32>, vector<1x8xf32>, vector<1x8xf32>, vector<1x8xf32>, vector<1x8xf32> -> vector<1x64xf32>
    %203 = vector.broadcast %202 : vector<1x64xf32> to vector<16x64xf32>
    %204 = arith.subf %180, %203 : vector<16x64xf32>
    %205 = arith.mulf %204, %204 : vector<16x64xf32>
    %cst_73 = arith.constant dense<0.000000e+00> : vector<64xf32>
    %206 = vector.multi_reduction <add>, %205, %cst_73 [0] : vector<16x64xf32> to vector<64xf32>
    %207 = vector.shape_cast %206 : vector<64xf32> to vector<1x64xf32>
    %208 = vector.extract_strided_slice %207 {offsets = [0, 0], sizes = [1, 8], strides = [1, 1]} : vector<1x64xf32> to vector<1x8xf32>
    %209 = vector.extract_strided_slice %207 {offsets = [0, 8], sizes = [1, 8], strides = [1, 1]} : vector<1x64xf32> to vector<1x8xf32>
    %210 = arith.addf %208, %209 : vector<1x8xf32>
    %211 = vector.extract_strided_slice %207 {offsets = [0, 16], sizes = [1, 8], strides = [1, 1]} : vector<1x64xf32> to vector<1x8xf32>
    %212 = arith.addf %210, %211 : vector<1x8xf32>
    %213 = vector.extract_strided_slice %207 {offsets = [0, 24], sizes = [1, 8], strides = [1, 1]} : vector<1x64xf32> to vector<1x8xf32>
    %214 = arith.addf %212, %213 : vector<1x8xf32>
    %215 = vector.extract_strided_slice %207 {offsets = [0, 32], sizes = [1, 8], strides = [1, 1]} : vector<1x64xf32> to vector<1x8xf32>
    %216 = arith.addf %214, %215 : vector<1x8xf32>
    %217 = vector.extract_strided_slice %207 {offsets = [0, 40], sizes = [1, 8], strides = [1, 1]} : vector<1x64xf32> to vector<1x8xf32>
    %218 = arith.addf %216, %217 : vector<1x8xf32>
    %219 = vector.extract_strided_slice %207 {offsets = [0, 48], sizes = [1, 8], strides = [1, 1]} : vector<1x64xf32> to vector<1x8xf32>
    %220 = arith.addf %218, %219 : vector<1x8xf32>
    %221 = vector.extract_strided_slice %207 {offsets = [0, 56], sizes = [1, 8], strides = [1, 1]} : vector<1x64xf32> to vector<1x8xf32>
    %222 = arith.addf %220, %221 : vector<1x8xf32>
    %cst_74 = arith.constant 1.280000e+02 : f32
    %223 = vector.broadcast %cst_74 : f32 to vector<1x8xf32>
    %224 = arith.divf %222, %223 : vector<1x8xf32>
    %cst_75 = arith.constant 9.99999974E-6 : f32
    %225 = vector.broadcast %cst_75 : f32 to vector<1x8xf32>
    %226 = arith.addf %224, %225 : vector<1x8xf32>
    %227 = math.rsqrt %226 : vector<1x8xf32>
    %228 = tpu.concatenate %227, %227, %227, %227, %227, %227, %227, %227 in 1 : vector<1x8xf32>, vector<1x8xf32>, vector<1x8xf32>, vector<1x8xf32>, vector<1x8xf32>, vector<1x8xf32>, vector<1x8xf32>, vector<1x8xf32> -> vector<1x64xf32>
    %229 = vector.broadcast %228 : vector<1x64xf32> to vector<16x64xf32>
    %230 = arith.mulf %204, %229 : vector<16x64xf32>
    %231 = vector.broadcast %181 : vector<1x64xf32> to vector<16x64xf32>
    %232 = arith.mulf %230, %231 : vector<16x64xf32>
    %233 = vector.broadcast %182 : vector<1x64xf32> to vector<16x64xf32>
    %234 = arith.addf %232, %233 : vector<16x64xf32>
    %cst_76 = arith.constant 0.000000e+00 : f32
    %235 = vector.broadcast %cst_76 : f32 to vector<16x64xf32>
    %236 = arith.maximumf %234, %235 : vector<16x64xf32>
    %237 = tpu.iota {dimensions = array<i32: 0>} : vector<16x16xi32>
    %238 = tpu.iota {dimensions = array<i32: 1>} : vector<16x16xi32>
    %c8_i32 = arith.constant 8 : i32
    %c0_i32_77 = arith.constant 0 : i32
    %239 = arith.cmpi eq, %c8_i32, %c0_i32_77 : i32
    %c1_i32_78 = arith.constant 1 : i32
    %240 = arith.select %239, %c1_i32_78, %c8_i32 : i32
    %241 = vector.broadcast %240 : i32 to vector<16x16xi32>
    %242 = arith.remsi %237, %241 : vector<16x16xi32>
    %c0_i32_79 = arith.constant 0 : i32
    %243 = vector.broadcast %c0_i32_79 : i32 to vector<16x16xi32>
    %244 = arith.cmpi ne, %242, %243 : vector<16x16xi32>
    %c0_i32_80 = arith.constant 0 : i32
    %245 = vector.broadcast %c0_i32_80 : i32 to vector<16x16xi32>
    %246 = arith.cmpi slt, %242, %245 : vector<16x16xi32>
    %c0_i32_81 = arith.constant 0 : i32
    %247 = arith.cmpi slt, %240, %c0_i32_81 : i32
    %248 = vector.broadcast %247 : i1 to vector<16x16xi1>
    %249 = vector.broadcast %248 : vector<16x16xi1> to vector<16x16xi1>
    %250 = arith.xori %246, %249 : vector<16x16xi1>
    %251 = arith.andi %250, %244 : vector<16x16xi1>
    %252 = vector.broadcast %240 : i32 to vector<16x16xi32>
    %253 = arith.addi %242, %252 : vector<16x16xi32>
    %254 = arith.select %251, %253, %242 : vector<16x16xi1>, vector<16x16xi32>
    %c1_i32_82 = arith.constant 1 : i32
    %255 = vector.broadcast %c1_i32_82 : i32 to vector<16x16xi32>
    %256 = arith.addi %237, %255 : vector<16x16xi32>
    %257 = arith.cmpi eq, %238, %256 : vector<16x16xi32>
    %c1_i32_83 = arith.constant 1 : i32
    %258 = vector.broadcast %c1_i32_83 : i32 to vector<16x16xi32>
    %259 = arith.addi %254, %258 : vector<16x16xi32>
    %c0_i32_84 = arith.constant 0 : i32
    %260 = vector.broadcast %c0_i32_84 : i32 to vector<16x16xi32>
    %261 = arith.cmpi sge, %259, %260 : vector<16x16xi32>
    %262 = arith.andi %257, %261 : vector<16x16xi1>
    %c1_i32_85 = arith.constant 1 : i32
    %263 = vector.broadcast %c1_i32_85 : i32 to vector<16x16xi32>
    %264 = arith.addi %254, %263 : vector<16x16xi32>
    %c7_i32 = arith.constant 7 : i32
    %265 = vector.broadcast %c7_i32 : i32 to vector<16x16xi32>
    %266 = arith.cmpi sle, %264, %265 : vector<16x16xi32>
    %267 = arith.andi %262, %266 : vector<16x16xi1>
    %268 = arith.extui %267 : vector<16x16xi1> to vector<16x16xi32>
    %269 = arith.sitofp %268 : vector<16x16xi32> to vector<16x16xf32>
    %cst_86 = arith.constant dense<0.000000e+00> : vector<16x64xf32>
    %270 = tpu.matmul %269, %236, %cst_86 {dimension_numbers = #tpu.dot_dimension_numbers<[1], [0], [0], [1], [0, 0, 1, 1], [], []>} : vector<16x16xf32>, vector<16x64xf32>, vector<16x64xf32> -> vector<16x64xf32>
    %c0_87 = arith.constant 0 : index
    %c0_88 = arith.constant 0 : index
    %271 = vector.load %arg14[%c0_87, %c0_88] : memref<64x128xf32, #tpu.memory_space<vmem>>, vector<64x128xf32>
    %cst_89 = arith.constant dense<0.000000e+00> : vector<16x128xf32>
    %272 = tpu.matmul %236, %271, %cst_89 {dimension_numbers = #tpu.dot_dimension_numbers<[1], [0], [0], [1], [0, 0, 1, 1], [], []>} : vector<16x64xf32>, vector<64x128xf32>, vector<16x128xf32> -> vector<16x128xf32>
    %c0_90 = arith.constant 0 : index
    %c0_91 = arith.constant 0 : index
    %273 = vector.load %arg15[%c0_90, %c0_91] : memref<64x128xf32, #tpu.memory_space<vmem>>, vector<64x128xf32>
    %cst_92 = arith.constant dense<0.000000e+00> : vector<16x128xf32>
    %274 = tpu.matmul %236, %273, %cst_92 {dimension_numbers = #tpu.dot_dimension_numbers<[1], [0], [0], [1], [0, 0, 1, 1], [], []>} : vector<16x64xf32>, vector<64x128xf32>, vector<16x128xf32> -> vector<16x128xf32>
    %c0_93 = arith.constant 0 : index
    %c0_94 = arith.constant 0 : index
    %275 = vector.load %arg16[%c0_93, %c0_94] : memref<64x128xf32, #tpu.memory_space<vmem>>, vector<64x128xf32>
    %cst_95 = arith.constant dense<0.000000e+00> : vector<16x128xf32>
    %276 = tpu.matmul %270, %275, %cst_95 {dimension_numbers = #tpu.dot_dimension_numbers<[1], [0], [0], [1], [0, 0, 1, 1], [], []>} : vector<16x64xf32>, vector<64x128xf32>, vector<16x128xf32> -> vector<16x128xf32>
    %277 = arith.addf %274, %276 : vector<16x128xf32>
    %278 = tpu.iota {dimensions = array<i32: 0>} : vector<32x16xi32>
    %279 = tpu.iota {dimensions = array<i32: 1>} : vector<32x16xi32>
    %c2_i32_96 = arith.constant 2 : i32
    %280 = vector.broadcast %c2_i32_96 : i32 to vector<32x16xi32>
    %281 = arith.muli %280, %279 : vector<32x16xi32>
    %282 = arith.cmpi eq, %278, %281 : vector<32x16xi32>
    %283 = arith.extui %282 : vector<32x16xi1> to vector<32x16xi32>
    %284 = arith.sitofp %283 : vector<32x16xi32> to vector<32x16xf32>
    %c2_i32_97 = arith.constant 2 : i32
    %285 = vector.broadcast %c2_i32_97 : i32 to vector<32x16xi32>
    %286 = arith.muli %285, %279 : vector<32x16xi32>
    %c1_i32_98 = arith.constant 1 : i32
    %287 = vector.broadcast %c1_i32_98 : i32 to vector<32x16xi32>
    %288 = arith.addi %286, %287 : vector<32x16xi32>
    %289 = arith.cmpi eq, %278, %288 : vector<32x16xi32>
    %290 = arith.extui %289 : vector<32x16xi1> to vector<32x16xi32>
    %291 = arith.sitofp %290 : vector<32x16xi32> to vector<32x16xf32>
    %cst_99 = arith.constant dense<0.000000e+00> : vector<32x128xf32>
    %292 = tpu.matmul %284, %272, %cst_99 {dimension_numbers = #tpu.dot_dimension_numbers<[1], [0], [0], [1], [0, 0, 1, 1], [], []>} : vector<32x16xf32>, vector<16x128xf32>, vector<32x128xf32> -> vector<32x128xf32>
    %cst_100 = arith.constant dense<0.000000e+00> : vector<32x128xf32>
    %293 = tpu.matmul %291, %277, %cst_100 {dimension_numbers = #tpu.dot_dimension_numbers<[1], [0], [0], [1], [0, 0, 1, 1], [], []>} : vector<32x16xf32>, vector<16x128xf32>, vector<32x128xf32> -> vector<32x128xf32>
    %294 = arith.addf %292, %293 : vector<32x128xf32>
    %c0_101 = arith.constant 0 : index
    %c0_102 = arith.constant 0 : index
    %295 = vector.load %arg17[%c0_101, %c0_102] : memref<1x128xf32, #tpu.memory_space<vmem>>, vector<1x128xf32>
    %c0_103 = arith.constant 0 : index
    %c0_104 = arith.constant 0 : index
    %296 = vector.load %arg18[%c0_103, %c0_104] : memref<1x128xf32, #tpu.memory_space<vmem>>, vector<1x128xf32>
    %cst_105 = arith.constant dense<0.000000e+00> : vector<128xf32>
    %297 = vector.multi_reduction <add>, %294, %cst_105 [0] : vector<32x128xf32> to vector<128xf32>
    %298 = vector.shape_cast %297 : vector<128xf32> to vector<1x128xf32>
    %299 = vector.extract_strided_slice %298 {offsets = [0, 0], sizes = [1, 8], strides = [1, 1]} : vector<1x128xf32> to vector<1x8xf32>
    %300 = vector.extract_strided_slice %298 {offsets = [0, 8], sizes = [1, 8], strides = [1, 1]} : vector<1x128xf32> to vector<1x8xf32>
    %301 = arith.addf %299, %300 : vector<1x8xf32>
    %302 = vector.extract_strided_slice %298 {offsets = [0, 16], sizes = [1, 8], strides = [1, 1]} : vector<1x128xf32> to vector<1x8xf32>
    %303 = arith.addf %301, %302 : vector<1x8xf32>
    %304 = vector.extract_strided_slice %298 {offsets = [0, 24], sizes = [1, 8], strides = [1, 1]} : vector<1x128xf32> to vector<1x8xf32>
    %305 = arith.addf %303, %304 : vector<1x8xf32>
    %306 = vector.extract_strided_slice %298 {offsets = [0, 32], sizes = [1, 8], strides = [1, 1]} : vector<1x128xf32> to vector<1x8xf32>
    %307 = arith.addf %305, %306 : vector<1x8xf32>
    %308 = vector.extract_strided_slice %298 {offsets = [0, 40], sizes = [1, 8], strides = [1, 1]} : vector<1x128xf32> to vector<1x8xf32>
    %309 = arith.addf %307, %308 : vector<1x8xf32>
    %310 = vector.extract_strided_slice %298 {offsets = [0, 48], sizes = [1, 8], strides = [1, 1]} : vector<1x128xf32> to vector<1x8xf32>
    %311 = arith.addf %309, %310 : vector<1x8xf32>
    %312 = vector.extract_strided_slice %298 {offsets = [0, 56], sizes = [1, 8], strides = [1, 1]} : vector<1x128xf32> to vector<1x8xf32>
    %313 = arith.addf %311, %312 : vector<1x8xf32>
    %314 = vector.extract_strided_slice %298 {offsets = [0, 64], sizes = [1, 8], strides = [1, 1]} : vector<1x128xf32> to vector<1x8xf32>
    %315 = arith.addf %313, %314 : vector<1x8xf32>
    %316 = vector.extract_strided_slice %298 {offsets = [0, 72], sizes = [1, 8], strides = [1, 1]} : vector<1x128xf32> to vector<1x8xf32>
    %317 = arith.addf %315, %316 : vector<1x8xf32>
    %318 = vector.extract_strided_slice %298 {offsets = [0, 80], sizes = [1, 8], strides = [1, 1]} : vector<1x128xf32> to vector<1x8xf32>
    %319 = arith.addf %317, %318 : vector<1x8xf32>
    %320 = vector.extract_strided_slice %298 {offsets = [0, 88], sizes = [1, 8], strides = [1, 1]} : vector<1x128xf32> to vector<1x8xf32>
    %321 = arith.addf %319, %320 : vector<1x8xf32>
    %322 = vector.extract_strided_slice %298 {offsets = [0, 96], sizes = [1, 8], strides = [1, 1]} : vector<1x128xf32> to vector<1x8xf32>
    %323 = arith.addf %321, %322 : vector<1x8xf32>
    %324 = vector.extract_strided_slice %298 {offsets = [0, 104], sizes = [1, 8], strides = [1, 1]} : vector<1x128xf32> to vector<1x8xf32>
    %325 = arith.addf %323, %324 : vector<1x8xf32>
    %326 = vector.extract_strided_slice %298 {offsets = [0, 112], sizes = [1, 8], strides = [1, 1]} : vector<1x128xf32> to vector<1x8xf32>
    %327 = arith.addf %325, %326 : vector<1x8xf32>
    %328 = vector.extract_strided_slice %298 {offsets = [0, 120], sizes = [1, 8], strides = [1, 1]} : vector<1x128xf32> to vector<1x8xf32>
    %329 = arith.addf %327, %328 : vector<1x8xf32>
    %cst_106 = arith.constant 5.120000e+02 : f32
    %330 = vector.broadcast %cst_106 : f32 to vector<1x8xf32>
    %331 = arith.divf %329, %330 : vector<1x8xf32>
    %332 = tpu.concatenate %331, %331, %331, %331, %331, %331, %331, %331, %331, %331, %331, %331, %331, %331, %331, %331 in 1 : vector<1x8xf32>, vector<1x8xf32>, vector<1x8xf32>, vector<1x8xf32>, vector<1x8xf32>, vector<1x8xf32>, vector<1x8xf32>, vector<1x8xf32>, vector<1x8xf32>, vector<1x8xf32>, vector<1x8xf32>, vector<1x8xf32>, vector<1x8xf32>, vector<1x8xf32>, vector<1x8xf32>, vector<1x8xf32> -> vector<1x128xf32>
    %333 = vector.broadcast %332 : vector<1x128xf32> to vector<32x128xf32>
    %334 = arith.subf %294, %333 : vector<32x128xf32>
    %335 = arith.mulf %334, %334 : vector<32x128xf32>
    %cst_107 = arith.constant dense<0.000000e+00> : vector<128xf32>
    %336 = vector.multi_reduction <add>, %335, %cst_107 [0] : vector<32x128xf32> to vector<128xf32>
    %337 = vector.shape_cast %336 : vector<128xf32> to vector<1x128xf32>
    %338 = vector.extract_strided_slice %337 {offsets = [0, 0], sizes = [1, 8], strides = [1, 1]} : vector<1x128xf32> to vector<1x8xf32>
    %339 = vector.extract_strided_slice %337 {offsets = [0, 8], sizes = [1, 8], strides = [1, 1]} : vector<1x128xf32> to vector<1x8xf32>
    %340 = arith.addf %338, %339 : vector<1x8xf32>
    %341 = vector.extract_strided_slice %337 {offsets = [0, 16], sizes = [1, 8], strides = [1, 1]} : vector<1x128xf32> to vector<1x8xf32>
    %342 = arith.addf %340, %341 : vector<1x8xf32>
    %343 = vector.extract_strided_slice %337 {offsets = [0, 24], sizes = [1, 8], strides = [1, 1]} : vector<1x128xf32> to vector<1x8xf32>
    %344 = arith.addf %342, %343 : vector<1x8xf32>
    %345 = vector.extract_strided_slice %337 {offsets = [0, 32], sizes = [1, 8], strides = [1, 1]} : vector<1x128xf32> to vector<1x8xf32>
    %346 = arith.addf %344, %345 : vector<1x8xf32>
    %347 = vector.extract_strided_slice %337 {offsets = [0, 40], sizes = [1, 8], strides = [1, 1]} : vector<1x128xf32> to vector<1x8xf32>
    %348 = arith.addf %346, %347 : vector<1x8xf32>
    %349 = vector.extract_strided_slice %337 {offsets = [0, 48], sizes = [1, 8], strides = [1, 1]} : vector<1x128xf32> to vector<1x8xf32>
    %350 = arith.addf %348, %349 : vector<1x8xf32>
    %351 = vector.extract_strided_slice %337 {offsets = [0, 56], sizes = [1, 8], strides = [1, 1]} : vector<1x128xf32> to vector<1x8xf32>
    %352 = arith.addf %350, %351 : vector<1x8xf32>
    %353 = vector.extract_strided_slice %337 {offsets = [0, 64], sizes = [1, 8], strides = [1, 1]} : vector<1x128xf32> to vector<1x8xf32>
    %354 = arith.addf %352, %353 : vector<1x8xf32>
    %355 = vector.extract_strided_slice %337 {offsets = [0, 72], sizes = [1, 8], strides = [1, 1]} : vector<1x128xf32> to vector<1x8xf32>
    %356 = arith.addf %354, %355 : vector<1x8xf32>
    %357 = vector.extract_strided_slice %337 {offsets = [0, 80], sizes = [1, 8], strides = [1, 1]} : vector<1x128xf32> to vector<1x8xf32>
    %358 = arith.addf %356, %357 : vector<1x8xf32>
    %359 = vector.extract_strided_slice %337 {offsets = [0, 88], sizes = [1, 8], strides = [1, 1]} : vector<1x128xf32> to vector<1x8xf32>
    %360 = arith.addf %358, %359 : vector<1x8xf32>
    %361 = vector.extract_strided_slice %337 {offsets = [0, 96], sizes = [1, 8], strides = [1, 1]} : vector<1x128xf32> to vector<1x8xf32>
    %362 = arith.addf %360, %361 : vector<1x8xf32>
    %363 = vector.extract_strided_slice %337 {offsets = [0, 104], sizes = [1, 8], strides = [1, 1]} : vector<1x128xf32> to vector<1x8xf32>
    %364 = arith.addf %362, %363 : vector<1x8xf32>
    %365 = vector.extract_strided_slice %337 {offsets = [0, 112], sizes = [1, 8], strides = [1, 1]} : vector<1x128xf32> to vector<1x8xf32>
    %366 = arith.addf %364, %365 : vector<1x8xf32>
    %367 = vector.extract_strided_slice %337 {offsets = [0, 120], sizes = [1, 8], strides = [1, 1]} : vector<1x128xf32> to vector<1x8xf32>
    %368 = arith.addf %366, %367 : vector<1x8xf32>
    %cst_108 = arith.constant 5.120000e+02 : f32
    %369 = vector.broadcast %cst_108 : f32 to vector<1x8xf32>
    %370 = arith.divf %368, %369 : vector<1x8xf32>
    %cst_109 = arith.constant 9.99999974E-6 : f32
    %371 = vector.broadcast %cst_109 : f32 to vector<1x8xf32>
    %372 = arith.addf %370, %371 : vector<1x8xf32>
    %373 = math.rsqrt %372 : vector<1x8xf32>
    %374 = tpu.concatenate %373, %373, %373, %373, %373, %373, %373, %373, %373, %373, %373, %373, %373, %373, %373, %373 in 1 : vector<1x8xf32>, vector<1x8xf32>, vector<1x8xf32>, vector<1x8xf32>, vector<1x8xf32>, vector<1x8xf32>, vector<1x8xf32>, vector<1x8xf32>, vector<1x8xf32>, vector<1x8xf32>, vector<1x8xf32>, vector<1x8xf32>, vector<1x8xf32>, vector<1x8xf32>, vector<1x8xf32>, vector<1x8xf32> -> vector<1x128xf32>
    %375 = vector.broadcast %374 : vector<1x128xf32> to vector<32x128xf32>
    %376 = arith.mulf %334, %375 : vector<32x128xf32>
    %377 = vector.broadcast %295 : vector<1x128xf32> to vector<32x128xf32>
    %378 = arith.mulf %376, %377 : vector<32x128xf32>
    %379 = vector.broadcast %296 : vector<1x128xf32> to vector<32x128xf32>
    %380 = arith.addf %378, %379 : vector<32x128xf32>
    %cst_110 = arith.constant 0.000000e+00 : f32
    %381 = vector.broadcast %cst_110 : f32 to vector<32x128xf32>
    %382 = arith.maximumf %380, %381 : vector<32x128xf32>
    %383 = tpu.iota {dimensions = array<i32: 0>} : vector<32x32xi32>
    %384 = tpu.iota {dimensions = array<i32: 1>} : vector<32x32xi32>
    %c16_i32 = arith.constant 16 : i32
    %c0_i32_111 = arith.constant 0 : i32
    %385 = arith.cmpi eq, %c16_i32, %c0_i32_111 : i32
    %c1_i32_112 = arith.constant 1 : i32
    %386 = arith.select %385, %c1_i32_112, %c16_i32 : i32
    %387 = vector.broadcast %386 : i32 to vector<32x32xi32>
    %388 = arith.remsi %383, %387 : vector<32x32xi32>
    %c0_i32_113 = arith.constant 0 : i32
    %389 = vector.broadcast %c0_i32_113 : i32 to vector<32x32xi32>
    %390 = arith.cmpi ne, %388, %389 : vector<32x32xi32>
    %c0_i32_114 = arith.constant 0 : i32
    %391 = vector.broadcast %c0_i32_114 : i32 to vector<32x32xi32>
    %392 = arith.cmpi slt, %388, %391 : vector<32x32xi32>
    %c0_i32_115 = arith.constant 0 : i32
    %393 = arith.cmpi slt, %386, %c0_i32_115 : i32
    %394 = vector.broadcast %393 : i1 to vector<32x32xi1>
    %395 = vector.broadcast %394 : vector<32x32xi1> to vector<32x32xi1>
    %396 = arith.xori %392, %395 : vector<32x32xi1>
    %397 = arith.andi %396, %390 : vector<32x32xi1>
    %398 = vector.broadcast %386 : i32 to vector<32x32xi32>
    %399 = arith.addi %388, %398 : vector<32x32xi32>
    %400 = arith.select %397, %399, %388 : vector<32x32xi1>, vector<32x32xi32>
    %c-1_i32 = arith.constant -1 : i32
    %401 = vector.broadcast %c-1_i32 : i32 to vector<32x32xi32>
    %402 = arith.addi %383, %401 : vector<32x32xi32>
    %403 = arith.cmpi eq, %384, %402 : vector<32x32xi32>
    %c-1_i32_116 = arith.constant -1 : i32
    %404 = vector.broadcast %c-1_i32_116 : i32 to vector<32x32xi32>
    %405 = arith.addi %400, %404 : vector<32x32xi32>
    %c0_i32_117 = arith.constant 0 : i32
    %406 = vector.broadcast %c0_i32_117 : i32 to vector<32x32xi32>
    %407 = arith.cmpi sge, %405, %406 : vector<32x32xi32>
    %408 = arith.andi %403, %407 : vector<32x32xi1>
    %c-1_i32_118 = arith.constant -1 : i32
    %409 = vector.broadcast %c-1_i32_118 : i32 to vector<32x32xi32>
    %410 = arith.addi %400, %409 : vector<32x32xi32>
    %c15_i32 = arith.constant 15 : i32
    %411 = vector.broadcast %c15_i32 : i32 to vector<32x32xi32>
    %412 = arith.cmpi sle, %410, %411 : vector<32x32xi32>
    %413 = arith.andi %408, %412 : vector<32x32xi1>
    %414 = arith.extui %413 : vector<32x32xi1> to vector<32x32xi32>
    %415 = arith.sitofp %414 : vector<32x32xi32> to vector<32x32xf32>
    %cst_119 = arith.constant dense<0.000000e+00> : vector<32x128xf32>
    %416 = tpu.matmul %415, %382, %cst_119 {dimension_numbers = #tpu.dot_dimension_numbers<[1], [0], [0], [1], [0, 0, 1, 1], [], []>} : vector<32x32xf32>, vector<32x128xf32>, vector<32x128xf32> -> vector<32x128xf32>
    %417 = tpu.iota {dimensions = array<i32: 0>} : vector<32x32xi32>
    %418 = tpu.iota {dimensions = array<i32: 1>} : vector<32x32xi32>
    %c16_i32_120 = arith.constant 16 : i32
    %c0_i32_121 = arith.constant 0 : i32
    %419 = arith.cmpi eq, %c16_i32_120, %c0_i32_121 : i32
    %c1_i32_122 = arith.constant 1 : i32
    %420 = arith.select %419, %c1_i32_122, %c16_i32_120 : i32
    %421 = vector.broadcast %420 : i32 to vector<32x32xi32>
    %422 = arith.remsi %417, %421 : vector<32x32xi32>
    %c0_i32_123 = arith.constant 0 : i32
    %423 = vector.broadcast %c0_i32_123 : i32 to vector<32x32xi32>
    %424 = arith.cmpi ne, %422, %423 : vector<32x32xi32>
    %c0_i32_124 = arith.constant 0 : i32
    %425 = vector.broadcast %c0_i32_124 : i32 to vector<32x32xi32>
    %426 = arith.cmpi slt, %422, %425 : vector<32x32xi32>
    %c0_i32_125 = arith.constant 0 : i32
    %427 = arith.cmpi slt, %420, %c0_i32_125 : i32
    %428 = vector.broadcast %427 : i1 to vector<32x32xi1>
    %429 = vector.broadcast %428 : vector<32x32xi1> to vector<32x32xi1>
    %430 = arith.xori %426, %429 : vector<32x32xi1>
    %431 = arith.andi %430, %424 : vector<32x32xi1>
    %432 = vector.broadcast %420 : i32 to vector<32x32xi32>
    %433 = arith.addi %422, %432 : vector<32x32xi32>
    %434 = arith.select %431, %433, %422 : vector<32x32xi1>, vector<32x32xi32>
    %c1_i32_126 = arith.constant 1 : i32
    %435 = vector.broadcast %c1_i32_126 : i32 to vector<32x32xi32>
    %436 = arith.addi %417, %435 : vector<32x32xi32>
    %437 = arith.cmpi eq, %418, %436 : vector<32x32xi32>
    %c1_i32_127 = arith.constant 1 : i32
    %438 = vector.broadcast %c1_i32_127 : i32 to vector<32x32xi32>
    %439 = arith.addi %434, %438 : vector<32x32xi32>
    %c0_i32_128 = arith.constant 0 : i32
    %440 = vector.broadcast %c0_i32_128 : i32 to vector<32x32xi32>
    %441 = arith.cmpi sge, %439, %440 : vector<32x32xi32>
    %442 = arith.andi %437, %441 : vector<32x32xi1>
    %c1_i32_129 = arith.constant 1 : i32
    %443 = vector.broadcast %c1_i32_129 : i32 to vector<32x32xi32>
    %444 = arith.addi %434, %443 : vector<32x32xi32>
    %c15_i32_130 = arith.constant 15 : i32
    %445 = vector.broadcast %c15_i32_130 : i32 to vector<32x32xi32>
    %446 = arith.cmpi sle, %444, %445 : vector<32x32xi32>
    %447 = arith.andi %442, %446 : vector<32x32xi1>
    %448 = arith.extui %447 : vector<32x32xi1> to vector<32x32xi32>
    %449 = arith.sitofp %448 : vector<32x32xi32> to vector<32x32xf32>
    %cst_131 = arith.constant dense<0.000000e+00> : vector<32x128xf32>
    %450 = tpu.matmul %449, %382, %cst_131 {dimension_numbers = #tpu.dot_dimension_numbers<[1], [0], [0], [1], [0, 0, 1, 1], [], []>} : vector<32x32xf32>, vector<32x128xf32>, vector<32x128xf32> -> vector<32x128xf32>
    %c0_132 = arith.constant 0 : index
    %c0_133 = arith.constant 0 : index
    %451 = vector.load %arg19[%c0_132, %c0_133] : memref<128x16xf32, #tpu.memory_space<vmem>>, vector<128x16xf32>
    %cst_134 = arith.constant dense<0.000000e+00> : vector<32x16xf32>
    %452 = tpu.matmul %416, %451, %cst_134 {dimension_numbers = #tpu.dot_dimension_numbers<[1], [0], [0], [1], [0, 0, 1, 1], [], []>} : vector<32x128xf32>, vector<128x16xf32>, vector<32x16xf32> -> vector<32x16xf32>
    %c0_135 = arith.constant 0 : index
    %c0_136 = arith.constant 0 : index
    %453 = vector.load %arg20[%c0_135, %c0_136] : memref<128x16xf32, #tpu.memory_space<vmem>>, vector<128x16xf32>
    %cst_137 = arith.constant dense<0.000000e+00> : vector<32x16xf32>
    %454 = tpu.matmul %382, %453, %cst_137 {dimension_numbers = #tpu.dot_dimension_numbers<[1], [0], [0], [1], [0, 0, 1, 1], [], []>} : vector<32x128xf32>, vector<128x16xf32>, vector<32x16xf32> -> vector<32x16xf32>
    %455 = arith.addf %452, %454 : vector<32x16xf32>
    %c0_138 = arith.constant 0 : index
    %c0_139 = arith.constant 0 : index
    %456 = vector.load %arg21[%c0_138, %c0_139] : memref<128x16xf32, #tpu.memory_space<vmem>>, vector<128x16xf32>
    %cst_140 = arith.constant dense<0.000000e+00> : vector<32x16xf32>
    %457 = tpu.matmul %450, %456, %cst_140 {dimension_numbers = #tpu.dot_dimension_numbers<[1], [0], [0], [1], [0, 0, 1, 1], [], []>} : vector<32x128xf32>, vector<128x16xf32>, vector<32x16xf32> -> vector<32x16xf32>
    %458 = arith.addf %455, %457 : vector<32x16xf32>
    %c0_141 = arith.constant 0 : index
    %c0_142 = arith.constant 0 : index
    %459 = vector.load %arg22[%c0_141, %c0_142] : memref<1x16xf32, #tpu.memory_space<vmem>>, vector<1x16xf32>
    %460 = vector.broadcast %459 : vector<1x16xf32> to vector<32x16xf32>
    %461 = arith.addf %458, %460 : vector<32x16xf32>
    %462 = arith.negf %461 : vector<32x16xf32>
    %463 = math.exp %462 : vector<32x16xf32>
    %cst_143 = arith.constant 1.000000e+00 : f32
    %464 = vector.broadcast %cst_143 : f32 to vector<32x16xf32>
    %465 = arith.addf %464, %463 : vector<32x16xf32>
    %466 = arith.divf %464, %465 : vector<32x16xf32>
    %467 = tpu.iota {dimensions = array<i32: 0>} : vector<2x32xi32>
    %468 = tpu.iota {dimensions = array<i32: 1>} : vector<2x32xi32>
    %c16_i32_144 = arith.constant 16 : i32
    %469 = vector.broadcast %c16_i32_144 : i32 to vector<2x32xi32>
    %470 = arith.muli %467, %469 : vector<2x32xi32>
    %c0_i32_145 = arith.constant 0 : i32
    %471 = vector.broadcast %c0_i32_145 : i32 to vector<2x32xi32>
    %472 = arith.addi %470, %471 : vector<2x32xi32>
    %473 = arith.cmpi eq, %468, %472 : vector<2x32xi32>
    %474 = arith.extui %473 : vector<2x32xi1> to vector<2x32xi32>
    %475 = arith.sitofp %474 : vector<2x32xi32> to vector<2x32xf32>
    %cst_146 = arith.constant dense<0.000000e+00> : vector<2x16xf32>
    %476 = tpu.matmul %475, %466, %cst_146 {dimension_numbers = #tpu.dot_dimension_numbers<[1], [0], [0], [1], [0, 0, 1, 1], [], []>} : vector<2x32xf32>, vector<32x16xf32>, vector<2x16xf32> -> vector<2x16xf32>
    %c16_i32_147 = arith.constant 16 : i32
    %477 = vector.broadcast %c16_i32_147 : i32 to vector<2x32xi32>
    %478 = arith.muli %467, %477 : vector<2x32xi32>
    %c1_i32_148 = arith.constant 1 : i32
    %479 = vector.broadcast %c1_i32_148 : i32 to vector<2x32xi32>
    %480 = arith.addi %478, %479 : vector<2x32xi32>
    %481 = arith.cmpi eq, %468, %480 : vector<2x32xi32>
    %482 = arith.extui %481 : vector<2x32xi1> to vector<2x32xi32>
    %483 = arith.sitofp %482 : vector<2x32xi32> to vector<2x32xf32>
    %cst_149 = arith.constant dense<0.000000e+00> : vector<2x16xf32>
    %484 = tpu.matmul %483, %466, %cst_149 {dimension_numbers = #tpu.dot_dimension_numbers<[1], [0], [0], [1], [0, 0, 1, 1], [], []>} : vector<2x32xf32>, vector<32x16xf32>, vector<2x16xf32> -> vector<2x16xf32>
    %c16_i32_150 = arith.constant 16 : i32
    %485 = vector.broadcast %c16_i32_150 : i32 to vector<2x32xi32>
    %486 = arith.muli %467, %485 : vector<2x32xi32>
    %c2_i32_151 = arith.constant 2 : i32
    %487 = vector.broadcast %c2_i32_151 : i32 to vector<2x32xi32>
    %488 = arith.addi %486, %487 : vector<2x32xi32>
    %489 = arith.cmpi eq, %468, %488 : vector<2x32xi32>
    %490 = arith.extui %489 : vector<2x32xi1> to vector<2x32xi32>
    %491 = arith.sitofp %490 : vector<2x32xi32> to vector<2x32xf32>
    %cst_152 = arith.constant dense<0.000000e+00> : vector<2x16xf32>
    %492 = tpu.matmul %491, %466, %cst_152 {dimension_numbers = #tpu.dot_dimension_numbers<[1], [0], [0], [1], [0, 0, 1, 1], [], []>} : vector<2x32xf32>, vector<32x16xf32>, vector<2x16xf32> -> vector<2x16xf32>
    %c16_i32_153 = arith.constant 16 : i32
    %493 = vector.broadcast %c16_i32_153 : i32 to vector<2x32xi32>
    %494 = arith.muli %467, %493 : vector<2x32xi32>
    %c3_i32_154 = arith.constant 3 : i32
    %495 = vector.broadcast %c3_i32_154 : i32 to vector<2x32xi32>
    %496 = arith.addi %494, %495 : vector<2x32xi32>
    %497 = arith.cmpi eq, %468, %496 : vector<2x32xi32>
    %498 = arith.extui %497 : vector<2x32xi1> to vector<2x32xi32>
    %499 = arith.sitofp %498 : vector<2x32xi32> to vector<2x32xf32>
    %cst_155 = arith.constant dense<0.000000e+00> : vector<2x16xf32>
    %500 = tpu.matmul %499, %466, %cst_155 {dimension_numbers = #tpu.dot_dimension_numbers<[1], [0], [0], [1], [0, 0, 1, 1], [], []>} : vector<2x32xf32>, vector<32x16xf32>, vector<2x16xf32> -> vector<2x16xf32>
    %c16_i32_156 = arith.constant 16 : i32
    %501 = vector.broadcast %c16_i32_156 : i32 to vector<2x32xi32>
    %502 = arith.muli %467, %501 : vector<2x32xi32>
    %c4_i32_157 = arith.constant 4 : i32
    %503 = vector.broadcast %c4_i32_157 : i32 to vector<2x32xi32>
    %504 = arith.addi %502, %503 : vector<2x32xi32>
    %505 = arith.cmpi eq, %468, %504 : vector<2x32xi32>
    %506 = arith.extui %505 : vector<2x32xi1> to vector<2x32xi32>
    %507 = arith.sitofp %506 : vector<2x32xi32> to vector<2x32xf32>
    %cst_158 = arith.constant dense<0.000000e+00> : vector<2x16xf32>
    %508 = tpu.matmul %507, %466, %cst_158 {dimension_numbers = #tpu.dot_dimension_numbers<[1], [0], [0], [1], [0, 0, 1, 1], [], []>} : vector<2x32xf32>, vector<32x16xf32>, vector<2x16xf32> -> vector<2x16xf32>
    %c16_i32_159 = arith.constant 16 : i32
    %509 = vector.broadcast %c16_i32_159 : i32 to vector<2x32xi32>
    %510 = arith.muli %467, %509 : vector<2x32xi32>
    %c5_i32 = arith.constant 5 : i32
    %511 = vector.broadcast %c5_i32 : i32 to vector<2x32xi32>
    %512 = arith.addi %510, %511 : vector<2x32xi32>
    %513 = arith.cmpi eq, %468, %512 : vector<2x32xi32>
    %514 = arith.extui %513 : vector<2x32xi1> to vector<2x32xi32>
    %515 = arith.sitofp %514 : vector<2x32xi32> to vector<2x32xf32>
    %cst_160 = arith.constant dense<0.000000e+00> : vector<2x16xf32>
    %516 = tpu.matmul %515, %466, %cst_160 {dimension_numbers = #tpu.dot_dimension_numbers<[1], [0], [0], [1], [0, 0, 1, 1], [], []>} : vector<2x32xf32>, vector<32x16xf32>, vector<2x16xf32> -> vector<2x16xf32>
    %c16_i32_161 = arith.constant 16 : i32
    %517 = vector.broadcast %c16_i32_161 : i32 to vector<2x32xi32>
    %518 = arith.muli %467, %517 : vector<2x32xi32>
    %c6_i32 = arith.constant 6 : i32
    %519 = vector.broadcast %c6_i32 : i32 to vector<2x32xi32>
    %520 = arith.addi %518, %519 : vector<2x32xi32>
    %521 = arith.cmpi eq, %468, %520 : vector<2x32xi32>
    %522 = arith.extui %521 : vector<2x32xi1> to vector<2x32xi32>
    %523 = arith.sitofp %522 : vector<2x32xi32> to vector<2x32xf32>
    %cst_162 = arith.constant dense<0.000000e+00> : vector<2x16xf32>
    %524 = tpu.matmul %523, %466, %cst_162 {dimension_numbers = #tpu.dot_dimension_numbers<[1], [0], [0], [1], [0, 0, 1, 1], [], []>} : vector<2x32xf32>, vector<32x16xf32>, vector<2x16xf32> -> vector<2x16xf32>
    %c16_i32_163 = arith.constant 16 : i32
    %525 = vector.broadcast %c16_i32_163 : i32 to vector<2x32xi32>
    %526 = arith.muli %467, %525 : vector<2x32xi32>
    %c7_i32_164 = arith.constant 7 : i32
    %527 = vector.broadcast %c7_i32_164 : i32 to vector<2x32xi32>
    %528 = arith.addi %526, %527 : vector<2x32xi32>
    %529 = arith.cmpi eq, %468, %528 : vector<2x32xi32>
    %530 = arith.extui %529 : vector<2x32xi1> to vector<2x32xi32>
    %531 = arith.sitofp %530 : vector<2x32xi32> to vector<2x32xf32>
    %cst_165 = arith.constant dense<0.000000e+00> : vector<2x16xf32>
    %532 = tpu.matmul %531, %466, %cst_165 {dimension_numbers = #tpu.dot_dimension_numbers<[1], [0], [0], [1], [0, 0, 1, 1], [], []>} : vector<2x32xf32>, vector<32x16xf32>, vector<2x16xf32> -> vector<2x16xf32>
    %c16_i32_166 = arith.constant 16 : i32
    %533 = vector.broadcast %c16_i32_166 : i32 to vector<2x32xi32>
    %534 = arith.muli %467, %533 : vector<2x32xi32>
    %c8_i32_167 = arith.constant 8 : i32
    %535 = vector.broadcast %c8_i32_167 : i32 to vector<2x32xi32>
    %536 = arith.addi %534, %535 : vector<2x32xi32>
    %537 = arith.cmpi eq, %468, %536 : vector<2x32xi32>
    %538 = arith.extui %537 : vector<2x32xi1> to vector<2x32xi32>
    %539 = arith.sitofp %538 : vector<2x32xi32> to vector<2x32xf32>
    %cst_168 = arith.constant dense<0.000000e+00> : vector<2x16xf32>
    %540 = tpu.matmul %539, %466, %cst_168 {dimension_numbers = #tpu.dot_dimension_numbers<[1], [0], [0], [1], [0, 0, 1, 1], [], []>} : vector<2x32xf32>, vector<32x16xf32>, vector<2x16xf32> -> vector<2x16xf32>
    %c16_i32_169 = arith.constant 16 : i32
    %541 = vector.broadcast %c16_i32_169 : i32 to vector<2x32xi32>
    %542 = arith.muli %467, %541 : vector<2x32xi32>
    %c9_i32 = arith.constant 9 : i32
    %543 = vector.broadcast %c9_i32 : i32 to vector<2x32xi32>
    %544 = arith.addi %542, %543 : vector<2x32xi32>
    %545 = arith.cmpi eq, %468, %544 : vector<2x32xi32>
    %546 = arith.extui %545 : vector<2x32xi1> to vector<2x32xi32>
    %547 = arith.sitofp %546 : vector<2x32xi32> to vector<2x32xf32>
    %cst_170 = arith.constant dense<0.000000e+00> : vector<2x16xf32>
    %548 = tpu.matmul %547, %466, %cst_170 {dimension_numbers = #tpu.dot_dimension_numbers<[1], [0], [0], [1], [0, 0, 1, 1], [], []>} : vector<2x32xf32>, vector<32x16xf32>, vector<2x16xf32> -> vector<2x16xf32>
    %c16_i32_171 = arith.constant 16 : i32
    %549 = vector.broadcast %c16_i32_171 : i32 to vector<2x32xi32>
    %550 = arith.muli %467, %549 : vector<2x32xi32>
    %c10_i32 = arith.constant 10 : i32
    %551 = vector.broadcast %c10_i32 : i32 to vector<2x32xi32>
    %552 = arith.addi %550, %551 : vector<2x32xi32>
    %553 = arith.cmpi eq, %468, %552 : vector<2x32xi32>
    %554 = arith.extui %553 : vector<2x32xi1> to vector<2x32xi32>
    %555 = arith.sitofp %554 : vector<2x32xi32> to vector<2x32xf32>
    %cst_172 = arith.constant dense<0.000000e+00> : vector<2x16xf32>
    %556 = tpu.matmul %555, %466, %cst_172 {dimension_numbers = #tpu.dot_dimension_numbers<[1], [0], [0], [1], [0, 0, 1, 1], [], []>} : vector<2x32xf32>, vector<32x16xf32>, vector<2x16xf32> -> vector<2x16xf32>
    %c16_i32_173 = arith.constant 16 : i32
    %557 = vector.broadcast %c16_i32_173 : i32 to vector<2x32xi32>
    %558 = arith.muli %467, %557 : vector<2x32xi32>
    %c11_i32 = arith.constant 11 : i32
    %559 = vector.broadcast %c11_i32 : i32 to vector<2x32xi32>
    %560 = arith.addi %558, %559 : vector<2x32xi32>
    %561 = arith.cmpi eq, %468, %560 : vector<2x32xi32>
    %562 = arith.extui %561 : vector<2x32xi1> to vector<2x32xi32>
    %563 = arith.sitofp %562 : vector<2x32xi32> to vector<2x32xf32>
    %cst_174 = arith.constant dense<0.000000e+00> : vector<2x16xf32>
    %564 = tpu.matmul %563, %466, %cst_174 {dimension_numbers = #tpu.dot_dimension_numbers<[1], [0], [0], [1], [0, 0, 1, 1], [], []>} : vector<2x32xf32>, vector<32x16xf32>, vector<2x16xf32> -> vector<2x16xf32>
    %c16_i32_175 = arith.constant 16 : i32
    %565 = vector.broadcast %c16_i32_175 : i32 to vector<2x32xi32>
    %566 = arith.muli %467, %565 : vector<2x32xi32>
    %c12_i32 = arith.constant 12 : i32
    %567 = vector.broadcast %c12_i32 : i32 to vector<2x32xi32>
    %568 = arith.addi %566, %567 : vector<2x32xi32>
    %569 = arith.cmpi eq, %468, %568 : vector<2x32xi32>
    %570 = arith.extui %569 : vector<2x32xi1> to vector<2x32xi32>
    %571 = arith.sitofp %570 : vector<2x32xi32> to vector<2x32xf32>
    %cst_176 = arith.constant dense<0.000000e+00> : vector<2x16xf32>
    %572 = tpu.matmul %571, %466, %cst_176 {dimension_numbers = #tpu.dot_dimension_numbers<[1], [0], [0], [1], [0, 0, 1, 1], [], []>} : vector<2x32xf32>, vector<32x16xf32>, vector<2x16xf32> -> vector<2x16xf32>
    %c16_i32_177 = arith.constant 16 : i32
    %573 = vector.broadcast %c16_i32_177 : i32 to vector<2x32xi32>
    %574 = arith.muli %467, %573 : vector<2x32xi32>
    %c13_i32 = arith.constant 13 : i32
    %575 = vector.broadcast %c13_i32 : i32 to vector<2x32xi32>
    %576 = arith.addi %574, %575 : vector<2x32xi32>
    %577 = arith.cmpi eq, %468, %576 : vector<2x32xi32>
    %578 = arith.extui %577 : vector<2x32xi1> to vector<2x32xi32>
    %579 = arith.sitofp %578 : vector<2x32xi32> to vector<2x32xf32>
    %cst_178 = arith.constant dense<0.000000e+00> : vector<2x16xf32>
    %580 = tpu.matmul %579, %466, %cst_178 {dimension_numbers = #tpu.dot_dimension_numbers<[1], [0], [0], [1], [0, 0, 1, 1], [], []>} : vector<2x32xf32>, vector<32x16xf32>, vector<2x16xf32> -> vector<2x16xf32>
    %c16_i32_179 = arith.constant 16 : i32
    %581 = vector.broadcast %c16_i32_179 : i32 to vector<2x32xi32>
    %582 = arith.muli %467, %581 : vector<2x32xi32>
    %c14_i32 = arith.constant 14 : i32
    %583 = vector.broadcast %c14_i32 : i32 to vector<2x32xi32>
    %584 = arith.addi %582, %583 : vector<2x32xi32>
    %585 = arith.cmpi eq, %468, %584 : vector<2x32xi32>
    %586 = arith.extui %585 : vector<2x32xi1> to vector<2x32xi32>
    %587 = arith.sitofp %586 : vector<2x32xi32> to vector<2x32xf32>
    %cst_180 = arith.constant dense<0.000000e+00> : vector<2x16xf32>
    %588 = tpu.matmul %587, %466, %cst_180 {dimension_numbers = #tpu.dot_dimension_numbers<[1], [0], [0], [1], [0, 0, 1, 1], [], []>} : vector<2x32xf32>, vector<32x16xf32>, vector<2x16xf32> -> vector<2x16xf32>
    %c16_i32_181 = arith.constant 16 : i32
    %589 = vector.broadcast %c16_i32_181 : i32 to vector<2x32xi32>
    %590 = arith.muli %467, %589 : vector<2x32xi32>
    %c15_i32_182 = arith.constant 15 : i32
    %591 = vector.broadcast %c15_i32_182 : i32 to vector<2x32xi32>
    %592 = arith.addi %590, %591 : vector<2x32xi32>
    %593 = arith.cmpi eq, %468, %592 : vector<2x32xi32>
    %594 = arith.extui %593 : vector<2x32xi1> to vector<2x32xi32>
    %595 = arith.sitofp %594 : vector<2x32xi32> to vector<2x32xf32>
    %cst_183 = arith.constant dense<0.000000e+00> : vector<2x16xf32>
    %596 = tpu.matmul %595, %466, %cst_183 {dimension_numbers = #tpu.dot_dimension_numbers<[1], [0], [0], [1], [0, 0, 1, 1], [], []>} : vector<2x32xf32>, vector<32x16xf32>, vector<2x16xf32> -> vector<2x16xf32>
    %597 = tpu.concatenate %476, %484, %492, %500, %508, %516, %524, %532, %540, %548, %556, %564, %572, %580, %588, %596 in 1 : vector<2x16xf32>, vector<2x16xf32>, vector<2x16xf32>, vector<2x16xf32>, vector<2x16xf32>, vector<2x16xf32>, vector<2x16xf32>, vector<2x16xf32>, vector<2x16xf32>, vector<2x16xf32>, vector<2x16xf32>, vector<2x16xf32>, vector<2x16xf32>, vector<2x16xf32>, vector<2x16xf32>, vector<2x16xf32> -> vector<2x256xf32>
    %c0_184 = arith.constant 0 : index
    %c0_185 = arith.constant 0 : index
    %598 = vector.load %arg23[%c0_184, %c0_185] : memref<2x256xf32, #tpu.memory_space<vmem>>, vector<2x256xf32>
    tpu.vector_store %arg23[%c0_184, %c0_185], %597 {strides = array<i32>} : memref<2x256xf32, #tpu.memory_space<vmem>>, vector<2x256xf32>,
    return
  }
  func.func @transform_0(%arg0: i32) -> (i32, i32) {
    %c0_i32 = arith.constant 0 : i32
    %c0_i32_0 = arith.constant 0 : i32
    %c0_i32_1 = arith.constant 0 : i32
    return %c0_i32, %c0_i32_0 : i32, i32
  }
  func.func @transform_1(%arg0: i32) -> (i32, i32) {
    %c0_i32 = arith.constant 0 : i32
    %c0_i32_0 = arith.constant 0 : i32
    %c0_i32_1 = arith.constant 0 : i32
    return %c0_i32, %c0_i32_0 : i32, i32
  }
  func.func @transform_2(%arg0: i32) -> (i32, i32) {
    %c0_i32 = arith.constant 0 : i32
    %c0_i32_0 = arith.constant 0 : i32
    %c0_i32_1 = arith.constant 0 : i32
    return %c0_i32, %c0_i32_0 : i32, i32
  }
  func.func @transform_3(%arg0: i32) -> (i32, i32) {
    %c0_i32 = arith.constant 0 : i32
    %c0_i32_0 = arith.constant 0 : i32
    %c0_i32_1 = arith.constant 0 : i32
    return %c0_i32, %c0_i32_0 : i32, i32
  }
  func.func @transform_4(%arg0: i32) -> (i32, i32) {
    %c0_i32 = arith.constant 0 : i32
    %c0_i32_0 = arith.constant 0 : i32
    %c0_i32_1 = arith.constant 0 : i32
    return %c0_i32, %c0_i32_0 : i32, i32
  }
  func.func @transform_5(%arg0: i32) -> (i32, i32) {
    %c0_i32 = arith.constant 0 : i32
    %c0_i32_0 = arith.constant 0 : i32
    %c0_i32_1 = arith.constant 0 : i32
    return %c0_i32, %c0_i32_0 : i32, i32
  }
  func.func @transform_6(%arg0: i32) -> (i32, i32) {
    %c0_i32 = arith.constant 0 : i32
    %c0_i32_0 = arith.constant 0 : i32
    %c0_i32_1 = arith.constant 0 : i32
    return %c0_i32, %c0_i32_0 : i32, i32
  }
  func.func @transform_7(%arg0: i32) -> (i32, i32) {
    %c0_i32 = arith.constant 0 : i32
    %c0_i32_0 = arith.constant 0 : i32
    %c0_i32_1 = arith.constant 0 : i32
    return %c0_i32, %c0_i32_0 : i32, i32
  }
  func.func @transform_8(%arg0: i32) -> (i32, i32) {
    %c0_i32 = arith.constant 0 : i32
    %c0_i32_0 = arith.constant 0 : i32
    %c0_i32_1 = arith.constant 0 : i32
    return %c0_i32, %c0_i32_0 : i32, i32
  }
  func.func @transform_9(%arg0: i32) -> (i32, i32) {
    %c0_i32 = arith.constant 0 : i32
    %c0_i32_0 = arith.constant 0 : i32
    %c0_i32_1 = arith.constant 0 : i32
    return %c0_i32, %c0_i32_0 : i32, i32
  }
  func.func @transform_10(%arg0: i32) -> (i32, i32) {
    %c0_i32 = arith.constant 0 : i32
    %c0_i32_0 = arith.constant 0 : i32
    %c0_i32_1 = arith.constant 0 : i32
    return %c0_i32, %c0_i32_0 : i32, i32
  }
  func.func @transform_11(%arg0: i32) -> (i32, i32) {
    %c0_i32 = arith.constant 0 : i32
    %c0_i32_0 = arith.constant 0 : i32
    %c0_i32_1 = arith.constant 0 : i32
    return %c0_i32, %c0_i32_0 : i32, i32
  }
  func.func @transform_12(%arg0: i32) -> (i32, i32) {
    %c0_i32 = arith.constant 0 : i32
    %c0_i32_0 = arith.constant 0 : i32
    %c0_i32_1 = arith.constant 0 : i32
    return %c0_i32, %c0_i32_0 : i32, i32
  }
  func.func @transform_13(%arg0: i32) -> (i32, i32) {
    %c0_i32 = arith.constant 0 : i32
    %c0_i32_0 = arith.constant 0 : i32
    %c0_i32_1 = arith.constant 0 : i32
    return %c0_i32, %c0_i32_0 : i32, i32
  }
  func.func @transform_14(%arg0: i32) -> (i32, i32) {
    %c0_i32 = arith.constant 0 : i32
    %c0_i32_0 = arith.constant 0 : i32
    %c0_i32_1 = arith.constant 0 : i32
    return %c0_i32, %c0_i32_0 : i32, i32
  }
  func.func @transform_15(%arg0: i32) -> (i32, i32) {
    %c0_i32 = arith.constant 0 : i32
    %c0_i32_0 = arith.constant 0 : i32
    %c0_i32_1 = arith.constant 0 : i32
    return %c0_i32, %c0_i32_0 : i32, i32
  }
  func.func @transform_16(%arg0: i32) -> (i32, i32) {
    %c0_i32 = arith.constant 0 : i32
    %c0_i32_0 = arith.constant 0 : i32
    %c0_i32_1 = arith.constant 0 : i32
    return %c0_i32, %c0_i32_0 : i32, i32
  }
  func.func @transform_17(%arg0: i32) -> (i32, i32) {
    %c0_i32 = arith.constant 0 : i32
    %c0_i32_0 = arith.constant 0 : i32
    %c0_i32_1 = arith.constant 0 : i32
    return %c0_i32, %c0_i32_0 : i32, i32
  }
  func.func @transform_18(%arg0: i32) -> (i32, i32) {
    %c0_i32 = arith.constant 0 : i32
    %c0_i32_0 = arith.constant 0 : i32
    %c0_i32_1 = arith.constant 0 : i32
    return %c0_i32, %c0_i32_0 : i32, i32
  }
  func.func @transform_19(%arg0: i32) -> (i32, i32) {
    %c0_i32 = arith.constant 0 : i32
    %c0_i32_0 = arith.constant 0 : i32
    %c0_i32_1 = arith.constant 0 : i32
    return %c0_i32, %c0_i32_0 : i32, i32
  }
  func.func @transform_20(%arg0: i32) -> (i32, i32) {
    %c0_i32 = arith.constant 0 : i32
    %c0_i32_0 = arith.constant 0 : i32
    %c0_i32_1 = arith.constant 0 : i32
    return %c0_i32, %c0_i32_0 : i32, i32
  }
  func.func @transform_21(%arg0: i32) -> (i32, i32) {
    %c0_i32 = arith.constant 0 : i32
    %c0_i32_0 = arith.constant 0 : i32
    %c0_i32_1 = arith.constant 0 : i32
    return %c0_i32, %c0_i32_0 : i32, i32
  }
  func.func @transform_22(%arg0: i32) -> (i32, i32) {
    %c0_i32 = arith.constant 0 : i32
    %c0_i32_0 = arith.constant 0 : i32
    %c0_i32_1 = arith.constant 0 : i32
    return %c0_i32, %c0_i32_0 : i32, i32
  }
}

</mosaic_0001>

<bundles_post_ra>
// kernel: tpu_custom_call.1
= control target key start
LH: loop header
LB: loop body
LE: loop exit
PB: predicated region body
PF: predicated region fallthrough
CT: control target
= control target key end

     0   :  { %s7549_s0 = inlined_call_operand.hbm [shape: f32[2,32], index: 0, kind: input, shape index: {}]   ;;  %s7550_s1 = inlined_call_operand.hbm [shape: f32[32,128], index: 1, kind: input, shape index: {}]   ;;  %s7551_s2 = inlined_call_operand.hbm [shape: f32[1,128], index: 2, kind: input, shape index: {}]   ;;  %s7552_s3 = inlined_call_operand.vmem [shape: f32[64,64], index: 3, kind: input, shape index: {}]   ;;  %s7553_s4 = inlined_call_operand.vmem [shape: f32[64,64], index: 4, kind: input, shape index: {}]   ;;  %s7554_s5 = inlined_call_operand.vmem [shape: f32[64,64], index: 5, kind: input, shape index: {}]   ;;  %s7555_s6 = inlined_call_operand.hbm [shape: f32[1,64], index: 6, kind: input, shape index: {}]   ;;  %s7556_s7 = inlined_call_operand.hbm [shape: f32[1,64], index: 7, kind: input, shape index: {}]   ;;  %s7557_s8 = inlined_call_operand.vmem [shape: f32[64,64], index: 8, kind: input, shape index: {}]   ;;  %s7558_s9 = inlined_call_operand.vmem [shape: f32[64,64], index: 9, kind: input, shape index: {}]   ;;  %s7559_s10 = inlined_call_operand.vmem [shape: f32[64,64], index: 10, kind: input, shape index: {}]   ;;  %s7560_s11 = inlined_call_operand.hbm [shape: f32[1,64], index: 11, kind: input, shape index: {}]   ;;  %s7561_s12 = inlined_call_operand.hbm [shape: f32[1,64], index: 12, kind: input, shape index: {}]   ;;  %s7562_s13 = inlined_call_operand.vmem [shape: f32[64,128], index: 13, kind: input, shape index: {}]   ;;  %s7563_s14 = inlined_call_operand.hbm [shape: f32[64,128], index: 14, kind: input, shape index: {}]   ;;  %s7564_s15 = inlined_call_operand.hbm [shape: f32[64,128], index: 15, kind: input, shape index: {}]   ;;  %s7565_s16 = inlined_call_operand.hbm [shape: f32[1,128], index: 16, kind: input, shape index: {}]   ;;  %s7566_s17 = inlined_call_operand.hbm [shape: f32[1,128], index: 17, kind: input, shape index: {}]   ;;  %s7567_s18 = inlined_call_operand.vmem [shape: f32[128,16], index: 18, kind: input, shape index: {}]   ;;  %s7568_s19 = inlined_call_operand.vmem [shape: f32[128,16], index: 19, kind: input, shape index: {}]   ;;  %s7569_s20 = inlined_call_operand.vmem [shape: f32[128,16], index: 20, kind: input, shape index: {}]   ;;  %s7570_s21 = inlined_call_operand.vmem [shape: f32[1,16], index: 21, kind: input, shape index: {}]   ;;  %s7571_s22 = inlined_call_operand.hbm [shape: f32[2,256], index: 22, kind: output, shape index: {}]  }
   0x1   :  { %7587 = sst [smem:[#allocation28_spill]] %s7549_s0 }
   0x2   :  { %7588 = sst [smem:[#allocation29_spill]] %s7550_s1 }
   0x3   :  { %7589 = sst [smem:[#allocation30_spill]] %s7551_s2 }
   0x4   :  { %7590 = sst [smem:[#allocation31_spill]] %s7552_s3 }
   0x5   :  { %7591 = sst [smem:[#allocation32_spill]] %s7553_s4 }
   0x6   :  { %7592 = sst [smem:[#allocation33_spill]] %s7554_s5 }
   0x7   :  { %7593 = sst [smem:[#allocation34_spill]] %s7555_s6 }
   0x8   :  { %7594 = sst [smem:[#allocation35_spill]] %s7569_s20 }
   0x9   :  { %7595 = sst [smem:[#allocation36_spill]] %s7570_s21 }
   0xa   :  { %7596 = sst [smem:[#allocation37_spill]] %s7571_s22 }
   0xb   :  { %27 = vsyncpa [#allocation3], 0 }
   0xc   :  { %28 = vsyncpa [#allocation6], 0 }
   0xd   :  { %29 = vsyncpa [#allocation9], 0 }
   0xe   :  { %30 = vsyncpa [#allocation12], 0 }
   0xf   :  { %31 = vsyncpa [#allocation15], 0 }
  0x10   :  { %32 = vsyncpa [#allocation18], 0 }
  0x11   :  { %33 = vsyncpa [#allocation4], 0  ;;  %s6274_s3 = smov [#allocation5]   ;;  %s7597_s4 = sld [smem:[#allocation29_spill]] }
  0x12   :  { %s49_s28 = sshll.u32 %s6274_s3, 4  ;;  %s50_s28 = int_to_ptr.vmem [resolvable:$true] %s49_s28 }
  0x17   :  { %s5996_s0 = scalar_lea.hbm %s7597_s4, 512 }
  0x18   :  { %p5997_p0 = scmp.ne.s32.totalorder %s7597_s4, %s5996_s0  ;;  %p6000_p1 = scmp.lt.u32.totalorder %s5996_s0, %s7597_s4 }
  0x1a   :  { %p6002_p2 = pnand %p6000_p1, %p5997_p0 }
  0x1c   :  { %6005 = shalt.err (!%p6002_p2)
}
  0x1d   :  { %s6006_s6 = scalar_lea.vmem %s50_s28, 512  ;;  %p6011_p4 = scmp.lt.s32.totalorder %s50_s28, %s50_s28 }
  0x1e   :  { %p6007_p3 = scmp.ne.s32.totalorder %s50_s28, %s6006_s6  ;;  %p6012_p5 = scmp.lt.s32.totalorder %s6006_s6, %s6006_s6 }
  0x20   :  { %p6013_p6 = por %p6012_p5, %p6011_p4 }
  0x22   :  { %p6014_p7 = pnand %p6013_p6, %p6007_p3 }
  0x24   :  { %6017 = shalt.err (!%p6014_p7)
}
  0x25   :  { %s6275_s25 = smov 128   ;;  %s6276_s26 = smov 8  }
  0x26   :  { %55 = dma.hbm_to_vmem [thread:$0]  %s7597_s4, 512, %s50_s28, [#allocation6], %s6275_s25, %s6275_s25, %s6276_s26  }
  0x27   :  { %s6277_s3 = smov [#allocation8]   ;;  %s6278_s30 = smov [#allocation11]  }
  0x28   :  { %s78_s29 = sshll.u32 %s6277_s3, 4  ;;  %s104_s0 = sshll.u32 %s6278_s30, 4  ;;  %s79_s29 = int_to_ptr.vmem [resolvable:$true] %s78_s29  ;;  %s105_s0 = int_to_ptr.vmem [resolvable:$true] %s104_s0 }
  0x29   :  { %s7598_s5 = sld [smem:[#allocation34_spill]] }
  0x2f   :  { %s6018_s24 = scalar_lea.hbm %s7598_s5, 16 }
  0x30   :  { %p6019_p8 = scmp.ne.s32.totalorder %s7598_s5, %s6018_s24  ;;  %p6022_p9 = scmp.lt.u32.totalorder %s6018_s24, %s7598_s5 }
  0x32   :  { %p6024_p10 = pnand %p6022_p9, %p6019_p8 }
  0x34   :  { %6027 = shalt.err (!%p6024_p10)
}
  0x35   :  { %s6028_s28 = scalar_lea.vmem %s79_s29, 16  ;;  %s6032_s4 = scalar_lea.vmem %s79_s29, 32 }
  0x36   :  { %p6029_p11 = scmp.ne.s32.totalorder %s79_s29, %s6028_s28  ;;  %p6033_p12 = scmp.lt.s32.totalorder %s79_s29, %s79_s29 }
  0x37   :  { %p6034_p13 = scmp.lt.s32.totalorder %s6032_s4, %s6028_s28 }
  0x39   :  { %p6035_p0 = por %p6034_p13, %p6033_p12 }
  0x3b   :  { %p6036_p1 = pnand %p6035_p0, %p6029_p11 }
  0x3d   :  { %6039 = shalt.err (!%p6036_p1)
}
  0x3e   :  { %81 = dma.hbm_to_vmem [thread:$0]  %s7598_s5, 16, %s79_s29, [#allocation9]  }
  0x3f   :  { %s6040_s20 = scalar_lea.hbm %s7560_s11, 16 }
  0x40   :  { %p6041_p2 = scmp.ne.s32.totalorder %s7560_s11, %s6040_s20  ;;  %p6044_p3 = scmp.lt.u32.totalorder %s6040_s20, %s7560_s11 }
  0x42   :  { %p6046_p4 = pnand %p6044_p3, %p6041_p2 }
  0x44   :  { %6049 = shalt.err (!%p6046_p4)
}
  0x45   :  { %s6050_s24 = scalar_lea.vmem %s105_s0, 16  ;;  %s6054_s6 = scalar_lea.vmem %s105_s0, 32 }
  0x46   :  { %p6051_p5 = scmp.ne.s32.totalorder %s105_s0, %s6050_s24  ;;  %p6055_p6 = scmp.lt.s32.totalorder %s105_s0, %s105_s0 }
  0x47   :  { %p6056_p7 = scmp.lt.s32.totalorder %s6054_s6, %s6050_s24 }
  0x49   :  { %p6057_p8 = por %p6056_p7, %p6055_p6 }
  0x4b   :  { %p6058_p9 = pnand %p6057_p8, %p6051_p5 }
  0x4d   :  { %6061 = shalt.err (!%p6058_p9)
}
  0x4e   :  { %107 = dma.hbm_to_vmem [thread:$0]  %s7560_s11, 16, %s105_s0, [#allocation12]  }
  0x4f   :  { %s6279_s28 = smov [#allocation14]   ;;  %s6280_s2 = smov [#allocation17]  }
  0x50   :  { %s125_s4 = sshll.u32 %s6279_s28, 4  ;;  %s150_s27 = sshll.u32 %s6280_s2, 4  ;;  %s126_s4 = int_to_ptr.vmem [resolvable:$true] %s125_s4  ;;  %s151_s27 = int_to_ptr.vmem [resolvable:$true] %s150_s27 }
  0x51   :  { %s6062_s20 = scalar_lea.hbm %s7563_s14, 1024 }
  0x52   :  { %p6063_p10 = scmp.ne.s32.totalorder %s7563_s14, %s6062_s20  ;;  %p6066_p11 = scmp.lt.u32.totalorder %s6062_s20, %s7563_s14 }
  0x54   :  { %p6068_p12 = pnand %p6066_p11, %p6063_p10 }
  0x56   :  { %6071 = shalt.err (!%p6068_p12)
}
  0x57   :  { %s6072_s11 = scalar_lea.vmem %s126_s4, 1024  ;;  %p6077_p0 = scmp.lt.s32.totalorder %s126_s4, %s126_s4 }
  0x58   :  { %p6073_p13 = scmp.ne.s32.totalorder %s126_s4, %s6072_s11  ;;  %p6078_p1 = scmp.lt.s32.totalorder %s6072_s11, %s6072_s11 }
  0x5a   :  { %p6079_p2 = por %p6078_p1, %p6077_p0 }
  0x5c   :  { %p6080_p3 = pnand %p6079_p2, %p6073_p13 }
  0x5e   :  { %6083 = shalt.err (!%p6080_p3)
}
  0x5f   :  { %131 = dma.hbm_to_vmem [thread:$0]  %s7563_s14, 1024, %s126_s4, [#allocation15], %s6275_s25, %s6275_s25, %s6276_s26  }
  0x60   :  { %s6084_s5 = scalar_lea.hbm %s7565_s16, 16 }
  0x61   :  { %p6085_p4 = scmp.ne.s32.totalorder %s7565_s16, %s6084_s5  ;;  %p6088_p5 = scmp.lt.u32.totalorder %s6084_s5, %s7565_s16 }
  0x63   :  { %p6090_p6 = pnand %p6088_p5, %p6085_p4 }
  0x65   :  { %6093 = shalt.err (!%p6090_p6)
}
  0x66   :  { %s6094_s20 = scalar_lea.vmem %s151_s27, 16  ;;  %s6098_s21 = scalar_lea.vmem %s151_s27, 32 }
  0x67   :  { %p6095_p7 = scmp.ne.s32.totalorder %s151_s27, %s6094_s20  ;;  %p6099_p8 = scmp.lt.s32.totalorder %s151_s27, %s151_s27 }
  0x68   :  { %p6100_p9 = scmp.lt.s32.totalorder %s6098_s21, %s6094_s20 }
  0x6a   :  { %p6101_p10 = por %p6100_p9, %p6099_p8 }
  0x6c   :  { %p6102_p11 = pnand %p6101_p10, %p6095_p7 }
  0x6e   :  { %6105 = shalt.err (!%p6102_p11)
}
  0x6f   :  { %153 = dma.hbm_to_vmem [thread:$0]  %s7565_s16, 16, %s151_s27, [#allocation18]  }
  0x70   :  { %s6281_s30 = smov [#allocation2]   ;;  %s6282_s1 = smov [#allocation7]  }
  0x71   :  { %s40_s23 = sshll.u32 %s6281_s30, 4  ;;  %s62_s11 = sshll.u32 %s6282_s1, 4  ;;  %s41_s23 = int_to_ptr.vmem [resolvable:$true] %s40_s23  ;;  %s63_s11 = int_to_ptr.vmem [resolvable:$true] %s62_s11 }
  0x72   :  { %s7599_s6 = sld [smem:[#allocation28_spill]] }
  0x78   :  { %s6106_s29 = scalar_lea.hbm %s7599_s6, 32 }
  0x79   :  { %p6107_p12 = scmp.ne.s32.totalorder %s7599_s6, %s6106_s29  ;;  %p6110_p13 = scmp.lt.u32.totalorder %s6106_s29, %s7599_s6 }
  0x7b   :  { %p6112_p0 = pnand %p6110_p13, %p6107_p12 }
  0x7d   :  { %6115 = shalt.err (!%p6112_p0)
}
  0x7e   :  { %s6116_s16 = scalar_lea.vmem %s41_s23, 32  ;;  %p6121_p2 = scmp.lt.s32.totalorder %s41_s23, %s41_s23 }
  0x7f   :  { %p6117_p1 = scmp.ne.s32.totalorder %s41_s23, %s6116_s16  ;;  %p6122_p3 = scmp.lt.s32.totalorder %s6116_s16, %s6116_s16 }
  0x81   :  { %p6123_p4 = por %p6122_p3, %p6121_p2 }
  0x83   :  { %p6124_p5 = pnand %p6123_p4, %p6117_p1 }
  0x85   :  { %6127 = shalt.err (!%p6124_p5)
}
  0x86   :  { %43 = dma.hbm_to_vmem [thread:$0]  %s7599_s6, 32, %s41_s23, [#allocation3]  }
  0x87   :  { %s7600_s14 = sld [smem:[#allocation30_spill]] }
  0x8d   :  { %s6128_s4 = scalar_lea.hbm %s7600_s14, 16 }
  0x8e   :  { %p6129_p6 = scmp.ne.s32.totalorder %s7600_s14, %s6128_s4  ;;  %p6132_p7 = scmp.lt.u32.totalorder %s6128_s4, %s7600_s14 }
  0x90   :  { %p6134_p8 = pnand %p6132_p7, %p6129_p6 }
  0x92   :  { %6137 = shalt.err (!%p6134_p8)
}
  0x93   :  { %s6138_s29 = scalar_lea.vmem %s63_s11, 16  ;;  %s6142_s5 = scalar_lea.vmem %s63_s11, 32 }
  0x94   :  { %p6139_p9 = scmp.ne.s32.totalorder %s63_s11, %s6138_s29  ;;  %p6143_p10 = scmp.lt.s32.totalorder %s63_s11, %s63_s11 }
  0x95   :  { %p6144_p11 = scmp.lt.s32.totalorder %s6142_s5, %s6138_s29 }
  0x97   :  { %p6145_p12 = por %p6144_p11, %p6143_p10 }
  0x99   :  { %p6146_p13 = pnand %p6145_p12, %p6139_p9 }
  0x9b   :  { %6149 = shalt.err (!%p6146_p13)
}
  0x9c   :  { %65 = dma.hbm_to_vmem [thread:$0]  %s7600_s14, 16, %s63_s11, [#allocation6]  }
  0x9d   :  { %s6283_s28 = smov [#allocation10]   ;;  %s6284_s22 = smov [#allocation13]  }
  0x9e   :  { %s88_s2 = sshll.u32 %s6283_s28, 4  ;;  %s114_s16 = sshll.u32 %s6284_s22, 4  ;;  %s89_s2 = int_to_ptr.vmem [resolvable:$true] %s88_s2  ;;  %s115_s16 = int_to_ptr.vmem [resolvable:$true] %s114_s16 }
  0x9f   :  { %s6150_s20 = scalar_lea.hbm %s7556_s7, 16 }
  0xa0   :  { %p6151_p0 = scmp.ne.s32.totalorder %s7556_s7, %s6150_s20  ;;  %p6154_p1 = scmp.lt.u32.totalorder %s6150_s20, %s7556_s7 }
  0xa2   :  { %p6156_p2 = pnand %p6154_p1, %p6151_p0 }
  0xa4   :  { %6159 = shalt.err (!%p6156_p2)
}
  0xa5   :  { %s6160_s11 = scalar_lea.vmem %s89_s2, 16  ;;  %s6164_s14 = scalar_lea.vmem %s89_s2, 32 }
  0xa6   :  { %p6161_p3 = scmp.ne.s32.totalorder %s89_s2, %s6160_s11  ;;  %p6165_p4 = scmp.lt.s32.totalorder %s89_s2, %s89_s2 }
  0xa7   :  { %p6166_p5 = scmp.lt.s32.totalorder %s6164_s14, %s6160_s11 }
  0xa9   :  { %p6167_p6 = por %p6166_p5, %p6165_p4 }
  0xab   :  { %p6168_p7 = pnand %p6167_p6, %p6161_p3 }
  0xad   :  { %6171 = shalt.err (!%p6168_p7)
}
  0xae   :  { %91 = dma.hbm_to_vmem [thread:$0]  %s7556_s7, 16, %s89_s2, [#allocation9]  }
  0xaf   :  { %s6172_s23 = scalar_lea.hbm %s7561_s12, 16 }
  0xb0   :  { %p6173_p8 = scmp.ne.s32.totalorder %s7561_s12, %s6172_s23  ;;  %p6176_p9 = scmp.lt.u32.totalorder %s6172_s23, %s7561_s12 }
  0xb2   :  { %p6178_p10 = pnand %p6176_p9, %p6173_p8 }
  0xb4   :  { %6181 = shalt.err (!%p6178_p10)
}
  0xb5   :  { %s6182_s3 = scalar_lea.vmem %s115_s16, 16  ;;  %s6186_s20 = scalar_lea.vmem %s115_s16, 32 }
  0xb6   :  { %p6183_p11 = scmp.ne.s32.totalorder %s115_s16, %s6182_s3  ;;  %p6187_p12 = scmp.lt.s32.totalorder %s115_s16, %s115_s16 }
  0xb7   :  { %p6188_p13 = scmp.lt.s32.totalorder %s6186_s20, %s6182_s3 }
  0xb9   :  { %p6189_p0 = por %p6188_p13, %p6187_p12 }
  0xbb   :  { %p6190_p1 = pnand %p6189_p0, %p6183_p11 }
  0xbd   :  { %6193 = shalt.err (!%p6190_p1)
}
  0xbe   :  { %117 = dma.hbm_to_vmem [thread:$0]  %s7561_s12, 16, %s115_s16, [#allocation12]  }
  0xbf   :  { %s6285_s21 = smov [#allocation16]   ;;  %s6286_s30 = smov [#allocation19]  }
  0xc0   :  { %s137_s4 = sshll.u32 %s6285_s21, 4  ;;  %s160_s1 = sshll.u32 %s6286_s30, 4  ;;  %s138_s4 = int_to_ptr.vmem [resolvable:$true] %s137_s4  ;;  %s161_s1 = int_to_ptr.vmem [resolvable:$true] %s160_s1 }
  0xc1   :  { %s6194_s0 = scalar_lea.hbm %s7564_s15, 1024 }
  0xc2   :  { %p6195_p2 = scmp.ne.s32.totalorder %s7564_s15, %s6194_s0  ;;  %p6198_p3 = scmp.lt.u32.totalorder %s6194_s0, %s7564_s15 }
  0xc4   :  { %p6200_p4 = pnand %p6198_p3, %p6195_p2 }
  0xc6   :  { %6203 = shalt.err (!%p6200_p4)
}
  0xc7   :  { %s6204_s12 = scalar_lea.vmem %s138_s4, 1024  ;;  %p6209_p6 = scmp.lt.s32.totalorder %s138_s4, %s138_s4 }
  0xc8   :  { %p6205_p5 = scmp.ne.s32.totalorder %s138_s4, %s6204_s12  ;;  %p6210_p7 = scmp.lt.s32.totalorder %s6204_s12, %s6204_s12 }
  0xca   :  { %p6211_p8 = por %p6210_p7, %p6209_p6 }
  0xcc   :  { %p6212_p9 = pnand %p6211_p8, %p6205_p5 }
  0xce   :  { %6215 = shalt.err (!%p6212_p9)
}
  0xcf   :  { %143 = dma.hbm_to_vmem [thread:$0]  %s7564_s15, 1024, %s138_s4, [#allocation15], %s6275_s25, %s6275_s25, %s6276_s26  }
  0xd0   :  { %s6216_s27 = scalar_lea.hbm %s7566_s17, 16 }
  0xd1   :  { %p6217_p10 = scmp.ne.s32.totalorder %s7566_s17, %s6216_s27  ;;  %p6220_p11 = scmp.lt.u32.totalorder %s6216_s27, %s7566_s17 }
  0xd3   :  { %p6222_p12 = pnand %p6220_p11, %p6217_p10 }
  0xd5   :  { %6225 = shalt.err (!%p6222_p12)
}
  0xd6   :  { %s6226_s21 = scalar_lea.vmem %s161_s1, 16  ;;  %s6230_s30 = scalar_lea.vmem %s161_s1, 32 }
  0xd7   :  { %p6227_p13 = scmp.ne.s32.totalorder %s161_s1, %s6226_s21  ;;  %p6231_p0 = scmp.lt.s32.totalorder %s161_s1, %s161_s1 }
  0xd8   :  { %p6232_p1 = scmp.lt.s32.totalorder %s6230_s30, %s6226_s21 }
  0xda   :  { %p6233_p2 = por %p6232_p1, %p6231_p0 }
  0xdc   :  { %p6234_p3 = pnand %p6233_p2, %p6227_p13 }
  0xde   :  { %6237 = shalt.err (!%p6234_p3)
}
  0xdf   :  { %163 = dma.hbm_to_vmem [thread:$0]  %s7566_s17, 16, %s161_s1, [#allocation18]  }
  0xe0   :  { %6260 = dma.done.wait [#allocation3], 32  }
  0xe1   :  { %6261 = vsyncadd [#allocation3], 4294967264 }
  0xe2   :  { %6262 = dma.done.wait [#allocation6], 528  }
  0xe3   :  { %6263 = vsyncadd [#allocation6], 4294966768 }
  0xe4   :  { %6264 = dma.done.wait [#allocation9], 32  }
  0xe5   :  { %6265 = vsyncadd [#allocation9], 4294967264 }
  0xe6   :  { %6266 = dma.done.wait [#allocation12], 32  }
  0xe7   :  { %6267 = vsyncadd [#allocation12], 4294967264 }
  0xe8   :  { %6268 = dma.done.wait [#allocation15], 2048  }
  0xe9   :  { %6269 = vsyncadd [#allocation15], 4294965248 }
  0xea   :  { %6270 = dma.done.wait [#allocation18], 32  }
  0xeb   :  { %6271 = vsyncadd [#allocation18], 4294967264  ;;  %v6287_v0 = vmov 0.0|0.0   ;;  %vm7581_vm0 = vmmov 0   ;;  %v6289_v1 = vmov 0.0   ;;  %v206_v2 = vld [vmem:[#allocation5] sm:$0xff]  ;;  %v291_v25 = vlaneseq }
  0xec   :  { %5573 = vmatprep.subr.bf16.mxu0 %v6287_v0  ;;  %5014 = vmatprep.mubr.msk.f32.mxu0 %vm7581_vm0, %v6289_v1  ;;  %v207_v3 = vld [vmem:[#allocation5 + $0x8] sm:$0xff]  ;;  %v208_v4 = vld [vmem:[#allocation5 + $0x10] sm:$0xff]  ;;  %v209_v6 = vld [vmem:[#allocation5 + $0x18] sm:$0xff]  ;;  %vm217_vm1 = vcmask 261120   ;;  %s7601_s1 = sld [smem:[#allocation31_spill]]  ;;  %s6290_s23 = smov 64  }
  0xed   :  { %5017 = vmatprep.subr.mxu1 %v6289_v1  ;;  %5019 = vmatprep.mubr.msk.f32.mxu1 %vm7581_vm0, %v6289_v1  ;;  %v5574_v5 = vpack.c.bf16 %v207_v3, %v206_v2  ;;  %v5577_v7 = vpack.c.bf16 %v209_v6, %v208_v4  ;;  %v205_v8 = vld [vmem:[#allocation2] sm:$0x3]  ;;  %v4616_v9 = vld [vmem:[#allocation7] ss:$0 sm:$0xff]  ;;  %v6601_v26 = vand.u32 127, %v291_v25  ;;  %v6606_v28 = vshrl.u32 %v291_v25, 7 }
  0xee   :  { %vm310_vm3 = vcmask 1041408   ;;  %vm306_vm4 = vcmask 15360   ;;  %s7602_s21 = sld [smem:[#allocation33_spill]]  ;;  %vm483_vm9 = vcmask 1043456   ;;  %vm565_vm10 = vcmask 523264   ;;  %s7603_s22 = sld [smem:[#allocation32_spill]] }
  0xef   :  { %5575 = vmatpush3.bf16.msra.mxu0 %v5574_v5  ;;  %v6604_v27 = vmul.u32 2, %v6601_v26  ;;  %v462_v33 = vand.u32 1, %v6606_v28  ;;  %v6631_v34 = vadd.s32 1, %v6606_v28  ;;  %vm479_vm11 = vcmask 31744   ;;  %s6291_s0 = smov 96   ;;  %s6292_s24 = smov 112  }
  0xf0   :  { %5576 = vmatprep.subr.bf16.mxu0 %v6287_v0  ;;  %s6293_s29 = smov 80   ;;  %s6294_s5 = smov 32   ;;  %vm981_vm12 = vcmask 130048   ;;  %vm984_vm13 = vcmask 392192  }
  0xf1   :  { %v6609_v29 = vadd.s32 1, %v6604_v27  ;;  %vm296_vm5 = vcmp.eq.s32.totalorder %v6606_v28, %v6604_v27  ;;  %v472_v35 = vadd.s32 1, %v462_v33  ;;  %vm7583_vm6 = vcmp.eq.s32.totalorder %v6601_v26, %v6631_v34  ;;  %s6295_s12 = smov 16   ;;  %s6296_s16 = smov 48  }
  0xf2   :  { %v557_v10 = vld [vmem:[%s7601_s1] sm:$0xff]  ;;  %v558_v11 = vld [vmem:[%s7601_s1 + $0x8] sm:$0xff]  ;;  %v559_v12 = vld [vmem:[%s7601_s1 + $0x10] sm:$0xff]  ;;  %v6624_v32 = vsel %vm296_vm5, 1.0, %v6289_v1  ;;  %s6298_s25 = smov 104   ;;  %s6299_s17 = smov 88  }
  0xf3   :  { %5578 = vmatpush3.bf16.msra.mxu0 %v5577_v7  ;;  %v5580_v14 = vpack.c.bf16 %v558_v11, %v557_v10  ;;  %v560_v15 = vld [vmem:[%s7601_s1 + $0x18] sm:$0xff]  ;;  %v561_v19 = vld [vmem:[%s7601_s1 + $0x20] sm:$0xff]  ;;  %v562_v20 = vld [vmem:[%s7601_s1 + $0x28] sm:$0xff]  ;;  %vm300_vm2 = vcmp.eq.s32.totalorder %v6606_v28, %v6609_v29  ;;  %vm475_vm7 = vcmp.le.s32.totalorder %v472_v35, 1  ;;  %s6300_s4 = smov 72   ;;  %s6302_s11 = smov 40  }
  0xf4   :  { %5579 = vmatprep.subr.bf16.mxu0 %v6287_v0  ;;  %v5583_v18 = vpack.c.bf16 %v560_v15, %v559_v12  ;;  %v5586_v21 = vpack.c.bf16 %v562_v20, %v561_v19  ;;  %v563_v22 = vld [vmem:[%s7601_s1 + $0x30] sm:$0xff]  ;;  %v564_v23 = vld [vmem:[%s7601_s1 + $0x38] sm:$0xff]  ;;  %v6614_v30 = vsel %vm300_vm2, 1.0, %v6289_v1  ;;  %vm476_vm8 = vmand %vm7583_vm6, %vm475_vm7  ;;  %vm1067_vm2 = vcmask 64512   ;;  %s6301_s1 = smov 24   ;;  %s7609_s3 = sld [smem:[#allocation35_spill]] }
  0xf5   :  { %v5589_v24 = vpack.c.bf16 %v564_v23, %v563_v22  ;;  %v646_v36 = vld [vmem:[%s7602_s21] sm:$0xff]  ;;  %v647_v37 = vld [vmem:[%s7602_s21 + $0x8] sm:$0xff]  ;;  %v4624_v38 = vsel %vm476_vm8, 1.0, %v6289_v1  ;;  %v648_v41 = vld [vmem:[%s7602_s21 + $0x10] sm:$0xff]  ;;  %vm1614_vm5 = vcmask 195584   ;;  %vm1617_vm7 = vcmask 326656  }
  0xf6   :  { %5015 = vmatmul.mubr.msk.f32.vlgmr.msra.gmra.mrb[0].mxu0 %vm217_vm1, %v205_v8  ;;  %v5592_v39 = vpack.c.bf16 %v647_v37, %v646_v36  ;;  %v649_v42 = vld [vmem:[%s7602_s21 + $0x18] sm:$0xff]  ;;  %v650_v45 = vld [vmem:[%s7602_s21 + $0x20] sm:$0xff]  ;;  %v651_v46 = vld [vmem:[%s7602_s21 + $0x28] sm:$0xff]  ;;  %vm1620_vm8 = vcmask 457728   ;;  %s7610_s14 = sld [smem:[#allocation36_spill]] }
  0xf7   :  { %5048 = vmatprep.mubr.msk.f32.mxu0 %vm7581_vm0, %v6289_v1  ;;  %5581 = vmatpush3.bf16.msra.mxu0 %v5580_v14  ;;  %v5595_v44 = vpack.c.bf16 %v649_v42, %v648_v41  ;;  %v5598_v47 = vpack.c.bf16 %v651_v46, %v650_v45  ;;  %v652_v48 = vld [vmem:[%s7602_s21 + $0x30] sm:$0xff]  ;;  %v653_v49 = vld [vmem:[%s7602_s21 + $0x38] sm:$0xff]  ;;  %v638_v51 = vld [vmem:[%s7603_s22] sm:$0xff] }
  0xf8   :  { %5582 = vmatprep.subr.bf16.mxu0 %v6287_v0  ;;  %v5601_v50 = vpack.c.bf16 %v653_v49, %v652_v48  ;;  %v639_v52 = vld [vmem:[%s7603_s22 + $0x8] sm:$0xff]  ;;  %v640_v55 = vld [vmem:[%s7603_s22 + $0x10] sm:$0xff]  ;;  %v641_v56 = vld [vmem:[%s7603_s22 + $0x18] sm:$0xff] }
  0xf9   :  { %v5604_v53 = vpack.c.bf16 %v639_v52, %v638_v51  ;;  %v5607_v60 = vpack.c.bf16 %v641_v56, %v640_v55  ;;  %v642_v61 = vld [vmem:[%s7603_s22 + $0x20] sm:$0xff]  ;;  %v643_v62 = vld [vmem:[%s7603_s22 + $0x28] sm:$0xff]  ;;  %v644_v2 = vld [vmem:[%s7603_s22 + $0x30] sm:$0xff] }
  0xfa   :  { %v5610_v63 = vpack.c.bf16 %v643_v62, %v642_v61  ;;  %v645_v3 = vld [vmem:[%s7603_s22 + $0x38] sm:$0xff]  ;;  %v1230_v56 = vld [vmem:[%s7559_s10] sm:$0xff] }
  0xfb   :  { %5584 = vmatpush3.bf16.msra.mxu0 %v5583_v18  ;;  %v5613_v4 = vpack.c.bf16 %v645_v3, %v644_v2  ;;  %v1234_v62 = vld [vmem:[%s7559_s10 + $0x20] sm:$0xff]  ;;  %v1236_v3 = vld [vmem:[%s7559_s10 + $0x30] sm:$0xff] }
  0xfc   :  { %5585 = vmatprep.subr.bf16.mxu0 %v6287_v0 }
  0xff   :  { %5587 = vmatpush3.bf16.msra.mxu0 %v5586_v21 }
 0x100   :  { %5588 = vmatprep.subr.bf16.mxu0 %v6287_v0 }
 0x103   :  { %5590 = vmatpush3.bf16.msra.mxu0 %v5589_v24 }
 0x104   :  { %5089 = vmatprep.subr.mxu0 %v6289_v1 }
 0x1c9   :  { %v287_v13 = vpop.f32.mrb[0].mxu0 }
 0x1ca   :  { %v288_v16 = vadd.f32 %v4616_v9, %v287_v13  ;;  %v5016_v17 = vpop.f32.mrb[1].mxu0 }
 0x1cc   :  { %304 = vrot.lane.b32.xlu0 %v288_v16, %s6290_s23 }
 0x23e   :  { %v305_v31 = vpop.permute.xlu0 %304 }
 0x23f   :  { %5018 = vmatpush3.msk.msra.mxu1 %vm310_vm3, %v305_v31  ;;  %v6730_v31 = vsub.s32 0, %v6606_v28 }
 0x240   :  { %5020 = vmatmul.mubr.msk.f32.vlgmr.msra.gmra.mrb[0].mxu1 %vm306_vm4, %v6614_v30  ;;  %5022 = vmatprep.subr.mxu1 %v6289_v1 }
 0x241   :  { %5023 = vmatpush3.msk.msra.mxu1 %vm310_vm3, %v288_v16  ;;  %5024 = vmatprep.mubr.msk.f32.mxu1 %vm7581_vm0, %v6289_v1 }
 0x242   :  { %5027 = vmatprep.subr.mxu1 %v6289_v1 }
 0x248   :  { %5025 = vmatmul.mubr.msk.f32.vlgmr.msra.gmra.mrb[0].mxu1 %vm306_vm4, %v6624_v32 }
 0x249   :  { %5029 = vmatprep.mubr.msk.f32.mxu1 %vm7581_vm0, %v6289_v1 }
 0x31b   :  { %v454_v40 = vpop.f32.mrb[0].mxu1 }
 0x31c   :  { %v5026_v43 = vpop.f32.mrb[1].mxu1  ;;  %5028 = vmatpush3.msk.msra.mxu1 %vm483_vm9, %v454_v40  ;;  %5049 = vmatmul.mubr.msk.f32.vlgmr.msra.gmra.mrb[2].mxu0 %vm565_vm10, %v454_v40 }
 0x31d   :  { %5030 = vmatmul.mubr.msk.f32.vlgmr.msra.gmra.mrb[2].mxu1 %vm479_vm11, %v4624_v38  ;;  %5591 = vmatprep.subr.bf16.mxu1 %v6287_v0 }
 0x31e   :  { %5593 = vmatpush3.bf16.msra.mxu1 %v5592_v39  ;;  %5067 = vmatprep.mubr.msk.f32.mxu1 %vm7581_vm0, %v6289_v1 }
 0x31f   :  { %5594 = vmatprep.subr.bf16.mxu1 %v6287_v0  ;;  %5091 = vmatprep.mubr.msk.f32.mxu0 %vm7581_vm0, %v6289_v1 }
 0x322   :  { %5596 = vmatpush3.bf16.msra.mxu1 %v5595_v44 }
 0x323   :  { %5597 = vmatprep.subr.bf16.mxu1 %v6287_v0 }
 0x326   :  { %5599 = vmatpush3.bf16.msra.mxu1 %v5598_v47 }
 0x327   :  { %5600 = vmatprep.subr.bf16.mxu1 %v6287_v0 }
 0x32a   :  { %5602 = vmatpush3.bf16.msra.mxu1 %v5601_v50 }
 0x32b   :  { %5603 = vmatprep.subr.bf16.mxu1 %v6287_v0 }
 0x3ef   :  { %v634_v54 = vpop.f32.mrb[2].mxu0 }
 0x3f0   :  { %v553_v57 = vpop.f32.mrb[2].mxu1  ;;  %v5050_v58 = vpop.f32.mrb[3].mxu0 }
 0x3f1   :  { %v5031_v59 = vpop.f32.mrb[3].mxu1  ;;  %5068 = vmatmul.mubr.msk.f32.vlgmr.msra.gmra.mrb[4].mxu1 %vm565_vm10, %v553_v57  ;;  %v1231_v57 = vld [vmem:[%s7559_s10 + $0x8] sm:$0xff]  ;;  %v1232_v58 = vld [vmem:[%s7559_s10 + $0x10] sm:$0xff] }
 0x3f2   :  { %5605 = vmatpush3.bf16.msra.mxu1 %v5604_v53  ;;  %5086 = vmatprep.mubr.msk.f32.mxu1 %vm7581_vm0, %v6289_v1  ;;  %v5628_v59 = vpack.c.bf16 %v1231_v57, %v1230_v56 }
 0x3f3   :  { %5606 = vmatprep.subr.bf16.mxu1 %v6287_v0 }
 0x3f6   :  { %5608 = vmatpush3.bf16.msra.mxu1 %v5607_v60  ;;  %v1233_v60 = vld [vmem:[%s7559_s10 + $0x18] sm:$0xff] }
 0x3f7   :  { %5609 = vmatprep.subr.bf16.mxu1 %v6287_v0  ;;  %v5631_v61 = vpack.c.bf16 %v1233_v60, %v1232_v58  ;;  %v6845_v58 = vadd.s32 8, %v6606_v28 }
 0x3f9   :  { %vm1385_vm3 = vcmp.eq.s32.totalorder %v6845_v58, %v6609_v29  ;;  %vm1382_vm4 = vcmp.eq.s32.totalorder %v6845_v58, %v6604_v27 }
 0x3fa   :  { %5611 = vmatpush3.bf16.msra.mxu1 %v5610_v63  ;;  %v1235_v63 = vld [vmem:[%s7559_s10 + $0x28] sm:$0xff]  ;;  %v6850_v60 = vsel %vm1385_vm3, 1.0, %v6289_v1 }
 0x3fb   :  { %5612 = vmatprep.subr.bf16.mxu1 %v6287_v0  ;;  %v5634_v2 = vpack.c.bf16 %v1235_v63, %v1234_v62  ;;  %v6859_v62 = vsel %vm1382_vm4, 1.0, %v6289_v1 }
 0x3fe   :  { %5614 = vmatpush3.bf16.msra.mxu1 %v5613_v4  ;;  %v1237_v4 = vld [vmem:[%s7559_s10 + $0x38] sm:$0xff]  ;;  %s6303_s10 = smov 56  }
 0x3ff   :  { %5627 = vmatprep.subr.bf16.mxu1 %v6287_v0 }
 0x401   :  { %5087 = vmatmul.mubr.msk.f32.vlgmr.msra.gmra.mrb[4].mxu1 %vm565_vm10, %v454_v40 }
 0x402   :  { %5139 = vmatprep.mubr.msk.f32.mxu1 %vm7581_vm0, %v6289_v1  ;;  %5629 = vmatpush3.bf16.msra.mxu1 %v5628_v59 }
 0x403   :  { %5630 = vmatprep.subr.bf16.mxu1 %v6287_v0 }
 0x406   :  { %5632 = vmatpush3.bf16.msra.mxu1 %v5631_v61 }
 0x407   :  { %5633 = vmatprep.subr.bf16.mxu1 %v6287_v0 }
 0x40a   :  { %5635 = vmatpush3.bf16.msra.mxu1 %v5634_v2 }
 0x40b   :  { %5636 = vmatprep.subr.bf16.mxu1 %v6287_v0 }
 0x4d4   :  { %v793_v5 = vpop.f32.mrb[4].mxu1 }
 0x4d5   :  { %v5088_v6 = vpop.f32.mrb[5].mxu1  ;;  %5090 = vmatpush3.msk.msra.mxu0 %vm483_vm9, %v793_v5  ;;  %v5637_v5 = vpack.c.bf16 %v1237_v4, %v1236_v3 }
 0x4d6   :  { %5092 = vmatmul.mubr.msk.f32.vlgmr.msra.gmra.mrb[4].mxu0 %vm479_vm11, %v6614_v30  ;;  %5094 = vmatprep.subr.mxu0 %v6289_v1 }
 0x4d7   :  { %5095 = vmatpush3.msk.msra.mxu0 %vm483_vm9, %v634_v54  ;;  %5096 = vmatprep.mubr.msk.f32.mxu0 %vm7581_vm0, %v6289_v1 }
 0x4d8   :  { %5099 = vmatprep.subr.mxu0 %v6289_v1  ;;  %5638 = vmatpush3.bf16.msra.mxu1 %v5637_v5 }
 0x4d9   :  { %5639 = vmatprep.subr.bf16.mxu1 %v6287_v0 }
 0x4de   :  { %5097 = vmatmul.mubr.msk.f32.vlgmr.msra.gmra.mrb[4].mxu0 %vm479_vm11, %v6624_v32 }
 0x4df   :  { %5101 = vmatprep.mubr.msk.f32.mxu0 %vm7581_vm0, %v6289_v1 }
 0x5b1   :  { %v943_v7 = vpop.f32.mrb[4].mxu0 }
 0x5b2   :  { %v949_v8 = vsel %vm565_vm10, %v943_v7, 0.0  ;;  %v5098_v9 = vpop.f32.mrb[5].mxu0 }
 0x5b3   :  { %v950_v10 = vrot.slane %v949_v8, 4 }
 0x5b5   :  { %v951_v11 = vadd.f32 %v950_v10, %v949_v8 }
 0x5b7   :  { %v952_v12 = vrot.slane %v951_v11, 2 }
 0x5b9   :  { %v953_v13 = vadd.f32 %v952_v12, %v951_v11 }
 0x5bb   :  { %v954_v14 = vrot.slane %v953_v13, 1 }
 0x5bd   :  { %v955_v15 = vadd.f32 %v954_v14, %v953_v13 }
 0x5bf   :  { %961 = vrot.lane.b32.xlu1 %v955_v15, %s6291_s0  ;;  %957 = vrot.lane.b32.xlu0 %v955_v15, %s6292_s24 }
 0x5c3   :  { %965 = vrot.lane.b32.xlu1 %v955_v15, %s6293_s29 }
 0x631   :  { %v962_v16 = vpop.permute.xlu1 %961  ;;  %v958_v17 = vpop.permute.xlu0 %957 }
 0x632   :  { %v960_v18 = vadd.f32 %v958_v17, %v955_v15  ;;  %v4634_v15 = vld [vmem:[#allocation8] ss:$0 sm:$0xff]  ;;  %v4635_v17 = vld [vmem:[#allocation10] ss:$0 sm:$0xff] }
 0x634   :  { %v964_v19 = vadd.f32 %v962_v16, %v960_v18 }
 0x635   :  { %v966_v20 = vpop.permute.xlu1 %965 }
 0x636   :  { %v968_v21 = vadd.f32 %v966_v20, %v964_v19  ;;  %v1141_v19 = vld [vmem:[%s7557_s8] sm:$0xff]  ;;  %v1142_v20 = vld [vmem:[%s7557_s8 + $0x8] sm:$0xff] }
 0x638   :  { %v970_v22 = vmul.f32 0.03125, %v968_v21 }
 0x63a   :  { %975 = vrot.lane.b32.xlu1 %v970_v22, %s6294_s5  ;;  %972 = vrot.lane.b32.xlu0 %v970_v22, %s6295_s12 }
 0x63e   :  { %978 = vrot.lane.b32.xlu0 %v970_v22, %s6296_s16 }
 0x6ac   :  { %v973_v23 = vpop.permute.xlu0 %972  ;;  %v976_v24 = vpop.permute.xlu1 %975 }
 0x6ad   :  { %v982_v25 = vsel %vm981_vm12, %v970_v22, %v973_v23 }
 0x6ae   :  { %v983_v33 = vsel %vm217_vm1, %v982_v25, %v976_v24  ;;  %v5616_v24 = vpack.c.bf16 %v1142_v20, %v1141_v19  ;;  %v1143_v25 = vld [vmem:[%s7557_s8 + $0x10] sm:$0xff] }
 0x6b0   :  { %v979_v35 = vpop.permute.xlu0 %978 }
 0x6b1   :  { %v985_v36 = vsel %vm984_vm13, %v983_v33, %v979_v35  ;;  %v1144_v33 = vld [vmem:[%s7557_s8 + $0x18] sm:$0xff] }
 0x6b2   :  { %v989_v37 = vrot.slane %v985_v36, %v6730_v31  ;;  %v5619_v35 = vpack.c.bf16 %v1144_v33, %v1143_v25  ;;  %v1145_v36 = vld [vmem:[%s7557_s8 + $0x20] sm:$0xff] }
 0x6b4   :  { %v990_v38 = vsub.f32 %v943_v7, %v989_v37  ;;  %v1052_v7 = vand.u32 3, %v6606_v28  ;;  %v1146_v37 = vld [vmem:[%s7557_s8 + $0x28] sm:$0xff] }
 0x6b6   :  { %v991_v39 = vmul.f32 %v990_v38, %v990_v38  ;;  %v1060_v12 = vadd.s32 1, %v1052_v7 }
 0x6b8   :  { %v992_v40 = vsel %vm565_vm10, %v991_v39, 0.0  ;;  %vm1063_vm14 = vcmp.le.s32.totalorder %v1060_v12, 3  ;;  %v1147_v39 = vld [vmem:[%s7557_s8 + $0x30] sm:$0xff] }
 0x6b9   :  { %v993_v41 = vrot.slane %v992_v40, 4  ;;  %vm1064_vm15 = vmand %vm7583_vm6, %vm1063_vm14 }
 0x6ba   :  { %v4636_v23 = vsel %vm1064_vm15, 1.0, %v6289_v1 }
 0x6bb   :  { %v994_v42 = vadd.f32 %v993_v41, %v992_v40  ;;  %v1148_v40 = vld [vmem:[%s7557_s8 + $0x38] sm:$0xff] }
 0x6bc   :  { %v5625_v41 = vpack.c.bf16 %v1148_v40, %v1147_v39 }
 0x6bd   :  { %v995_v43 = vrot.slane %v994_v42, 2 }
 0x6bf   :  { %v996_v44 = vadd.f32 %v995_v43, %v994_v42  ;;  %v1222_v42 = vld [vmem:[%s7558_s9] sm:$0xff]  ;;  %v1223_v43 = vld [vmem:[%s7558_s9 + $0x8] sm:$0xff] }
 0x6c1   :  { %v997_v45 = vrot.slane %v996_v44, 1 }
 0x6c3   :  { %v998_v46 = vadd.f32 %v997_v45, %v996_v44  ;;  %v5640_v44 = vpack.c.bf16 %v1223_v43, %v1222_v42  ;;  %v1224_v45 = vld [vmem:[%s7558_s9 + $0x10] sm:$0xff] }
 0x6c5   :  { %1004 = vrot.lane.b32.xlu0 %v998_v46, %s6291_s0  ;;  %1000 = vrot.lane.b32.xlu1 %v998_v46, %s6292_s24 }
 0x6c9   :  { %1008 = vrot.lane.b32.xlu1 %v998_v46, %s6293_s29 }
 0x737   :  { %v1001_v47 = vpop.permute.xlu1 %1000  ;;  %v1005_v49 = vpop.permute.xlu0 %1004 }
 0x738   :  { %v1003_v48 = vadd.f32 %v1001_v47, %v998_v46  ;;  %v1225_v46 = vld [vmem:[%s7558_s9 + $0x18] sm:$0xff] }
 0x73a   :  { %v1007_v50 = vadd.f32 %v1005_v49, %v1003_v48  ;;  %v5643_v49 = vpack.c.bf16 %v1225_v46, %v1224_v45 }
 0x73b   :  { %v1009_v51 = vpop.permute.xlu1 %1008 }
 0x73c   :  { %v1011_v52 = vadd.f32 %v1009_v51, %v1007_v50  ;;  %v1226_v50 = vld [vmem:[%s7558_s9 + $0x20] sm:$0xff]  ;;  %v1227_v51 = vld [vmem:[%s7558_s9 + $0x28] sm:$0xff] }
 0x73e   :  { %v1012_v53 = vmul.f32 0.03125, %v1011_v52  ;;  %v5646_v52 = vpack.c.bf16 %v1227_v51, %v1226_v50 }
 0x740   :  { %v1013_v54 = vadd.f32 1e-05, %v1012_v53  ;;  %v1228_v53 = vld [vmem:[%s7558_s9 + $0x30] sm:$0xff] }
 0x742   :  { %5974 = vrsqrt.f32 %v1013_v54  ;;  %v1229_v54 = vld [vmem:[%s7558_s9 + $0x38] sm:$0xff]  ;;  %s6297_s9 = smov 120  }
 0x74c   :  { %v5975_v55 = vpop.eup %5974 }
 0x74d   :  { %1019 = vrot.lane.b32.xlu1 %v5975_v55, %s6294_s5  ;;  %1016 = vrot.lane.b32.xlu0 %v5975_v55, %s6295_s12 }
 0x751   :  { %1022 = vrot.lane.b32.xlu0 %v5975_v55, %s6296_s16 }
 0x7bf   :  { %v1017_v6 = vpop.permute.xlu0 %1016  ;;  %v1020_v8 = vpop.permute.xlu1 %1019 }
 0x7c0   :  { %v1025_v9 = vsel %vm981_vm12, %v5975_v55, %v1017_v6  ;;  %v5649_v55 = vpack.c.bf16 %v1229_v54, %v1228_v53 }
 0x7c1   :  { %v1026_v10 = vsel %vm217_vm1, %v1025_v9, %v1020_v8 }
 0x7c3   :  { %v1023_v11 = vpop.permute.xlu0 %1022 }
 0x7c4   :  { %v1027_v13 = vsel %vm984_vm13, %v1026_v10, %v1023_v11 }
 0x7c5   :  { %v1031_v14 = vrot.slane %v1027_v13, %v6730_v31 }
 0x7c7   :  { %v1032_v16 = vmul.f32 %v1031_v14, %v990_v38  ;;  %v5622_v38 = vpack.c.bf16 %v1146_v37, %v1145_v36 }
 0x7c9   :  { %v1039_v18 = vmul.f32 %v4634_v15, %v1032_v16 }
 0x7cb   :  { %v1046_v21 = vadd.f32 %v4635_v17, %v1039_v18 }
 0x7cd   :  { %v1047_v22 = vmax.f32 %v1046_v21, 0.0 }
 0x7cf   :  { %5100 = vmatpush3.msra.mxu0 %v1047_v22 }
 0x7d0   :  { %5102 = vmatmul.mubr.msk.f32.vlgmr.msra.gmra.mrb[6].mxu0 %vm1067_vm2, %v4636_v23  ;;  %5615 = vmatprep.subr.bf16.mxu0 %v6287_v0 }
 0x7d1   :  { %5617 = vmatpush3.bf16.msra.mxu0 %v5616_v24  ;;  %5120 = vmatprep.mubr.msk.f32.mxu0 %vm7581_vm0, %v6289_v1 }
 0x7d2   :  { %5618 = vmatprep.subr.bf16.mxu0 %v6287_v0 }
 0x7d5   :  { %5620 = vmatpush3.bf16.msra.mxu0 %v5619_v35 }
 0x7d6   :  { %5621 = vmatprep.subr.bf16.mxu0 %v6287_v0 }
 0x7d9   :  { %5623 = vmatpush3.bf16.msra.mxu0 %v5622_v38 }
 0x7da   :  { %5624 = vmatprep.subr.bf16.mxu0 %v6287_v0 }
 0x7dd   :  { %5626 = vmatpush3.bf16.msra.mxu0 %v5625_v41 }
 0x7e0   :  { %5121 = vmatmul.mubr.msk.f32.vlgmr.msra.gmra.mrb[8].mxu0 %vm565_vm10, %v1047_v22 }
 0x7e1   :  { %5163 = vmatprep.mubr.msk.f32.mxu0 %vm1067_vm2, %v6614_v30 }
 0x8a3   :  { %v1137_v47 = vpop.f32.mrb[6].mxu0 }
 0x8a4   :  { %v5103_v48 = vpop.f32.mrb[7].mxu0  ;;  %5140 = vmatmul.mubr.msk.f32.vlgmr.msra.gmra.mrb[6].mxu1 %vm565_vm10, %v1137_v47 }
 0x8a5   :  { %5641 = vmatpush3.bf16.msra.mxu1 %v5640_v44  ;;  %5158 = vmatprep.mubr.msk.f32.mxu1 %vm7581_vm0, %v6289_v1  ;;  %vm7586_vm0 = vcmask 916480  }
 0x8a6   :  { %5642 = vmatprep.subr.bf16.mxu1 %v6287_v0 }
 0x8a9   :  { %5644 = vmatpush3.bf16.msra.mxu1 %v5643_v49 }
 0x8aa   :  { %5645 = vmatprep.subr.bf16.mxu1 %v6287_v0 }
 0x8ad   :  { %5647 = vmatpush3.bf16.msra.mxu1 %v5646_v52 }
 0x8ae   :  { %5648 = vmatprep.subr.bf16.mxu1 %v6287_v0 }
 0x8b1   :  { %5650 = vmatpush3.bf16.msra.mxu1 %v5649_v55 }
 0x8b3   :  { %v1218_v56 = vpop.f32.mrb[8].mxu0 }
 0x8b4   :  { %5159 = vmatmul.mubr.msk.f32.vlgmr.msra.gmra.mrb[6].mxu1 %vm565_vm10, %v1047_v22  ;;  %v5122_v57 = vpop.f32.mrb[9].mxu0 }
 0x987   :  { %v1377_v59 = vpop.f32.mrb[6].mxu1 }
 0x988   :  { %v5160_v61 = vpop.f32.mrb[7].mxu1  ;;  %5161 = vmatprep.subr.mxu0 %v1377_v59 }
 0x989   :  { %5162 = vmatpush3.msra.mxu0 %v1377_v59 }
 0x98a   :  { %5164 = vmatmul.mubr.msk.f32.vlgmr.msra.gmra.mrb[10].mxu0 %vm1067_vm2, %v6850_v60  ;;  %5166 = vmatprep.subr.mxu0 %v1218_v56 }
 0x98b   :  { %5167 = vmatpush3.msra.mxu0 %v1218_v56  ;;  %5168 = vmatprep.mubr.msk.f32.mxu0 %vm1067_vm2, %v6624_v32 }
 0x992   :  { %5169 = vmatmul.mubr.msk.f32.vlgmr.msra.gmra.mrb[10].mxu0 %vm1067_vm2, %v6859_v62 }
 0xa65   :  { %v6863_v63 = vpop.f32.mrb[10].mxu0 }
 0xa66   :  { %v1551_v2 = vsel %vm565_vm10, %v6863_v63, 0.0  ;;  %v6867_v3 = vpop.f32.mrb[11].mxu0 }
 0xa67   :  { %v1550_v4 = vsel %vm565_vm10, %v6867_v3, 0.0 }
 0xa68   :  { %v1552_v5 = vadd.f32 %v1551_v2, %v1550_v4 }
 0xa6a   :  { %v1553_v6 = vrot.slane %v1552_v5, 4 }
 0xa6c   :  { %v1554_v7 = vadd.f32 %v1553_v6, %v1552_v5 }
 0xa6e   :  { %v1555_v8 = vrot.slane %v1554_v7, 2 }
 0xa70   :  { %v1556_v9 = vadd.f32 %v1555_v8, %v1554_v7 }
 0xa72   :  { %v1557_v10 = vrot.slane %v1556_v9, 1 }
 0xa74   :  { %v1558_v11 = vadd.f32 %v1557_v10, %v1556_v9 }
 0xa76   :  { %1564 = vrot.lane.b32.xlu0 %v1558_v11, %s6292_s24  ;;  %1560 = vrot.lane.b32.xlu1 %v1558_v11, %s6297_s9 }
 0xa7a   :  { %1572 = vrot.lane.b32.xlu0 %v1558_v11, %s6291_s0  ;;  %1568 = vrot.lane.b32.xlu1 %v1558_v11, %s6298_s25 }
 0xa7e   :  { %1580 = vrot.lane.b32.xlu0 %v1558_v11, %s6293_s29  ;;  %1576 = vrot.lane.b32.xlu1 %v1558_v11, %s6299_s17 }
 0xa82   :  { %1584 = vrot.lane.b32.xlu1 %v1558_v11, %s6300_s4 }
 0xae8   :  { %v1565_v12 = vpop.permute.xlu0 %1564  ;;  %v1561_v13 = vpop.permute.xlu1 %1560 }
 0xae9   :  { %v1563_v14 = vadd.f32 %v1561_v13, %v1558_v11 }
 0xaeb   :  { %v1567_v15 = vadd.f32 %v1565_v12, %v1563_v14 }
 0xaec   :  { %v1573_v16 = vpop.permute.xlu0 %1572  ;;  %v1569_v17 = vpop.permute.xlu1 %1568 }
 0xaed   :  { %v1571_v18 = vadd.f32 %v1569_v17, %v1567_v15 }
 0xaef   :  { %v1575_v19 = vadd.f32 %v1573_v16, %v1571_v18 }
 0xaf0   :  { %v1577_v20 = vpop.permute.xlu1 %1576  ;;  %v1581_v22 = vpop.permute.xlu0 %1580 }
 0xaf1   :  { %v1579_v21 = vadd.f32 %v1577_v20, %v1575_v19 }
 0xaf3   :  { %v1583_v23 = vadd.f32 %v1581_v22, %v1579_v21  ;;  %v1728_v21 = vand.u32 7, %v6606_v28 }
 0xaf4   :  { %v1585_v24 = vpop.permute.xlu1 %1584 }
 0xaf5   :  { %v1587_v25 = vadd.f32 %v1585_v24, %v1583_v23  ;;  %v1750_v22 = vadd.s32 1, %v1728_v21  ;;  %v1942_v24 = vld [vmem:[#allocation16] sm:$0xff]  ;;  %v1849_v21 = vld [vmem:[%s7562_s13 + $0x20] sm:$0xff] }
 0xaf7   :  { %v1589_v33 = vmul.f32 0.0078125, %v1587_v25  ;;  %vm1756_vm9 = vcmp.le.s32.totalorder %v1750_v22, 7  ;;  %v1943_v25 = vld [vmem:[#allocation16 + $0x8] sm:$0xff]  ;;  %v1850_v22 = vld [vmem:[%s7562_s13 + $0x28] sm:$0xff] }
 0xaf8   :  { %vm1758_vm11 = vmand %vm7583_vm6, %vm1756_vm9  ;;  %vm7585_vm6 = vcmask 982016  }
 0xaf9   :  { %1594 = vrot.lane.b32.xlu1 %v1589_v33, %s6295_s12  ;;  %1591 = vrot.lane.b32.xlu0 %v1589_v33, %s6276_s26  ;;  %v4649_v23 = vsel %vm1758_vm11, 1.0, %v6289_v1 }
 0xafa   :  { %5175 = vmatprep.mubr.msk.f32.mxu0 %vm981_vm12, %v4649_v23  ;;  %v5663_v23 = vpack.c.bf16 %v1850_v22, %v1849_v21 }
 0xafd   :  { %1600 = vrot.lane.b32.xlu1 %v1589_v33, %s6294_s5  ;;  %1597 = vrot.lane.b32.xlu0 %v1589_v33, %s6301_s1 }
 0xb01   :  { %1606 = vrot.lane.b32.xlu1 %v1589_v33, %s6296_s16  ;;  %1603 = vrot.lane.b32.xlu0 %v1589_v33, %s6302_s11 }
 0xb05   :  { %1609 = vrot.lane.b32.xlu0 %v1589_v33, %s6303_s10 }
 0xb6b   :  { %v1595_v35 = vpop.permute.xlu1 %1594  ;;  %v1592_v36 = vpop.permute.xlu0 %1591 }
 0xb6c   :  { %v1612_v37 = vsel %vm1067_vm2, %v1589_v33, %v1592_v36  ;;  %v1944_v33 = vld [vmem:[#allocation16 + $0x10] sm:$0xff]  ;;  %v1945_v36 = vld [vmem:[#allocation16 + $0x18] sm:$0xff] }
 0xb6d   :  { %v1613_v39 = vsel %vm981_vm12, %v1612_v37, %v1595_v35  ;;  %v5671_v35 = vpack.c.bf16 %v1943_v25, %v1942_v24  ;;  %v5675_v37 = vpack.c.bf16 %v1945_v36, %v1944_v33  ;;  %v1851_v24 = vld [vmem:[%s7562_s13 + $0x30] sm:$0xff]  ;;  %v1852_v25 = vld [vmem:[%s7562_s13 + $0x38] sm:$0xff] }
 0xb6e   :  { %v5667_v33 = vpack.c.bf16 %v1852_v25, %v1851_v24  ;;  %v1935_v36 = vld [vmem:[#allocation14 + $0x8] sm:$0xff] }
 0xb6f   :  { %v1601_v38 = vpop.permute.xlu1 %1600  ;;  %v1598_v40 = vpop.permute.xlu0 %1597  ;;  %5672 = vmatprep.subr.bf16.mxu1 %v5671_v35 }
 0xb70   :  { %v1615_v41 = vsel %vm1614_vm5, %v1613_v39, %v1598_v40  ;;  %v1947_v39 = vld [vmem:[#allocation16 + $0x28] sm:$0xff]  ;;  %5674 = vmatpush3.bf16.msra.mxu1 %v5671_v35  ;;  %v1934_v35 = vld [vmem:[#allocation14] sm:$0xff] }
 0xb71   :  { %v1616_v42 = vsel %vm217_vm1, %v1615_v41, %v1601_v38  ;;  %v1946_v38 = vld [vmem:[#allocation16 + $0x20] sm:$0xff]  ;;  %5676 = vmatprep.subr.bf16.mxu1 %v5675_v37  ;;  %v1948_v41 = vld [vmem:[#allocation16 + $0x30] sm:$0xff] }
 0xb72   :  { %v5679_v40 = vpack.c.bf16 %v1947_v39, %v1946_v38  ;;  %v1936_v38 = vld [vmem:[#allocation14 + $0x10] sm:$0xff]  ;;  %v1937_v39 = vld [vmem:[#allocation14 + $0x18] sm:$0xff] }
 0xb73   :  { %v1604_v43 = vpop.permute.xlu0 %1603  ;;  %v1607_v44 = vpop.permute.xlu1 %1606 }
 0xb74   :  { %v1618_v45 = vsel %vm1617_vm7, %v1616_v42, %v1604_v43  ;;  %v1949_v42 = vld [vmem:[#allocation16 + $0x38] sm:$0xff]  ;;  %5678 = vmatpush3.bf16.msra.mxu1 %v5675_v37  ;;  %v5687_v37 = vpack.c.bf16 %v1935_v36, %v1934_v35 }
 0xb75   :  { %v1619_v46 = vsel %vm984_vm13, %v1618_v45, %v1607_v44  ;;  %5680 = vmatprep.subr.bf16.mxu1 %v5679_v40  ;;  %v5683_v43 = vpack.c.bf16 %v1949_v42, %v1948_v41  ;;  %v5691_v42 = vpack.c.bf16 %v1937_v39, %v1936_v38 }
 0xb77   :  { %v1610_v47 = vpop.permute.xlu0 %1609 }
 0xb78   :  { %v1621_v48 = vsel %vm1620_vm8, %v1619_v46, %v1610_v47  ;;  %5682 = vmatpush3.bf16.msra.mxu1 %v5679_v40 }
 0xb79   :  { %v1625_v49 = vrot.slane %v1621_v48, %v6730_v31  ;;  %5684 = vmatprep.subr.bf16.mxu1 %v5683_v43 }
 0xb7b   :  { %v6894_v50 = vsub.f32 %v6867_v3, %v1625_v49  ;;  %v6897_v51 = vsub.f32 %v6863_v63, %v1625_v49 }
 0xb7c   :  { %5686 = vmatpush3.bf16.msra.mxu1 %v5683_v43  ;;  %v1938_v43 = vld [vmem:[#allocation14 + $0x20] sm:$0xff] }
 0xb7d   :  { %v1628_v52 = vmul.f32 %v6894_v50, %v6894_v50  ;;  %v1629_v53 = vmul.f32 %v6897_v51, %v6897_v51  ;;  %5688 = vmatprep.subr.bf16.mxu1 %v5687_v37 }
 0xb7f   :  { %v1630_v54 = vsel %vm565_vm10, %v1628_v52, 0.0  ;;  %v1631_v55 = vsel %vm565_vm10, %v1629_v53, 0.0 }
 0xb80   :  { %v1632_v56 = vadd.f32 %v1631_v55, %v1630_v54 }
 0xb82   :  { %v1633_v57 = vrot.slane %v1632_v56, 4 }
 0xb84   :  { %v1634_v59 = vadd.f32 %v1633_v57, %v1632_v56 }
 0xb86   :  { %v1635_v61 = vrot.slane %v1634_v59, 2 }
 0xb88   :  { %v1636_v2 = vadd.f32 %v1635_v61, %v1634_v59 }
 0xb8a   :  { %v1637_v3 = vrot.slane %v1636_v2, 1 }
 0xb8c   :  { %v1638_v4 = vadd.f32 %v1637_v3, %v1636_v2  ;;  %v1735_v2 = vand.u32 7, %v6845_v58 }
 0xb8e   :  { %1644 = vrot.lane.b32.xlu0 %v1638_v4, %s6292_s24  ;;  %1640 = vrot.lane.b32.xlu1 %v1638_v4, %s6297_s9 }
 0xb92   :  { %1652 = vrot.lane.b32.xlu0 %v1638_v4, %s6291_s0  ;;  %1648 = vrot.lane.b32.xlu1 %v1638_v4, %s6298_s25 }
 0xb96   :  { %1660 = vrot.lane.b32.xlu0 %v1638_v4, %s6293_s29  ;;  %1656 = vrot.lane.b32.xlu1 %v1638_v4, %s6299_s17 }
 0xb9a   :  { %1664 = vrot.lane.b32.xlu1 %v1638_v4, %s6300_s4 }
 0xc00   :  { %v1645_v63 = vpop.permute.xlu0 %1644  ;;  %v1641_v5 = vpop.permute.xlu1 %1640 }
 0xc01   :  { %v1643_v6 = vadd.f32 %v1641_v5, %v1638_v4  ;;  %v4647_v4 = vld [vmem:[#allocation11] ss:$0 sm:$0xff] }
 0xc03   :  { %v1647_v7 = vadd.f32 %v1645_v63, %v1643_v6  ;;  %v4648_v6 = vld [vmem:[#allocation13] ss:$0 sm:$0xff] }
 0xc04   :  { %v1653_v8 = vpop.permute.xlu0 %1652  ;;  %v1649_v9 = vpop.permute.xlu1 %1648 }
 0xc05   :  { %v1651_v10 = vadd.f32 %v1649_v9, %v1647_v7  ;;  %v6937_v7 = vadd.s32 1, %v6845_v58 }
 0xc07   :  { %v1655_v11 = vadd.f32 %v1653_v8, %v1651_v10  ;;  %v1751_v8 = vadd.s32 1, %v1735_v2  ;;  %vm7584_vm14 = vcmp.eq.s32.totalorder %v6601_v26, %v6937_v7 }
 0xc08   :  { %v1657_v12 = vpop.permute.xlu1 %1656  ;;  %v1661_v14 = vpop.permute.xlu0 %1660 }
 0xc09   :  { %v1659_v13 = vadd.f32 %v1657_v12, %v1655_v11  ;;  %vm1757_vm15 = vcmp.le.s32.totalorder %v1751_v8, 7 }
 0xc0a   :  { %vm1759_vm3 = vmand %vm7584_vm14, %vm1757_vm15 }
 0xc0b   :  { %v1663_v15 = vadd.f32 %v1661_v14, %v1659_v13  ;;  %v1845_v13 = vld [vmem:[%s7562_s13] sm:$0xff] }
 0xc0c   :  { %v1665_v16 = vpop.permute.xlu1 %1664 }
 0xc0d   :  { %v1667_v17 = vadd.f32 %v1665_v16, %v1663_v15 }
 0xc0f   :  { %v1668_v18 = vmul.f32 0.0078125, %v1667_v17  ;;  %v1847_v17 = vld [vmem:[%s7562_s13 + $0x10] sm:$0xff] }
 0xc11   :  { %v1669_v19 = vadd.f32 1e-05, %v1668_v18  ;;  %v1848_v18 = vld [vmem:[%s7562_s13 + $0x18] sm:$0xff] }
 0xc13   :  { %5976 = vrsqrt.f32 %v1669_v19  ;;  %v4650_v19 = vsel %vm1759_vm3, 1.0, %v6289_v1  ;;  %vm2438_vm3 = vcmask 588800  }
 0xc1d   :  { %v5977_v20 = vpop.eup %5976 }
 0xc1e   :  { %1675 = vrot.lane.b32.xlu1 %v5977_v20, %s6295_s12  ;;  %1672 = vrot.lane.b32.xlu0 %v5977_v20, %s6276_s26 }
 0xc22   :  { %1681 = vrot.lane.b32.xlu1 %v5977_v20, %s6294_s5  ;;  %1678 = vrot.lane.b32.xlu0 %v5977_v20, %s6301_s1 }
 0xc26   :  { %1687 = vrot.lane.b32.xlu1 %v5977_v20, %s6296_s16  ;;  %1684 = vrot.lane.b32.xlu0 %v5977_v20, %s6302_s11 }
 0xc2a   :  { %1690 = vrot.lane.b32.xlu0 %v5977_v20, %s6303_s10 }
 0xc90   :  { %v1676_v44 = vpop.permute.xlu1 %1675  ;;  %v1673_v45 = vpop.permute.xlu0 %1672 }
 0xc91   :  { %v1693_v46 = vsel %vm1067_vm2, %v5977_v20, %v1673_v45  ;;  %v5659_v20 = vpack.c.bf16 %v1848_v18, %v1847_v17  ;;  %v1940_v45 = vld [vmem:[#allocation14 + $0x30] sm:$0xff] }
 0xc92   :  { %v1694_v48 = vsel %vm981_vm12, %v1693_v46, %v1676_v44  ;;  %v1939_v44 = vld [vmem:[#allocation14 + $0x28] sm:$0xff]  ;;  %v1941_v46 = vld [vmem:[#allocation14 + $0x38] sm:$0xff] }
 0xc94   :  { %v1682_v47 = vpop.permute.xlu1 %1681  ;;  %v1679_v49 = vpop.permute.xlu0 %1678 }
 0xc95   :  { %v1695_v52 = vsel %vm1614_vm5, %v1694_v48, %v1679_v49 }
 0xc96   :  { %v1696_v53 = vsel %vm217_vm1, %v1695_v52, %v1682_v47  ;;  %v5699_v47 = vpack.c.bf16 %v1941_v46, %v1940_v45 }
 0xc98   :  { %v1685_v54 = vpop.permute.xlu0 %1684  ;;  %v1688_v55 = vpop.permute.xlu1 %1687 }
 0xc99   :  { %v1697_v56 = vsel %vm1617_vm7, %v1696_v53, %v1685_v54  ;;  %v6979_v53 = vadd.s32 16, %v6606_v28 }
 0xc9a   :  { %v1698_v57 = vsel %vm984_vm13, %v1697_v56, %v1688_v55 }
 0xc9b   :  { %vm2114_vm4 = vcmp.eq.s32.totalorder %v6979_v53, %v6609_v29  ;;  %vm2108_vm11 = vcmp.eq.s32.totalorder %v6979_v53, %v6604_v27 }
 0xc9c   :  { %v1691_v59 = vpop.permute.xlu0 %1690  ;;  %v4659_v2 = vsel %vm2108_vm11, 1.0, %v6289_v1  ;;  %vm2444_vm11 = vcmask 785408  }
 0xc9d   :  { %v1699_v61 = vsel %vm1620_vm8, %v1698_v57, %v1691_v59  ;;  %v6982_v57 = vadd.s32 24, %v6606_v28  ;;  %v4661_v59 = vsel %vm2114_vm4, 1.0, %v6289_v1  ;;  %vm2440_vm4 = vcmask 654336  }
 0xc9e   :  { %v1703_v3 = vrot.slane %v1699_v61, %v6730_v31 }
 0xc9f   :  { %vm2115_vm9 = vcmp.eq.s32.totalorder %v6982_v57, %v6609_v29  ;;  %vm2109_vm15 = vcmp.eq.s32.totalorder %v6982_v57, %v6604_v27 }
 0xca0   :  { %v1704_v63 = vmul.f32 %v1703_v3, %v6894_v50  ;;  %v1705_v5 = vmul.f32 %v1703_v3, %v6897_v51  ;;  %v1846_v50 = vld [vmem:[%s7562_s13 + $0x8] sm:$0xff]  ;;  %v4662_v61 = vsel %vm2115_vm9, 1.0, %v6289_v1  ;;  %v4660_v29 = vsel %vm2109_vm15, 1.0, %v6289_v1 }
 0xca1   :  { %v5655_v16 = vpack.c.bf16 %v1846_v50, %v1845_v13  ;;  %vm2442_vm9 = vcmask 719872   ;;  %vm2446_vm15 = vcmask 850944  }
 0xca2   :  { %v1712_v9 = vmul.f32 %v4647_v4, %v1704_v63  ;;  %v1713_v10 = vmul.f32 %v4647_v4, %v1705_v5 }
 0xca4   :  { %v1720_v11 = vadd.f32 %v4648_v6, %v1712_v9  ;;  %v1721_v12 = vadd.f32 %v4648_v6, %v1713_v10 }
 0xca6   :  { %v1722_v51 = vmax.f32 %v1720_v11, 0.0  ;;  %v1723_v14 = vmax.f32 %v1721_v12, 0.0 }
 0xca8   :  { %v5651_v15 = vpack.c.bf16 %v1723_v14, %v1722_v51 }
 0xcaa   :  { %5652 = vmatprep.subr.bf16.mxu0 %v5651_v15 }
 0xcab   :  { %5654 = vmatpush3.bf16.msra.mxu0 %v5651_v15 }
 0xcac   :  { %5656 = vmatprep.subr.bf16.mxu0 %v5655_v16 }
 0xcae   :  { %5176 = vmatmul.mubr.msk.f32.vlgmr.msra.gmra.mrb[12].mxu0 %vm981_vm12, %v4650_v19 }
 0xcaf   :  { %5658 = vmatpush3.bf16.msra.mxu0 %v5655_v16  ;;  %5194 = vmatprep.mubr.msk.f32.mxu0 %vm565_vm10, %v1722_v51 }
 0xcb0   :  { %5660 = vmatprep.subr.bf16.mxu0 %v5659_v20 }
 0xcb3   :  { %5662 = vmatpush3.bf16.msra.mxu0 %v5659_v20 }
 0xcb4   :  { %5664 = vmatprep.subr.bf16.mxu0 %v5663_v23 }
 0xcb7   :  { %5666 = vmatpush3.bf16.msra.mxu0 %v5663_v23 }
 0xcb8   :  { %5668 = vmatprep.subr.bf16.mxu0 %v5667_v33 }
 0xcbb   :  { %5670 = vmatpush3.bf16.msra.mxu0 %v5667_v33 }
 0xcbe   :  { %5195 = vmatmul.mubr.msk.f32.vlgmr.msra.gmra.mrb[14].mxu0 %vm565_vm10, %v1723_v14 }
 0xcbf   :  { %5239 = vmatprep.mubr.msk.f32.mxu0 %vm981_vm12, %v6614_v30  ;;  %v5695_v30 = vpack.c.bf16 %v1939_v44, %v1938_v43 }
 0xd81   :  { %v5177_v40 = vpop.f32.mrb[12].mxu0 }
 0xd82   :  { %v1836_v41 = vpop.f32.mrb[13].mxu0 }
 0xd83   :  { %5213 = vmatprep.mubr.msk.f32.mxu1 %vm565_vm10, %v1836_v41 }
 0xd84   :  { %5214 = vmatmul.mubr.msk.f32.vlgmr.msra.gmra.mrb[8].mxu1 %vm565_vm10, %v5177_v40 }
 0xd85   :  { %5690 = vmatpush3.bf16.msra.mxu1 %v5687_v37  ;;  %5232 = vmatprep.mubr.msk.f32.mxu1 %vm565_vm10, %v1722_v51 }
 0xd86   :  { %5692 = vmatprep.subr.bf16.mxu1 %v5691_v42 }
 0xd89   :  { %5694 = vmatpush3.bf16.msra.mxu1 %v5691_v42 }
 0xd8a   :  { %5696 = vmatprep.subr.bf16.mxu1 %v5695_v30 }
 0xd8d   :  { %5698 = vmatpush3.bf16.msra.mxu1 %v5695_v30 }
 0xd8e   :  { %5700 = vmatprep.subr.bf16.mxu1 %v5699_v47 }
 0xd91   :  { %5702 = vmatpush3.bf16.msra.mxu1 %v5699_v47  ;;  %v5196_v48 = vpop.f32.mrb[14].mxu0 }
 0xd92   :  { %v1925_v49 = vpop.f32.mrb[15].mxu0 }
 0xd93   :  { %v5707_v52 = vpack.c.bf16 %v5196_v48, %v1925_v49 }
 0xd94   :  { %5233 = vmatmul.mubr.msk.f32.vlgmr.msra.gmra.mrb[8].mxu1 %vm565_vm10, %v1723_v14 }
 0xe67   :  { %v5234_v54 = vpop.f32.mrb[8].mxu1 }
 0xe68   :  { %v2097_v55 = vpop.f32.mrb[9].mxu1 }
 0xe69   :  { %v5703_v56 = vpack.c.bf16 %v5234_v54, %v2097_v55 }
 0xe6b   :  { %5704 = vmatprep.subr.bf16.mxu0 %v5703_v56 }
 0xe6c   :  { %5706 = vmatpush3.bf16.msra.mxu0 %v5703_v56 }
 0xe6d   :  { %5708 = vmatprep.subr.bf16.mxu0 %v5707_v52 }
 0xe6f   :  { %5240 = vmatmul.mubr.msk.f32.vlgmr.msra.gmra.mrb[16].mxu0 %vm981_vm12, %v6850_v60 }
 0xe70   :  { %5710 = vmatpush3.bf16.msra.mxu0 %v5707_v52  ;;  %5242 = vmatprep.mubr.msk.f32.mxu0 %vm981_vm12, %v4661_v59 }
 0xe73   :  { %5243 = vmatmul.mubr.msk.f32.gmra.mrb[18].mxu0 %vm981_vm12, %v4662_v61 }
 0xe74   :  { %5249 = vmatprep.mubr.msk.f32.mxu0 %vm981_vm12, %v6624_v32 }
 0xe77   :  { %5250 = vmatmul.mubr.msk.f32.vlgmr.msra.gmra.mrb[16].mxu0 %vm981_vm12, %v6859_v62 }
 0xe78   :  { %5252 = vmatprep.mubr.msk.f32.mxu0 %vm981_vm12, %v4659_v2 }
 0xe7b   :  { %5253 = vmatmul.mubr.msk.f32.gmra.mrb[18].mxu0 %vm981_vm12, %v4660_v29 }
 0xf4a   :  { %v7006_v60 = vpop.f32.mrb[16].mxu0 }
 0xf4b   :  { %v7008_v3 = vpop.f32.mrb[17].mxu0 }
 0xf4c   :  { %v2312_v32 = vadd.f32 %v7006_v60, %v7008_v3 }
 0xf4e   :  { %v7012_v4 = vpop.f32.mrb[18].mxu0 }
 0xf4f   :  { %v7014_v63 = vpop.f32.mrb[19].mxu0 }
 0xf50   :  { %v2313_v27 = vadd.f32 %v2312_v32, %v7014_v63 }
 0xf52   :  { %v2314_v62 = vadd.f32 %v7012_v4, %v2313_v27 }
 0xf54   :  { %v2315_v5 = vrot.slane %v2314_v62, 4 }
 0xf56   :  { %v2316_v6 = vadd.f32 %v2315_v5, %v2314_v62 }
 0xf58   :  { %v2317_v8 = vrot.slane %v2316_v6, 2 }
 0xf5a   :  { %v2318_v9 = vadd.f32 %v2317_v8, %v2316_v6 }
 0xf5c   :  { %v2319_v10 = vrot.slane %v2318_v9, 1 }
 0xf5e   :  { %v2320_v11 = vadd.f32 %v2319_v10, %v2318_v9 }
 0xf60   :  { %2326 = vrot.lane.b32.xlu0 %v2320_v11, %s6292_s24  ;;  %2322 = vrot.lane.b32.xlu1 %v2320_v11, %s6297_s9 }
 0xf64   :  { %2334 = vrot.lane.b32.xlu0 %v2320_v11, %s6291_s0  ;;  %2330 = vrot.lane.b32.xlu1 %v2320_v11, %s6298_s25 }
 0xf68   :  { %2342 = vrot.lane.b32.xlu0 %v2320_v11, %s6293_s29  ;;  %2338 = vrot.lane.b32.xlu1 %v2320_v11, %s6299_s17 }
 0xf6c   :  { %2350 = vrot.lane.b32.xlu0 %v2320_v11, %s6290_s23  ;;  %2346 = vrot.lane.b32.xlu1 %v2320_v11, %s6300_s4 }
 0xf70   :  { %2358 = vrot.lane.b32.xlu0 %v2320_v11, %s6296_s16  ;;  %2354 = vrot.lane.b32.xlu1 %v2320_v11, %s6303_s10 }
 0xf74   :  { %2366 = vrot.lane.b32.xlu0 %v2320_v11, %s6294_s5  ;;  %2362 = vrot.lane.b32.xlu1 %v2320_v11, %s6302_s11 }
 0xf78   :  { %2374 = vrot.lane.b32.xlu0 %v2320_v11, %s6295_s12  ;;  %2370 = vrot.lane.b32.xlu1 %v2320_v11, %s6301_s1 }
 0xf7c   :  { %2378 = vrot.lane.b32.xlu1 %v2320_v11, %s6276_s26 }
 0xfd2   :  { %v2327_v12 = vpop.permute.xlu0 %2326  ;;  %v2323_v13 = vpop.permute.xlu1 %2322 }
 0xfd3   :  { %v2325_v50 = vadd.f32 %v2323_v13, %v2320_v11 }
 0xfd5   :  { %v2329_v51 = vadd.f32 %v2327_v12, %v2325_v50 }
 0xfd6   :  { %v2335_v14 = vpop.permute.xlu0 %2334  ;;  %v2331_v15 = vpop.permute.xlu1 %2330 }
 0xfd7   :  { %v2333_v16 = vadd.f32 %v2331_v15, %v2329_v51 }
 0xfd9   :  { %v2337_v17 = vadd.f32 %v2335_v14, %v2333_v16 }
 0xfda   :  { %v2343_v18 = vpop.permute.xlu0 %2342  ;;  %v2339_v19 = vpop.permute.xlu1 %2338 }
 0xfdb   :  { %v2341_v20 = vadd.f32 %v2339_v19, %v2337_v17 }
 0xfdd   :  { %v2345_v21 = vadd.f32 %v2343_v18, %v2341_v20 }
 0xfde   :  { %v2351_v22 = vpop.permute.xlu0 %2350  ;;  %v2347_v23 = vpop.permute.xlu1 %2346 }
 0xfdf   :  { %v2349_v24 = vadd.f32 %v2347_v23, %v2345_v21 }
 0xfe1   :  { %v2353_v25 = vadd.f32 %v2351_v22, %v2349_v24 }
 0xfe2   :  { %v2359_v33 = vpop.permute.xlu0 %2358  ;;  %v2355_v35 = vpop.permute.xlu1 %2354 }
 0xfe3   :  { %v2357_v36 = vadd.f32 %v2355_v35, %v2353_v25 }
 0xfe5   :  { %v2361_v37 = vadd.f32 %v2359_v33, %v2357_v36 }
 0xfe6   :  { %v2367_v38 = vpop.permute.xlu0 %2366  ;;  %v2363_v39 = vpop.permute.xlu1 %2362 }
 0xfe7   :  { %v2365_v40 = vadd.f32 %v2363_v39, %v2361_v37 }
 0xfe9   :  { %v2369_v41 = vadd.f32 %v2367_v38, %v2365_v40 }
 0xfea   :  { %v2371_v42 = vpop.permute.xlu1 %2370  ;;  %v2375_v44 = vpop.permute.xlu0 %2374 }
 0xfeb   :  { %v2373_v43 = vadd.f32 %v2371_v42, %v2369_v41 }
 0xfed   :  { %v2377_v30 = vadd.f32 %v2375_v44, %v2373_v43 }
 0xfee   :  { %v2379_v45 = vpop.permute.xlu1 %2378 }
 0xfef   :  { %v2381_v46 = vadd.f32 %v2379_v45, %v2377_v30 }
 0xff1   :  { %v2383_v47 = vmul.f32 0.001953125, %v2381_v46 }
 0xff3   :  { %2388 = vrot.lane.b32.xlu1 %v2383_v47, %s6295_s12  ;;  %2385 = vrot.lane.b32.xlu0 %v2383_v47, %s6276_s26 }
 0xff7   :  { %2394 = vrot.lane.b32.xlu1 %v2383_v47, %s6294_s5  ;;  %2391 = vrot.lane.b32.xlu0 %v2383_v47, %s6301_s1 }
 0xffb   :  { %2400 = vrot.lane.b32.xlu1 %v2383_v47, %s6296_s16  ;;  %2397 = vrot.lane.b32.xlu0 %v2383_v47, %s6302_s11 }
 0xfff   :  { %2406 = vrot.lane.b32.xlu1 %v2383_v47, %s6290_s23  ;;  %2403 = vrot.lane.b32.xlu0 %v2383_v47, %s6303_s10 }
0x1003   :  { %2412 = vrot.lane.b32.xlu1 %v2383_v47, %s6293_s29  ;;  %2409 = vrot.lane.b32.xlu0 %v2383_v47, %s6300_s4 }
0x1007   :  { %2418 = vrot.lane.b32.xlu1 %v2383_v47, %s6291_s0  ;;  %2415 = vrot.lane.b32.xlu0 %v2383_v47, %s6299_s17 }
0x100b   :  { %2424 = vrot.lane.b32.xlu1 %v2383_v47, %s6292_s24  ;;  %2421 = vrot.lane.b32.xlu0 %v2383_v47, %s6298_s25 }
0x100f   :  { %2427 = vrot.lane.b32.xlu0 %v2383_v47, %s6297_s9 }
0x1065   :  { %v2389_v48 = vpop.permute.xlu1 %2388  ;;  %v2386_v49 = vpop.permute.xlu0 %2385 }
0x1066   :  { %v2430_v52 = vsel %vm1067_vm2, %v2383_v47, %v2386_v49 }
0x1067   :  { %v2431_v55 = vsel %vm981_vm12, %v2430_v52, %v2389_v48 }
0x1069   :  { %v2395_v54 = vpop.permute.xlu1 %2394  ;;  %v2392_v56 = vpop.permute.xlu0 %2391 }
0x106a   :  { %v2432_v59 = vsel %vm1614_vm5, %v2431_v55, %v2392_v56 }
0x106b   :  { %v2433_v2 = vsel %vm217_vm1, %v2432_v59, %v2395_v54 }
0x106d   :  { %v2401_v61 = vpop.permute.xlu1 %2400  ;;  %v2398_v29 = vpop.permute.xlu0 %2397 }
0x106e   :  { %v2434_v32 = vsel %vm1617_vm7, %v2433_v2, %v2398_v29 }
0x106f   :  { %v2435_v62 = vsel %vm984_vm13, %v2434_v32, %v2401_v61 }
0x1071   :  { %v2407_v27 = vpop.permute.xlu1 %2406  ;;  %v2404_v5 = vpop.permute.xlu0 %2403 }
0x1072   :  { %v2436_v6 = vsel %vm1620_vm8, %v2435_v62, %v2404_v5 }
0x1073   :  { %v2437_v9 = vsel %vm565_vm10, %v2436_v6, %v2407_v27 }
0x1075   :  { %v2413_v8 = vpop.permute.xlu1 %2412  ;;  %v2410_v10 = vpop.permute.xlu0 %2409 }
0x1076   :  { %v2439_v11 = vsel %vm2438_vm3, %v2437_v9, %v2410_v10 }
0x1077   :  { %v2441_v13 = vsel %vm2440_vm4, %v2439_v11, %v2413_v8 }
0x1079   :  { %v2419_v12 = vpop.permute.xlu1 %2418  ;;  %v2416_v50 = vpop.permute.xlu0 %2415 }
0x107a   :  { %v2443_v51 = vsel %vm2442_vm9, %v2441_v13, %v2416_v50 }
0x107b   :  { %v2445_v14 = vsel %vm2444_vm11, %v2443_v51, %v2419_v12 }
0x107d   :  { %v2422_v15 = vpop.permute.xlu0 %2421  ;;  %v2425_v16 = vpop.permute.xlu1 %2424 }
0x107e   :  { %v2447_v17 = vsel %vm2446_vm15, %v2445_v14, %v2422_v15 }
0x107f   :  { %v2449_v18 = vsel %vm7586_vm0, %v2447_v17, %v2425_v16  ;;  %v2956_v17 = vld [vmem:[%s7568_s19] sm:$0xff] }
0x1081   :  { %v2428_v19 = vpop.permute.xlu0 %2427 }
0x1082   :  { %v2451_v20 = vsel %vm7585_vm6, %v2449_v18, %v2428_v19  ;;  %v2957_v18 = vld [vmem:[%s7568_s19 + $0x8] sm:$0xff] }
0x1083   :  { %v2455_v21 = vrot.slane %v2451_v20, %v6730_v31  ;;  %v5727_v19 = vpack.c.bf16 %v2957_v18, %v2956_v17  ;;  %v2958_v20 = vld [vmem:[%s7568_s19 + $0x10] sm:$0xff] }
0x1085   :  { %v7065_v22 = vsub.f32 %v7008_v3, %v2455_v21  ;;  %v7068_v23 = vsub.f32 %v7006_v60, %v2455_v21  ;;  %v7071_v24 = vsub.f32 %v7014_v63, %v2455_v21  ;;  %v7074_v25 = vsub.f32 %v7012_v4, %v2455_v21  ;;  %5728 = vmatprep.subr.bf16.mxu1 %v5727_v19  ;;  %v2959_v21 = vld [vmem:[%s7568_s19 + $0x18] sm:$0xff] }
0x1086   :  { %5730 = vmatpush3.bf16.msra.mxu1 %v5727_v19 }
0x1087   :  { %v2460_v33 = vmul.f32 %v7065_v22, %v7065_v22  ;;  %v2461_v35 = vmul.f32 %v7068_v23, %v7068_v23  ;;  %v2462_v36 = vmul.f32 %v7071_v24, %v7071_v24  ;;  %v2463_v60 = vmul.f32 %v7074_v25, %v7074_v25 }
0x1089   :  { %v2464_v3 = vadd.f32 %v2461_v35, %v2460_v33  ;;  %v5731_v33 = vpack.c.bf16 %v2959_v21, %v2958_v20 }
0x108b   :  { %v2465_v37 = vadd.f32 %v2464_v3, %v2462_v36  ;;  %5732 = vmatprep.subr.bf16.mxu1 %v5731_v33  ;;  %v2960_v36 = vld [vmem:[%s7568_s19 + $0x20] sm:$0xff]  ;;  %v2961_v3 = vld [vmem:[%s7568_s19 + $0x28] sm:$0xff] }
0x108c   :  { %5734 = vmatpush3.bf16.msra.mxu1 %v5731_v33 }
0x108d   :  { %v2466_v38 = vadd.f32 %v2465_v37, %v2463_v60  ;;  %v5735_v60 = vpack.c.bf16 %v2961_v3, %v2960_v36  ;;  %v2962_v37 = vld [vmem:[%s7568_s19 + $0x30] sm:$0xff] }
0x108f   :  { %v2467_v63 = vrot.slane %v2466_v38, 4  ;;  %5736 = vmatprep.subr.bf16.mxu1 %v5735_v60 }
0x1090   :  { %5738 = vmatpush3.bf16.msra.mxu1 %v5735_v60 }
0x1091   :  { %v2468_v39 = vadd.f32 %v2467_v63, %v2466_v38  ;;  %v2963_v38 = vld [vmem:[%s7568_s19 + $0x38] sm:$0xff] }
0x1092   :  { %v5739_v63 = vpack.c.bf16 %v2963_v38, %v2962_v37 }
0x1093   :  { %v2469_v40 = vrot.slane %v2468_v39, 2 }
0x1094   :  { %5740 = vmatprep.subr.bf16.mxu1 %v5739_v63 }
0x1095   :  { %v2470_v4 = vadd.f32 %v2469_v40, %v2468_v39  ;;  %v2964_v39 = vld [vmem:[%s7568_s19 + $0x40] sm:$0xff]  ;;  %v2965_v40 = vld [vmem:[%s7568_s19 + $0x48] sm:$0xff]  ;;  %5742 = vmatpush3.bf16.msra.mxu1 %v5739_v63 }
0x1097   :  { %v2471_v41 = vrot.slane %v2470_v4, 1 }
0x1099   :  { %v2472_v42 = vadd.f32 %v2471_v41, %v2470_v4  ;;  %v5743_v4 = vpack.c.bf16 %v2965_v40, %v2964_v39  ;;  %v2966_v41 = vld [vmem:[%s7568_s19 + $0x50] sm:$0xff]  ;;  %v4671_v39 = vld [vmem:[#allocation17] ss:$0 sm:$0xff] }
0x109b   :  { %2478 = vrot.lane.b32.xlu0 %v2472_v42, %s6292_s24  ;;  %2474 = vrot.lane.b32.xlu1 %v2472_v42, %s6297_s9 }
0x109c   :  { %5744 = vmatprep.subr.bf16.mxu1 %v5743_v4 }
0x109d   :  { %5746 = vmatpush3.bf16.msra.mxu1 %v5743_v4 }
0x109f   :  { %2486 = vrot.lane.b32.xlu0 %v2472_v42, %s6291_s0  ;;  %2482 = vrot.lane.b32.xlu1 %v2472_v42, %s6298_s25 }
0x10a3   :  { %2494 = vrot.lane.b32.xlu0 %v2472_v42, %s6293_s29  ;;  %2490 = vrot.lane.b32.xlu1 %v2472_v42, %s6299_s17 }
0x10a7   :  { %2502 = vrot.lane.b32.xlu0 %v2472_v42, %s6290_s23  ;;  %2498 = vrot.lane.b32.xlu1 %v2472_v42, %s6300_s4 }
0x10ab   :  { %2510 = vrot.lane.b32.xlu0 %v2472_v42, %s6296_s16  ;;  %2506 = vrot.lane.b32.xlu1 %v2472_v42, %s6303_s10 }
0x10af   :  { %2518 = vrot.lane.b32.xlu0 %v2472_v42, %s6294_s5  ;;  %2514 = vrot.lane.b32.xlu1 %v2472_v42, %s6302_s11 }
0x10b3   :  { %2526 = vrot.lane.b32.xlu0 %v2472_v42, %s6295_s12  ;;  %2522 = vrot.lane.b32.xlu1 %v2472_v42, %s6301_s1 }
0x10b7   :  { %2530 = vrot.lane.b32.xlu1 %v2472_v42, %s6276_s26 }
0x110d   :  { %v2479_v43 = vpop.permute.xlu0 %2478  ;;  %v2475_v44 = vpop.permute.xlu1 %2474 }
0x110e   :  { %v2477_v30 = vadd.f32 %v2475_v44, %v2472_v42  ;;  %v2967_v42 = vld [vmem:[%s7568_s19 + $0x58] sm:$0xff]  ;;  %v2968_v44 = vld [vmem:[%s7568_s19 + $0x60] sm:$0xff] }
0x1110   :  { %v2481_v45 = vadd.f32 %v2479_v43, %v2477_v30  ;;  %v5747_v43 = vpack.c.bf16 %v2967_v42, %v2966_v41  ;;  %v2969_v30 = vld [vmem:[%s7568_s19 + $0x68] sm:$0xff] }
0x1111   :  { %v2487_v46 = vpop.permute.xlu0 %2486  ;;  %v2483_v47 = vpop.permute.xlu1 %2482 }
0x1112   :  { %v2485_v48 = vadd.f32 %v2483_v47, %v2481_v45  ;;  %5748 = vmatprep.subr.bf16.mxu1 %v5747_v43  ;;  %v5751_v45 = vpack.c.bf16 %v2969_v30, %v2968_v44  ;;  %v2971_v47 = vld [vmem:[%s7568_s19 + $0x78] sm:$0xff]  ;;  %v2648_v44 = vand.u32 15, %v6979_v53 }
0x1113   :  { %5750 = vmatpush3.bf16.msra.mxu1 %v5747_v43  ;;  %v4672_v43 = vld [vmem:[#allocation19] ss:$0 sm:$0xff] }
0x1114   :  { %v2489_v49 = vadd.f32 %v2487_v46, %v2485_v48  ;;  %v2970_v46 = vld [vmem:[%s7568_s19 + $0x70] sm:$0xff]  ;;  %5752 = vmatprep.subr.bf16.mxu1 %v5751_v45 }
0x1115   :  { %v2495_v52 = vpop.permute.xlu0 %2494  ;;  %v2491_v54 = vpop.permute.xlu1 %2490  ;;  %v5755_v48 = vpack.c.bf16 %v2971_v47, %v2970_v46 }
0x1116   :  { %v2493_v55 = vadd.f32 %v2491_v54, %v2489_v49  ;;  %v2634_v49 = vand.u32 15, %v6606_v28 }
0x1117   :  { %5754 = vmatpush3.bf16.msra.mxu1 %v5751_v45 }
0x1118   :  { %v2497_v56 = vadd.f32 %v2495_v52, %v2493_v55  ;;  %5756 = vmatprep.subr.bf16.mxu1 %v5755_v48  ;;  %v2678_v52 = vadd.s32 4294967295, %v6606_v28  ;;  %v2686_v54 = vadd.s32 4294967295, %v2634_v49 }
0x1119   :  { %v2503_v59 = vpop.permute.xlu0 %2502  ;;  %v2499_v61 = vpop.permute.xlu1 %2498 }
0x111a   :  { %v2501_v2 = vadd.f32 %v2499_v61, %v2497_v56  ;;  %vm2682_vm14 = vcmp.eq.s32.totalorder %v6601_v26, %v2678_v52  ;;  %vm2690_vm6 = vcmp.ge.s32.totalorder %v2686_v54, 0  ;;  %v2940_v56 = vld [vmem:[%s7567_s18] sm:$0xff]  ;;  %v2680_v54 = vadd.s32 4294967295, %v6979_v53 }
0x111b   :  { %5758 = vmatpush3.bf16.msra.mxu1 %v5755_v48  ;;  %vm2694_vm0 = vmand %vm2682_vm14, %vm2690_vm6  ;;  %vm7605_vm6 = vcmask 982016  }
0x111c   :  { %v2505_v29 = vadd.f32 %v2503_v59, %v2501_v2  ;;  %v4673_v55 = vsel %vm2694_vm0, 1.0, %v6289_v1  ;;  %v2941_v59 = vld [vmem:[%s7567_s18 + $0x8] sm:$0xff]  ;;  %vm7604_vm0 = vcmask 916480  }
0x111d   :  { %v2511_v32 = vpop.permute.xlu0 %2510  ;;  %v2507_v27 = vpop.permute.xlu1 %2506  ;;  %5263 = vmatprep.mubr.msk.f32.mxu0 %vm217_vm1, %v4673_v55  ;;  %v7190_v61 = vpack.c.bf16 %v2941_v59, %v2940_v56 }
0x111e   :  { %v2509_v62 = vadd.f32 %v2507_v27, %v2505_v29 }
0x111f   :  { %5760 = vmatprep.subr.bf16.mxu1 %v7190_v61 }
0x1120   :  { %v2513_v5 = vadd.f32 %v2511_v32, %v2509_v62 }
0x1121   :  { %v2519_v6 = vpop.permute.xlu0 %2518  ;;  %v2515_v8 = vpop.permute.xlu1 %2514 }
0x1122   :  { %v2517_v9 = vadd.f32 %v2515_v8, %v2513_v5 }
0x1124   :  { %v2521_v10 = vadd.f32 %v2519_v6, %v2517_v9 }
0x1125   :  { %v2523_v11 = vpop.permute.xlu1 %2522  ;;  %v2527_v13 = vpop.permute.xlu0 %2526 }
0x1126   :  { %v2525_v12 = vadd.f32 %v2523_v11, %v2521_v10 }
0x1128   :  { %v2529_v50 = vadd.f32 %v2527_v13, %v2525_v12 }
0x1129   :  { %v2531_v51 = vpop.permute.xlu1 %2530 }
0x112a   :  { %v2533_v14 = vadd.f32 %v2531_v51, %v2529_v50 }
0x112c   :  { %v2534_v15 = vmul.f32 0.001953125, %v2533_v14 }
0x112e   :  { %v2535_v16 = vadd.f32 1e-05, %v2534_v15 }
0x1130   :  { %5978 = vrsqrt.f32 %v2535_v16 }
0x113a   :  { %v7111_v35 = vpop.eup %5978 }
0x113b   :  { %2541 = vrot.lane.b32.xlu1 %v7111_v35, %s6295_s12  ;;  %2538 = vrot.lane.b32.xlu0 %v7111_v35, %s6276_s26 }
0x113f   :  { %2547 = vrot.lane.b32.xlu1 %v7111_v35, %s6294_s5  ;;  %2544 = vrot.lane.b32.xlu0 %v7111_v35, %s6301_s1 }
0x1143   :  { %2553 = vrot.lane.b32.xlu1 %v7111_v35, %s6296_s16  ;;  %2550 = vrot.lane.b32.xlu0 %v7111_v35, %s6302_s11 }
0x1147   :  { %2559 = vrot.lane.b32.xlu1 %v7111_v35, %s6290_s23  ;;  %2556 = vrot.lane.b32.xlu0 %v7111_v35, %s6303_s10 }
0x114b   :  { %2565 = vrot.lane.b32.xlu1 %v7111_v35, %s6293_s29  ;;  %2562 = vrot.lane.b32.xlu0 %v7111_v35, %s6300_s4 }
0x114f   :  { %2571 = vrot.lane.b32.xlu1 %v7111_v35, %s6291_s0  ;;  %2568 = vrot.lane.b32.xlu0 %v7111_v35, %s6299_s17 }
0x1153   :  { %2577 = vrot.lane.b32.xlu1 %v7111_v35, %s6292_s24  ;;  %2574 = vrot.lane.b32.xlu0 %v7111_v35, %s6298_s25 }
0x1157   :  { %2580 = vrot.lane.b32.xlu0 %v7111_v35, %s6297_s9 }
0x11ad   :  { %v2542_v2 = vpop.permute.xlu1 %2541  ;;  %v2539_v29 = vpop.permute.xlu0 %2538 }
0x11ae   :  { %v2583_v32 = vsel %vm1067_vm2, %v7111_v35, %v2539_v29  ;;  %vm2684_vm2 = vcmp.eq.s32.totalorder %v6601_v26, %v2680_v54 }
0x11af   :  { %v2584_v62 = vsel %vm981_vm12, %v2583_v32, %v2542_v2  ;;  %v2641_v2 = vand.u32 15, %v6845_v58  ;;  %v2679_v32 = vadd.s32 4294967295, %v6845_v58 }
0x11b1   :  { %v2548_v27 = vpop.permute.xlu1 %2547  ;;  %v2545_v5 = vpop.permute.xlu0 %2544  ;;  %v2816_v58 = vadd.s32 1, %v2641_v2  ;;  %v3153_v2 = vld [vmem:[%s7609_s3 + $0x58] sm:$0xff] }
0x11b2   :  { %v2585_v6 = vsel %vm1614_vm5, %v2584_v62, %v2545_v5  ;;  %v2944_v62 = vld [vmem:[%s7567_s18 + $0x20] sm:$0xff]  ;;  %v2945_v5 = vld [vmem:[%s7567_s18 + $0x28] sm:$0xff] }
0x11b3   :  { %v2586_v9 = vsel %vm217_vm1, %v2585_v6, %v2548_v27  ;;  %vm2828_vm14 = vcmp.le.s32.totalorder %v2816_v58, 15 }
0x11b5   :  { %v2554_v8 = vpop.permute.xlu1 %2553  ;;  %v2551_v10 = vpop.permute.xlu0 %2550 }
0x11b6   :  { %v2587_v11 = vsel %vm1617_vm7, %v2586_v9, %v2551_v10  ;;  %vm2683_vm7 = vcmp.eq.s32.totalorder %v6601_v26, %v2679_v32  ;;  %v5767_v9 = vpack.c.bf16 %v2945_v5, %v2944_v62  ;;  %v2655_v10 = vand.u32 15, %v6982_v57  ;;  %v3154_v32 = vld [vmem:[%s7609_s3 + $0x60] sm:$0xff]  ;;  %v3156_v5 = vld [vmem:[%s7609_s3 + $0x70] sm:$0xff] }
0x11b7   :  { %v2588_v13 = vsel %vm984_vm13, %v2587_v11, %v2554_v8  ;;  %v2681_v8 = vadd.s32 4294967295, %v6982_v57  ;;  %v2946_v11 = vld [vmem:[%s7567_s18 + $0x30] sm:$0xff] }
0x11b9   :  { %v2560_v12 = vpop.permute.xlu1 %2559  ;;  %v2557_v50 = vpop.permute.xlu0 %2556 }
0x11ba   :  { %v2589_v51 = vsel %vm1620_vm8, %v2588_v13, %v2557_v50  ;;  %v2811_v50 = vadd.s32 1, %v6979_v53 }
0x11bb   :  { %v2590_v15 = vsel %vm565_vm10, %v2589_v51, %v2560_v12  ;;  %v4674_v12 = vsel %vm2683_vm7, 1.0, %v6289_v1  ;;  %v2812_v51 = vadd.s32 1, %v6982_v57 }
0x11bd   :  { %v2566_v14 = vpop.permute.xlu1 %2565  ;;  %v2563_v16 = vpop.permute.xlu0 %2562 }
0x11be   :  { %v2591_v17 = vsel %vm2438_vm3, %v2590_v15, %v2563_v16  ;;  %vm2685_vm3 = vcmp.eq.s32.totalorder %v6601_v26, %v2681_v8  ;;  %v2948_v16 = vld [vmem:[%s7567_s18 + $0x40] sm:$0xff] }
0x11bf   :  { %v2592_v19 = vsel %vm2440_vm4, %v2591_v17, %v2566_v14  ;;  %v2818_v14 = vadd.s32 1, %v2655_v10  ;;  %v2949_v17 = vld [vmem:[%s7567_s18 + $0x48] sm:$0xff]  ;;  %v4689_v8 = vld [vmem:[%s7610_s14] ss:$0 sm:$0xff] }
0x11c0   :  { %v5775_v57 = vpack.c.bf16 %v2949_v17, %v2948_v16 }
0x11c1   :  { %v2572_v18 = vpop.permute.xlu1 %2571  ;;  %v2569_v20 = vpop.permute.xlu0 %2568 }
0x11c2   :  { %v2593_v21 = vsel %vm2442_vm9, %v2592_v19, %v2569_v20  ;;  %vm7606_vm9 = vcmp.eq.s32.totalorder %v6601_v26, %v6937_v7  ;;  %v2950_v7 = vld [vmem:[%s7567_s18 + $0x50] sm:$0xff]  ;;  %v2951_v19 = vld [vmem:[%s7567_s18 + $0x58] sm:$0xff] }
0x11c3   :  { %v2594_v33 = vsel %vm2444_vm11, %v2593_v21, %v2572_v18  ;;  %v4676_v18 = vsel %vm2685_vm3, 1.0, %v6289_v1  ;;  %v5779_v21 = vpack.c.bf16 %v2951_v19, %v2950_v7 }
0x11c5   :  { %v2575_v35 = vpop.permute.xlu0 %2574  ;;  %v2578_v36 = vpop.permute.xlu1 %2577 }
0x11c6   :  { %v2595_v3 = vsel %vm2446_vm15, %v2594_v33, %v2575_v35  ;;  %vm2832_vm15 = vmand %vm7606_vm9, %vm2828_vm14  ;;  %v2952_v33 = vld [vmem:[%s7567_s18 + $0x60] sm:$0xff]  ;;  %v2953_v35 = vld [vmem:[%s7567_s18 + $0x68] sm:$0xff] }
0x11c7   :  { %v2596_v60 = vsel %vm7604_vm0, %v2595_v3, %v2578_v36  ;;  %vm7607_vm0 = vcmp.eq.s32.totalorder %v6601_v26, %v6631_v34  ;;  %v4682_v34 = vsel %vm2832_vm15, 1.0, %v6289_v1  ;;  %v5783_v3 = vpack.c.bf16 %v2953_v35, %v2952_v33 }
0x11c8   :  { %v4681_v53 = vsel %vm7607_vm0, 1.0, %v6289_v1  ;;  %v7349_v33 = vmul.u32 16, %v6606_v28 }
0x11c9   :  { %v2581_v37 = vpop.permute.xlu0 %2580 }
0x11ca   :  { %v2597_v38 = vsel %vm7605_vm6, %v2596_v60, %v2581_v37  ;;  %vm2813_vm6 = vcmp.eq.s32.totalorder %v6601_v26, %v2811_v50  ;;  %v2954_v60 = vld [vmem:[%s7567_s18 + $0x70] sm:$0xff]  ;;  %v2955_v37 = vld [vmem:[%s7567_s18 + $0x78] sm:$0xff]  ;;  %vm3283_vm14 = vcmp.eq.s32.totalorder %v6601_v26, %v7349_v33 }
0x11cb   :  { %v2601_v63 = vrot.slane %v2597_v38, %v6730_v31  ;;  %v4683_v20 = vsel %vm2813_vm6, 1.0, %v6289_v1  ;;  %v5787_v38 = vpack.c.bf16 %v2955_v37, %v2954_v60 }
0x11cd   :  { %v2603_v40 = vmul.f32 %v2601_v63, %v7068_v23  ;;  %v2605_v4 = vmul.f32 %v2601_v63, %v7074_v25  ;;  %v2602_v41 = vmul.f32 %v2601_v63, %v7065_v22  ;;  %v2604_v42 = vmul.f32 %v2601_v63, %v7071_v24  ;;  %v2942_v22 = vld [vmem:[%s7567_s18 + $0x10] sm:$0xff]  ;;  %v2943_v24 = vld [vmem:[%s7567_s18 + $0x18] sm:$0xff]  ;;  %v3142_v63 = vld [vmem:[%s7609_s3] sm:$0xff] }
0x11ce   :  { %v2688_v23 = vadd.s32 4294967295, %v2648_v44  ;;  %v5763_v27 = vpack.c.bf16 %v2943_v24, %v2942_v22  ;;  %v3150_v22 = vld [vmem:[%s7609_s3 + $0x40] sm:$0xff]  ;;  %v3151_v24 = vld [vmem:[%s7609_s3 + $0x48] sm:$0xff] }
0x11cf   :  { %v2612_v30 = vmul.f32 %v4671_v39, %v2602_v41  ;;  %v2613_v45 = vmul.f32 %v4671_v39, %v2603_v40  ;;  %v2614_v46 = vmul.f32 %v4671_v39, %v2604_v42  ;;  %v2615_v47 = vmul.f32 %v4671_v39, %v2605_v4  ;;  %v3143_v39 = vld [vmem:[%s7609_s3 + $0x8] sm:$0xff]  ;;  %v3144_v4 = vld [vmem:[%s7609_s3 + $0x10] sm:$0xff]  ;;  %v3145_v41 = vld [vmem:[%s7609_s3 + $0x18] sm:$0xff] }
0x11d0   :  { %vm2692_vm5 = vcmp.ge.s32.totalorder %v2688_v23, 0  ;;  %v5791_v40 = vpack.c.bf16 %v3143_v39, %v3142_v63  ;;  %v5795_v44 = vpack.c.bf16 %v3145_v41, %v3144_v4  ;;  %v4694_v63 = vsel %vm3283_vm14, 1.0, %v6289_v1 }
0x11d1   :  { %v2622_v48 = vadd.f32 %v4672_v43, %v2612_v30  ;;  %v2623_v49 = vadd.f32 %v4672_v43, %v2613_v45  ;;  %v2624_v52 = vadd.f32 %v4672_v43, %v2614_v46  ;;  %v2625_v31 = vadd.f32 %v4672_v43, %v2615_v47  ;;  %vm2696_vm8 = vmand %vm2684_vm2, %vm2692_vm5  ;;  %v3146_v30 = vld [vmem:[%s7609_s3 + $0x20] sm:$0xff]  ;;  %v3147_v45 = vld [vmem:[%s7609_s3 + $0x28] sm:$0xff] }
0x11d2   :  { %v4675_v13 = vsel %vm2696_vm8, 1.0, %v6289_v1  ;;  %vm2814_vm2 = vcmp.eq.s32.totalorder %v6601_v26, %v2812_v51  ;;  %vm2830_vm5 = vcmp.le.s32.totalorder %v2818_v14, 15  ;;  %vm7608_vm8 = vmmov 0  }
0x11d3   :  { %v2626_v25 = vmax.f32 %v2622_v48, 0.0  ;;  %v2627_v55 = vmax.f32 %v2623_v49, 0.0  ;;  %v2628_v56 = vmax.f32 %v2624_v52, 0.0  ;;  %v2629_v59 = vmax.f32 %v2625_v31, 0.0  ;;  %vm2834_vm7 = vmand %vm2814_vm2, %vm2830_vm5  ;;  %v3148_v49 = vld [vmem:[%s7609_s3 + $0x30] sm:$0xff]  ;;  %v3149_v52 = vld [vmem:[%s7609_s3 + $0x38] sm:$0xff] }
0x11d4   :  { %v4684_v36 = vsel %vm2834_vm7, 1.0, %v6289_v1  ;;  %v5799_v47 = vpack.c.bf16 %v3147_v45, %v3146_v30  ;;  %v5803_v54 = vpack.c.bf16 %v3149_v52, %v3148_v49  ;;  %v4360_v4 = vadd.s32 14, %v7349_v33 }
0x11d5   :  { %v5711_v29 = vpack.c.bf16 %v2627_v55, %v2626_v25  ;;  %5315 = vmatprep.mubr.f32.mxu1 %v2626_v25  ;;  %v5715_v6 = vpack.c.bf16 %v2629_v59, %v2628_v56  ;;  %v3513_v30 = vadd.s32 3, %v7349_v33  ;;  %v3744_v52 = vadd.s32 6, %v7349_v33 }
0x11d6   :  { %5316 = vmatmul.mubr.f32.vlgmr.msra.gmra.mrb[10].mxu1 %v2627_v55  ;;  %v5807_v55 = vpack.c.bf16 %v3151_v24, %v3150_v22  ;;  %vm4361_vm15 = vcmp.eq.s32.totalorder %v6601_v26, %v4360_v4  ;;  %v3898_v22 = vadd.s32 8, %v7349_v33 }
0x11d7   :  { %5712 = vmatprep.subr.bf16.mxu0 %v5711_v29  ;;  %5318 = vmatprep.mubr.f32.mxu1 %v2628_v56  ;;  %vm3514_vm6 = vcmp.eq.s32.totalorder %v6601_v26, %v3513_v30  ;;  %vm3745_vm7 = vcmp.eq.s32.totalorder %v6601_v26, %v3744_v52 }
0x11d8   :  { %5714 = vmatpush3.bf16.msra.mxu0 %v5711_v29  ;;  %5762 = vmatpush3.bf16.msra.mxu1 %v7190_v61  ;;  %v2947_v61 = vld [vmem:[%s7567_s18 + $0x38] sm:$0xff]  ;;  %v4700_v45 = vsel %vm3514_vm6, 1.0, %v6289_v1 }
0x11d9   :  { %5716 = vmatprep.subr.bf16.mxu0 %v5715_v6  ;;  %5764 = vmatprep.subr.bf16.mxu1 %v5763_v27  ;;  %v5771_v15 = vpack.c.bf16 %v2947_v61, %v2946_v11 }
0x11da   :  { %5319 = vmatmul.mubr.f32.gmra.mrb[12].mxu1 %v2629_v59  ;;  %v3152_v59 = vld [vmem:[%s7609_s3 + $0x50] sm:$0xff] }
0x11dc   :  { %5718 = vmatpush3.bf16.msra.mxu0 %v5715_v6  ;;  %5766 = vmatpush3.bf16.msra.mxu1 %v5763_v27  ;;  %v3155_v27 = vld [vmem:[%s7609_s3 + $0x68] sm:$0xff] }
0x11dd   :  { %5720 = vmatprep.subr.bf16.mxu0 %v5711_v29  ;;  %5768 = vmatprep.subr.bf16.mxu1 %v5767_v9  ;;  %v5815_v62 = vpack.c.bf16 %v3155_v27, %v3154_v32  ;;  %v4283_v32 = vadd.s32 13, %v7349_v33 }
0x11df   :  { %5264 = vmatmul.mubr.msk.f32.vlgmr.msra.gmra.mrb[20].mxu0 %vm217_vm1, %v4674_v12  ;;  %vm4284_vm6 = vcmp.eq.s32.totalorder %v6601_v26, %v4283_v32 }
0x11e0   :  { %5722 = vmatpush3.bf16.msra.mxu0 %v5711_v29  ;;  %5266 = vmatprep.mubr.msk.f32.mxu0 %vm217_vm1, %v4675_v13  ;;  %v5811_v29 = vpack.c.bf16 %v3153_v2, %v3152_v59  ;;  %v4129_v2 = vadd.s32 11, %v7349_v33  ;;  %v4720_v27 = vsel %vm4284_vm6, 1.0, %v6289_v1 }
0x11e1   :  { %5724 = vmatprep.subr.bf16.mxu0 %v5715_v6  ;;  %5770 = vmatpush3.bf16.msra.mxu1 %v5767_v9 }
0x11e2   :  { %5772 = vmatprep.subr.bf16.mxu1 %v5771_v15 }
0x11e3   :  { %5267 = vmatmul.mubr.msk.f32.gmra.mrb[22].mxu0 %vm217_vm1, %v4676_v18 }
0x11e4   :  { %5726 = vmatpush3.bf16.msra.mxu0 %v5715_v6  ;;  %5277 = vmatprep.mubr.msk.f32.mxu0 %vm217_vm1, %v4681_v53  ;;  %v3157_v6 = vld [vmem:[%s7609_s3 + $0x78] sm:$0xff] }
0x11e5   :  { %5774 = vmatpush3.bf16.msra.mxu1 %v5771_v15  ;;  %5823 = vmatprep.subr.bf16.mxu0 %v6287_v0  ;;  %v5819_v58 = vpack.c.bf16 %v3157_v6, %v3156_v5 }
0x11e6   :  { %5776 = vmatprep.subr.bf16.mxu1 %v5775_v57 }
0x11e7   :  { %5278 = vmatmul.mubr.msk.f32.vlgmr.msra.gmra.mrb[24].mxu0 %vm217_vm1, %v4682_v34 }
0x11e8   :  { %5280 = vmatprep.mubr.msk.f32.mxu0 %vm217_vm1, %v4683_v20 }
0x11e9   :  { %5778 = vmatpush3.bf16.msra.mxu1 %v5775_v57 }
0x11ea   :  { %5780 = vmatprep.subr.bf16.mxu1 %v5779_v21 }
0x11eb   :  { %5281 = vmatmul.mubr.msk.f32.gmra.mrb[26].mxu0 %vm217_vm1, %v4684_v36 }
0x11ec   :  { %5405 = vmatprep.mubr.msk.f32.mxu0 %vm7608_vm8, %v6289_v1 }
0x11ed   :  { %5782 = vmatpush3.bf16.msra.mxu1 %v5779_v21 }
0x11ee   :  { %5784 = vmatprep.subr.bf16.mxu1 %v5783_v3 }
0x11f1   :  { %5786 = vmatpush3.bf16.msra.mxu1 %v5783_v3  ;;  %v4206_v3 = vadd.s32 12, %v7349_v33 }
0x11f2   :  { %5788 = vmatprep.subr.bf16.mxu1 %v5787_v38 }
0x11f3   :  { %vm4207_vm3 = vcmp.eq.s32.totalorder %v6601_v26, %v4206_v3 }
0x11f4   :  { %v4718_v39 = vsel %vm4207_vm3, 1.0, %v6289_v1  ;;  %vm3899_vm3 = vcmp.eq.s32.totalorder %v6601_v26, %v3898_v22 }
0x11f5   :  { %5790 = vmatpush3.bf16.msra.mxu1 %v5787_v38  ;;  %v4710_v24 = vsel %vm3899_vm3, 1.0, %v6289_v1 }
0x11f6   :  { %5792 = vmatprep.subr.bf16.mxu1 %v5791_v40 }
0x12b2   :  { %v5265_v42 = vpop.f32.mrb[20].mxu0 }
0x12b3   :  { %v2792_v43 = vpop.f32.mrb[21].mxu0 }
0x12b4   :  { %5353 = vmatprep.mubr.f32.mxu1 %v2792_v43  ;;  %v3436_v43 = vadd.s32 2, %v7349_v33 }
0x12b5   :  { %5354 = vmatmul.mubr.f32.vlgmr.msra.gmra.mrb[10].mxu1 %v5265_v42  ;;  %v4722_v42 = vsel %vm4361_vm15, 1.0, %v6289_v1 }
0x12b6   :  { %5794 = vmatpush3.bf16.msra.mxu1 %v5791_v40  ;;  %v5268_v46 = vpop.f32.mrb[22].mxu0  ;;  %v3359_v40 = vadd.s32 1, %v7349_v33  ;;  %vm3437_vm0 = vcmp.eq.s32.totalorder %v6601_v26, %v3436_v43 }
0x12b7   :  { %5796 = vmatprep.subr.bf16.mxu1 %v5795_v44  ;;  %v2802_v48 = vpop.f32.mrb[23].mxu0 }
0x12b8   :  { %5356 = vmatprep.mubr.f32.mxu1 %v2802_v48  ;;  %vm3360_vm9 = vcmp.eq.s32.totalorder %v6601_v26, %v3359_v40  ;;  %v3667_v48 = vadd.s32 5, %v7349_v33 }
0x12b9   :  { %5357 = vmatmul.mubr.f32.gmra.mrb[12].mxu1 %v5268_v46  ;;  %v4696_v41 = vsel %vm3360_vm9, 1.0, %v6289_v1  ;;  %v3590_v46 = vadd.s32 4, %v7349_v33 }
0x12ba   :  { %5798 = vmatpush3.bf16.msra.mxu1 %v5795_v44  ;;  %v5279_v31 = vpop.f32.mrb[24].mxu0  ;;  %v4698_v44 = vsel %vm3437_vm0, 1.0, %v6289_v1  ;;  %vm3668_vm5 = vcmp.eq.s32.totalorder %v6601_v26, %v3667_v48  ;;  %vm4130_vm0 = vcmp.eq.s32.totalorder %v6601_v26, %v4129_v2 }
0x12bb   :  { %5800 = vmatprep.subr.bf16.mxu1 %v5799_v47  ;;  %v2921_v23 = vpop.f32.mrb[25].mxu0  ;;  %vm3591_vm2 = vcmp.eq.s32.totalorder %v6601_v26, %v3590_v46  ;;  %v4704_v49 = vsel %vm3668_vm5, 1.0, %v6289_v1 }
0x12bc   :  { %5391 = vmatprep.mubr.f32.mxu1 %v2921_v23 }
0x12be   :  { %5802 = vmatpush3.bf16.msra.mxu1 %v5799_v47  ;;  %v5282_v25 = vpop.f32.mrb[26].mxu0  ;;  %v4702_v47 = vsel %vm3591_vm2, 1.0, %v6289_v1 }
0x12bf   :  { %5804 = vmatprep.subr.bf16.mxu1 %v5803_v54  ;;  %v2931_v56 = vpop.f32.mrb[27].mxu0 }
0x12c2   :  { %5806 = vmatpush3.bf16.msra.mxu1 %v5803_v54  ;;  %v3821_v54 = vadd.s32 7, %v7349_v33 }
0x12c3   :  { %5808 = vmatprep.subr.bf16.mxu1 %v5807_v55 }
0x12c4   :  { %vm3822_vm14 = vcmp.eq.s32.totalorder %v6601_v26, %v3821_v54 }
0x12c5   :  { %v4708_v23 = vsel %vm3822_vm14, 1.0, %v6289_v1 }
0x12c6   :  { %5810 = vmatpush3.bf16.msra.mxu1 %v5807_v55 }
0x12c7   :  { %5812 = vmatprep.subr.bf16.mxu1 %v5811_v29 }
0x12ca   :  { %5814 = vmatpush3.bf16.msra.mxu1 %v5811_v29  ;;  %v4716_v29 = vsel %vm4130_vm0, 1.0, %v6289_v1 }
0x12cb   :  { %5816 = vmatprep.subr.bf16.mxu1 %v5815_v62 }
0x12ce   :  { %5818 = vmatpush3.bf16.msra.mxu1 %v5815_v62  ;;  %v4437_v62 = vadd.s32 15, %v7349_v33 }
0x12cf   :  { %5820 = vmatprep.subr.bf16.mxu1 %v5819_v58 }
0x12d0   :  { %vm4438_vm2 = vcmp.eq.s32.totalorder %v6601_v26, %v4437_v62 }
0x12d1   :  { %v4724_v5 = vsel %vm4438_vm2, 1.0, %v6289_v1 }
0x12d2   :  { %5822 = vmatpush3.bf16.msra.mxu1 %v5819_v58 }
0x12d3   :  { %5895 = vmatprep.subr.bf16.mxu1 %v6287_v0 }
0x12d5   :  { %5392 = vmatmul.mubr.f32.vlgmr.msra.gmra.mrb[10].mxu1 %v5279_v31  ;;  %v4706_v31 = vsel %vm3745_vm7, 1.0, %v6289_v1 }
0x12d6   :  { %5394 = vmatprep.mubr.f32.mxu1 %v2931_v56  ;;  %v4052_v56 = vadd.s32 10, %v7349_v33 }
0x12d8   :  { %vm4053_vm15 = vcmp.eq.s32.totalorder %v6601_v26, %v4052_v56 }
0x12d9   :  { %5395 = vmatmul.mubr.f32.gmra.mrb[12].mxu1 %v5282_v25  ;;  %v3975_v25 = vadd.s32 9, %v7349_v33  ;;  %v4714_v59 = vsel %vm4053_vm15, 1.0, %v6289_v1 }
0x12da   :  { %5537 = vmatprep.mubr.msk.f32.mxu1 %vm7608_vm8, %v6289_v1 }
0x12db   :  { %vm3976_vm9 = vcmp.eq.s32.totalorder %v6601_v26, %v3975_v25 }
0x12dc   :  { %v4712_v55 = vsel %vm3976_vm9, 1.0, %v6289_v1 }
0x13a8   :  { %v5393_v9 = vpop.f32.mrb[10].mxu1 }
0x13a9   :  { %v3255_v10 = vadd.f32 %v5393_v9, %v4689_v8  ;;  %v3224_v11 = vpop.f32.mrb[11].mxu1 }
0x13aa   :  { %v3254_v61 = vadd.f32 %v4689_v8, %v3224_v11 }
0x13ab   :  { %v4691_v12 = vmul.f32 -1.442695, %v3255_v10 }
0x13ac   :  { %v4690_v13 = vmul.f32 -1.442695, %v3254_v61  ;;  %v5396_v50 = vpop.f32.mrb[12].mxu1 }
0x13ad   :  { %5980 = vpow2.f32 %v4691_v12  ;;  %v3257_v51 = vadd.f32 %v5396_v50, %v4689_v8  ;;  %v3234_v14 = vpop.f32.mrb[13].mxu1 }
0x13ae   :  { %5982 = vpow2.f32 %v4690_v13  ;;  %v3256_v15 = vadd.f32 %v4689_v8, %v3234_v14 }
0x13af   :  { %v4693_v16 = vmul.f32 -1.442695, %v3257_v51 }
0x13b0   :  { %v4692_v17 = vmul.f32 -1.442695, %v3256_v15 }
0x13b1   :  { %5984 = vpow2.f32 %v4693_v16 }
0x13b2   :  { %5986 = vpow2.f32 %v4692_v17 }
0x13b7   :  { %v5981_v18 = vpop.eup %5980 }
0x13b8   :  { %v5983_v53 = vpop.eup %5982  ;;  %v3271_v57 = vadd.f32 1.0, %v5981_v18 }
0x13b9   :  { %v3270_v7 = vadd.f32 1.0, %v5983_v53 }
0x13ba   :  { %5988 = vrcp.f32 %v3271_v57 }
0x13bb   :  { %v5985_v19 = vpop.eup %5984  ;;  %5990 = vrcp.f32 %v3270_v7 }
0x13bc   :  { %v5987_v34 = vpop.eup %5986  ;;  %v3273_v20 = vadd.f32 1.0, %v5985_v19 }
0x13bd   :  { %v3272_v21 = vadd.f32 1.0, %v5987_v34 }
0x13be   :  { %5992 = vrcp.f32 %v3273_v20 }
0x13bf   :  { %5994 = vrcp.f32 %v3272_v21 }
0x13c4   :  { %v5989_v35 = vpop.eup %5988 }
0x13c5   :  { %v5991_v36 = vpop.eup %5990 }
0x13c6   :  { %v7352_v60 = vpack.c.bf16 %v5989_v35, %v5991_v36 }
0x13c8   :  { %v5993_v37 = vpop.eup %5992  ;;  %5825 = vmatpush3.bf16.msra.mxu0 %v7352_v60  ;;  %5897 = vmatpush3.bf16.msra.mxu1 %v7352_v60 }
0x13c9   :  { %v5995_v38 = vpop.eup %5994  ;;  %5826 = vmatprep.subr.bf16.mxu0 %v6287_v0  ;;  %5898 = vmatprep.subr.bf16.mxu1 %v6287_v0 }
0x13ca   :  { %v7361_v28 = vpack.c.bf16 %v5993_v37, %v5995_v38 }
0x13cc   :  { %5828 = vmatpush3.bf16.msra.mxu0 %v7361_v28  ;;  %5900 = vmatpush3.bf16.msra.mxu1 %v7361_v28 }
0x13cd   :  { %5829 = vmatprep.subr.bf16.mxu0 %v6287_v0  ;;  %5907 = vmatprep.subr.bf16.mxu1 %v6287_v0 }
0x13cf   :  { %5406 = vmatmul.mubr.msk.f32.vlgmr.msra.gmra.mrb[28].mxu0 %vm217_vm1, %v4694_v63  ;;  %5538 = vmatmul.mubr.msk.f32.vlgmr.msra.gmra.mrb[14].mxu1 %vm217_vm1, %v4718_v39 }
0x13d0   :  { %5831 = vmatpush3.bf16.msra.mxu0 %v7352_v60  ;;  %5909 = vmatpush3.bf16.msra.mxu1 %v7352_v60 }
0x13d1   :  { %5832 = vmatprep.subr.bf16.mxu0 %v6287_v0  ;;  %5910 = vmatprep.subr.bf16.mxu1 %v6287_v0 }
0x13d2   :  { %5416 = vmatprep.mubr.msk.f32.mxu0 %vm7608_vm8, %v6289_v1  ;;  %5559 = vmatprep.mubr.msk.f32.mxu1 %vm7608_vm8, %v6289_v1 }
0x13d4   :  { %5834 = vmatpush3.bf16.msra.mxu0 %v7361_v28  ;;  %5912 = vmatpush3.bf16.msra.mxu1 %v7361_v28 }
0x13d5   :  { %5835 = vmatprep.subr.bf16.mxu0 %v6287_v0 }
0x13d7   :  { %5417 = vmatmul.mubr.msk.f32.vlgmr.msra.gmra.mrb[30].mxu0 %vm217_vm1, %v4696_v41  ;;  %5560 = vmatmul.mubr.msk.f32.vlgmr.msra.gmra.mrb[16].mxu1 %vm217_vm1, %v4722_v42 }
0x13d8   :  { %5837 = vmatpush3.bf16.msra.mxu0 %v7352_v60  ;;  %5427 = vmatprep.mubr.msk.f32.mxu0 %vm7608_vm8, %v6289_v1 }
0x13d9   :  { %5838 = vmatprep.subr.bf16.mxu0 %v6287_v0 }
0x13dc   :  { %5840 = vmatpush3.bf16.msra.mxu0 %v7361_v28 }
0x13dd   :  { %5841 = vmatprep.subr.bf16.mxu0 %v6287_v0 }
0x13df   :  { %5428 = vmatmul.mubr.msk.f32.vlgmr.msra.gmra.mrb[32].mxu0 %vm217_vm1, %v4698_v44 }
0x13e0   :  { %5843 = vmatpush3.bf16.msra.mxu0 %v7352_v60  ;;  %5438 = vmatprep.mubr.msk.f32.mxu0 %vm7608_vm8, %v6289_v1 }
0x13e1   :  { %5844 = vmatprep.subr.bf16.mxu0 %v6287_v0 }
0x13e4   :  { %5846 = vmatpush3.bf16.msra.mxu0 %v7361_v28 }
0x13e5   :  { %5847 = vmatprep.subr.bf16.mxu0 %v6287_v0 }
0x13e7   :  { %5439 = vmatmul.mubr.msk.f32.vlgmr.msra.gmra.mrb[34].mxu0 %vm217_vm1, %v4700_v45 }
0x13e8   :  { %5849 = vmatpush3.bf16.msra.mxu0 %v7352_v60  ;;  %5449 = vmatprep.mubr.msk.f32.mxu0 %vm7608_vm8, %v6289_v1 }
0x13e9   :  { %5850 = vmatprep.subr.bf16.mxu0 %v6287_v0 }
0x13ec   :  { %5852 = vmatpush3.bf16.msra.mxu0 %v7361_v28 }
0x13ed   :  { %5853 = vmatprep.subr.bf16.mxu0 %v6287_v0 }
0x13ef   :  { %5450 = vmatmul.mubr.msk.f32.vlgmr.msra.gmra.mrb[36].mxu0 %vm217_vm1, %v4702_v47 }
0x13f0   :  { %5855 = vmatpush3.bf16.msra.mxu0 %v7352_v60  ;;  %5460 = vmatprep.mubr.msk.f32.mxu0 %vm7608_vm8, %v6289_v1 }
0x13f1   :  { %5856 = vmatprep.subr.bf16.mxu0 %v6287_v0 }
0x13f4   :  { %5858 = vmatpush3.bf16.msra.mxu0 %v7361_v28 }
0x13f5   :  { %5859 = vmatprep.subr.bf16.mxu0 %v6287_v0 }
0x13f7   :  { %5461 = vmatmul.mubr.msk.f32.vlgmr.msra.gmra.mrb[38].mxu0 %vm217_vm1, %v4704_v49 }
0x13f8   :  { %5861 = vmatpush3.bf16.msra.mxu0 %v7352_v60  ;;  %5471 = vmatprep.mubr.msk.f32.mxu0 %vm7608_vm8, %v6289_v1 }
0x13f9   :  { %5862 = vmatprep.subr.bf16.mxu0 %v6287_v0 }
0x13fc   :  { %5864 = vmatpush3.bf16.msra.mxu0 %v7361_v28 }
0x13fd   :  { %5865 = vmatprep.subr.bf16.mxu0 %v6287_v0 }
0x13ff   :  { %5472 = vmatmul.mubr.msk.f32.vlgmr.msra.gmra.mrb[40].mxu0 %vm217_vm1, %v4706_v31 }
0x1400   :  { %5867 = vmatpush3.bf16.msra.mxu0 %v7352_v60  ;;  %5482 = vmatprep.mubr.msk.f32.mxu0 %vm7608_vm8, %v6289_v1 }
0x1401   :  { %5868 = vmatprep.subr.bf16.mxu0 %v6287_v0 }
0x1404   :  { %5870 = vmatpush3.bf16.msra.mxu0 %v7361_v28 }
0x1405   :  { %5871 = vmatprep.subr.bf16.mxu0 %v6287_v0 }
0x1407   :  { %5483 = vmatmul.mubr.msk.f32.vlgmr.msra.gmra.mrb[42].mxu0 %vm217_vm1, %v4708_v23 }
0x1408   :  { %5873 = vmatpush3.bf16.msra.mxu0 %v7352_v60  ;;  %5493 = vmatprep.mubr.msk.f32.mxu0 %vm7608_vm8, %v6289_v1 }
0x1409   :  { %5874 = vmatprep.subr.bf16.mxu0 %v6287_v0 }
0x140c   :  { %5876 = vmatpush3.bf16.msra.mxu0 %v7361_v28 }
0x140d   :  { %5877 = vmatprep.subr.bf16.mxu0 %v6287_v0 }
0x140f   :  { %5494 = vmatmul.mubr.msk.f32.vlgmr.msra.gmra.mrb[44].mxu0 %vm217_vm1, %v4710_v24 }
0x1410   :  { %5879 = vmatpush3.bf16.msra.mxu0 %v7352_v60  ;;  %5504 = vmatprep.mubr.msk.f32.mxu0 %vm7608_vm8, %v6289_v1 }
0x1411   :  { %5880 = vmatprep.subr.bf16.mxu0 %v6287_v0 }
0x1414   :  { %5882 = vmatpush3.bf16.msra.mxu0 %v7361_v28 }
0x1415   :  { %5883 = vmatprep.subr.bf16.mxu0 %v6287_v0 }
0x1417   :  { %5505 = vmatmul.mubr.msk.f32.vlgmr.msra.gmra.mrb[46].mxu0 %vm217_vm1, %v4712_v55 }
0x1418   :  { %5885 = vmatpush3.bf16.msra.mxu0 %v7352_v60  ;;  %5515 = vmatprep.mubr.msk.f32.mxu0 %vm7608_vm8, %v6289_v1 }
0x1419   :  { %5886 = vmatprep.subr.bf16.mxu0 %v6287_v0 }
0x141c   :  { %5888 = vmatpush3.bf16.msra.mxu0 %v7361_v28 }
0x141d   :  { %5889 = vmatprep.subr.bf16.mxu0 %v6287_v0 }
0x141f   :  { %5516 = vmatmul.mubr.msk.f32.vlgmr.msra.gmra.mrb[48].mxu0 %vm217_vm1, %v4714_v59 }
0x1420   :  { %5891 = vmatpush3.bf16.msra.mxu0 %v7352_v60  ;;  %5526 = vmatprep.mubr.msk.f32.mxu0 %vm7608_vm8, %v6289_v1 }
0x1421   :  { %5892 = vmatprep.subr.bf16.mxu0 %v6287_v0 }
0x1424   :  { %5894 = vmatpush3.bf16.msra.mxu0 %v7361_v28 }
0x1425   :  { %5901 = vmatprep.subr.bf16.mxu0 %v6287_v0 }
0x1427   :  { %5527 = vmatmul.mubr.msk.f32.vlgmr.msra.gmra.mrb[50].mxu0 %vm217_vm1, %v4716_v29 }
0x1428   :  { %5903 = vmatpush3.bf16.msra.mxu0 %v7352_v60  ;;  %5548 = vmatprep.mubr.msk.f32.mxu0 %vm7608_vm8, %v6289_v1 }
0x1429   :  { %5904 = vmatprep.subr.bf16.mxu0 %v6287_v0 }
0x142c   :  { %5906 = vmatpush3.bf16.msra.mxu0 %v7361_v28 }
0x142d   :  { %5913 = vmatprep.subr.bf16.mxu0 %v6287_v0 }
0x142f   :  { %5549 = vmatmul.mubr.msk.f32.vlgmr.msra.gmra.mrb[52].mxu0 %vm217_vm1, %v4720_v27 }
0x1430   :  { %5915 = vmatpush3.bf16.msra.mxu0 %v7352_v60  ;;  %5570 = vmatprep.mubr.msk.f32.mxu0 %vm7608_vm8, %v6289_v1 }
0x1431   :  { %5916 = vmatprep.subr.bf16.mxu0 %v6287_v0 }
0x1434   :  { %5918 = vmatpush3.bf16.msra.mxu0 %v7361_v28 }
0x1437   :  { %5571 = vmatmul.mubr.msk.f32.vlgmr.msra.gmra.mrb[54].mxu0 %vm217_vm1, %v4724_v5 }
0x14a2   :  { %v3355_v6 = vpop.f32.mrb[28].mxu0  ;;  %v4279_v58 = vpop.f32.mrb[14].mxu1 }
0x14a3   :  { %v5407_v8 = vpop.f32.mrb[29].mxu0  ;;  %4555 = vrot.lane.b32.xlu0 %v4279_v58, %s6290_s23  ;;  %v5539_v9 = vpop.f32.mrb[15].mxu1 }
0x14aa   :  { %v3432_v10 = vpop.f32.mrb[30].mxu0  ;;  %v4433_v11 = vpop.f32.mrb[16].mxu1 }
0x14ab   :  { %4515 = vrot.lane.b32.xlu1 %v3432_v10, %s6295_s12  ;;  %v5418_v61 = vpop.f32.mrb[31].mxu0  ;;  %4563 = vrot.lane.b32.xlu0 %v4433_v11, %s6291_s0  ;;  %v5561_v0 = vpop.f32.mrb[17].mxu1 }
0x14b2   :  { %v3509_v26 = vpop.f32.mrb[32].mxu0 }
0x14b3   :  { %4519 = vrot.lane.b32.xlu1 %v3509_v26, %s6294_s5  ;;  %v5429_v1 = vpop.f32.mrb[33].mxu0 }
0x14ba   :  { %v3586_v12 = vpop.f32.mrb[34].mxu0 }
0x14bb   :  { %4523 = vrot.lane.b32.xlu1 %v3586_v12, %s6296_s16  ;;  %v5440_v13 = vpop.f32.mrb[35].mxu0 }
0x14c2   :  { %v3663_v50 = vpop.f32.mrb[36].mxu0 }
0x14c3   :  { %4527 = vrot.lane.b32.xlu1 %v3663_v50, %s6290_s23  ;;  %v5451_v51 = vpop.f32.mrb[37].mxu0  ;;  %s6304_s23 = smov [#allocation20]  }
0x14ca   :  { %v3740_v14 = vpop.f32.mrb[38].mxu0 }
0x14cb   :  { %4531 = vrot.lane.b32.xlu1 %v3740_v14, %s6293_s29  ;;  %v5462_v15 = vpop.f32.mrb[39].mxu0 }
0x14d2   :  { %v3817_v16 = vpop.f32.mrb[40].mxu0 }
0x14d3   :  { %4535 = vrot.lane.b32.xlu1 %v3817_v16, %s6291_s0  ;;  %v5473_v17 = vpop.f32.mrb[41].mxu0  ;;  %s4602_s0 = sshll.u32 %s6304_s23, 4  ;;  %s4603_s0 = int_to_ptr.vmem [resolvable:$true] %s4602_s0 }
0x14d4   :  { %p6243_p5 = scmp.lt.s32.totalorder %s4603_s0, %s4603_s0 }
0x14da   :  { %v3894_v18 = vpop.f32.mrb[42].mxu0 }
0x14db   :  { %4539 = vrot.lane.b32.xlu1 %v3894_v18, %s6292_s24  ;;  %v5484_v53 = vpop.f32.mrb[43].mxu0 }
0x14e2   :  { %v3971_v57 = vpop.f32.mrb[44].mxu0 }
0x14e3   :  { %v5495_v7 = vpop.f32.mrb[45].mxu0 }
0x14ea   :  { %v4048_v19 = vpop.f32.mrb[46].mxu0 }
0x14eb   :  { %4543 = vrot.lane.b32.xlu0 %v4048_v19, %s6295_s12  ;;  %v5506_v34 = vpop.f32.mrb[47].mxu0 }
0x14f2   :  { %v4125_v20 = vpop.f32.mrb[48].mxu0 }
0x14f3   :  { %4547 = vrot.lane.b32.xlu0 %v4125_v20, %s6294_s5  ;;  %v5517_v21 = vpop.f32.mrb[49].mxu0 }
0x14fa   :  { %v4202_v33 = vpop.f32.mrb[50].mxu0 }
0x14fb   :  { %4551 = vrot.lane.b32.xlu0 %v4202_v33, %s6296_s16  ;;  %v5528_v35 = vpop.f32.mrb[51].mxu0 }
0x1502   :  { %v4356_v36 = vpop.f32.mrb[52].mxu0 }
0x1503   :  { %4559 = vrot.lane.b32.xlu0 %v4356_v36, %s6293_s29  ;;  %v5550_v3 = vpop.f32.mrb[53].mxu0 }
0x150a   :  { %v4510_v60 = vpop.f32.mrb[54].mxu0 }
0x150b   :  { %4567 = vrot.lane.b32.xlu0 %v4510_v60, %s6292_s24  ;;  %v5572_v37 = vpop.f32.mrb[55].mxu0  ;;  %s6238_s24 = scalar_lea.vmem %s4603_s0, 64 }
0x150c   :  { %p6239_p4 = scmp.ne.s32.totalorder %s4603_s0, %s6238_s24  ;;  %p6244_p6 = scmp.lt.s32.totalorder %s6238_s24, %s6238_s24 }
0x150e   :  { %p6245_p7 = por %p6244_p6, %p6243_p5 }
0x1510   :  { %p6246_p8 = pnand %p6245_p7, %p6239_p4 }
0x1515   :  { %v4556_v38 = vpop.permute.xlu0 %4555 }
0x151d   :  { %v4516_v28 = vpop.permute.xlu1 %4515  ;;  %v4564_v63 = vpop.permute.xlu0 %4563 }
0x151e   :  { %v4570_v49 = vsel %vm981_vm12, %v3355_v6, %v4516_v28 }
0x1525   :  { %v4520_v39 = vpop.permute.xlu1 %4519 }
0x1526   :  { %v4571_v52 = vsel %vm217_vm1, %v4570_v49, %v4520_v39 }
0x152d   :  { %v4524_v40 = vpop.permute.xlu1 %4523 }
0x152e   :  { %v4572_v54 = vsel %vm984_vm13, %v4571_v52, %v4524_v40 }
0x1535   :  { %v4528_v41 = vpop.permute.xlu1 %4527 }
0x1536   :  { %v4573_v22 = vsel %vm565_vm10, %v4572_v54, %v4528_v41 }
0x153d   :  { %v4532_v43 = vpop.permute.xlu1 %4531 }
0x153e   :  { %v4574_v25 = vsel %vm2440_vm4, %v4573_v22, %v4532_v43 }
0x1545   :  { %v4536_v47 = vpop.permute.xlu1 %4535 }
0x1546   :  { %v4575_v55 = vsel %vm2444_vm11, %v4574_v25, %v4536_v47 }
0x154d   :  { %v4540_v24 = vpop.permute.xlu1 %4539 }
0x155d   :  { %v4544_v4 = vpop.permute.xlu0 %4543 }
0x155e   :  { %v4577_v30 = vsel %vm981_vm12, %v3971_v57, %v4544_v4  ;;  %vm7611_vm12 = vcmask 916480  }
0x155f   :  { %v4576_v2 = vsel %vm7611_vm12, %v4575_v55, %v4540_v24 }
0x1565   :  { %v4548_v42 = vpop.permute.xlu0 %4547 }
0x1566   :  { %v4578_v45 = vsel %vm217_vm1, %v4577_v30, %v4548_v42  ;;  %vm7612_vm1 = vmmov %vm7611_vm12 }
0x156d   :  { %v4552_v44 = vpop.permute.xlu0 %4551 }
0x156e   :  { %v4579_v46 = vsel %vm984_vm13, %v4578_v45, %v4552_v44 }
0x156f   :  { %v4580_v31 = vsel %vm565_vm10, %v4579_v46, %v4556_v38 }
0x1575   :  { %v4560_v48 = vpop.permute.xlu0 %4559 }
0x1576   :  { %v4581_v23 = vsel %vm2440_vm4, %v4580_v31, %v4560_v48 }
0x1577   :  { %v4582_v56 = vsel %vm2444_vm11, %v4581_v23, %v4564_v63 }
0x157d   :  { %v4568_v59 = vpop.permute.xlu0 %4567 }
0x157e   :  { %v4583_v29 = vsel %vm7612_vm1, %v4582_v56, %v4568_v59 }
0x157f   :  { %v4586_v32 = vcombine.low %v4576_v2, %v4583_v29 }
0x1581   :  { %4726 = vst.sshfl [vmem:[#allocation20] sm:$0x33 pattern:$0x76325410] %v4586_v32 }
0x1582   :  { %6249 = shalt.err (!%p6246_p8)
}
0x1583   :  { %s7613_s12 = sld [smem:[#allocation37_spill]] }
0x1589   :  { %s6250_s16 = scalar_lea.hbm %s7613_s12, 64 }
0x158a   :  { %p6251_p9 = scmp.ne.s32.totalorder %s7613_s12, %s6250_s16  ;;  %p6254_p10 = scmp.lt.u32.totalorder %s6250_s16, %s7613_s12 }
0x158c   :  { %p6256_p11 = pnand %p6254_p10, %p6251_p9 }
0x158e   :  { %6259 = shalt.err (!%p6256_p11)
}
0x158f   :  { %4605 = dma.vmem_to_hbm [thread:$0]  %s4603_s0, 64, %s7613_s12, [#allocation4]  }
0x1590   :  { %6272 = dma.done.wait [#allocation4], 64  }
0x1591   :  { %6273 = vsyncadd [#allocation4], 4294967232 }
0x1592   :  { %4609 = vsyncpa [#allocation3], 1 }
0x1593   :  { %4610 = vsyncpa [#allocation6], 1 }
0x1594   :  { %4611 = vsyncpa [#allocation9], 1 }
0x1595   :  { %4612 = vsyncpa [#allocation12], 1 }
0x1596   :  { %4613 = vsyncpa [#allocation15], 1 }
0x1597   :  { %4614 = vsyncpa [#allocation18], 1 }
0x1598   :  { %4615 = vsyncpa [#allocation4], 1 }

</bundles_post_ra>
